<compile_context>
chip_gen: v6e
topology: v6e:2x2x1
jax: 0.10.0
libtpu: 0.0.40
codegen_flags: <defaults>
</compile_context>

<pallas_src>
import functools
import math

import jax
import jax.numpy as jnp
from jax.experimental import pallas as pl
from jax.experimental.pallas import tpu as pltpu


# --------------------------------------------------------------------------
# Static helpers
# --------------------------------------------------------------------------
def _unique_offsets(rates):
    """Unique (dy, dx) taps across all dilation rates (centre tap shared)."""
    offs = []
    for r in rates:
        for ky in (-1, 0, 1):
            for kx in (-1, 0, 1):
                o = (ky * r, kx * r)
                if o not in offs:
                    offs.append(o)
    return tuple(sorted(offs))


def _divisors(n):
    return [d for d in range(1, n + 1) if n % d == 0]


def _pick_tiling(H, W, max_pixels):
    """Pick (tile_h, W_pad): tile_h divides H, tile_h * W_pad is a multiple of
    128 (lane-dense flattened stores) and <= max_pixels.  When the native
    width has no 128-friendly tile, pad W minimally (the padded columns are
    computed on zeros and sliced off in the wrapper)."""
    best = None
    for t in _divisors(H):
        if t * W <= max_pixels and (t * W) % 128 == 0:
            best = t
    if best is not None:
        return best, W
    for t in sorted(_divisors(H), reverse=True):
        step = 128 // math.gcd(t, 128)
        w_pad = ((W + step - 1) // step) * step
        if t * w_pad <= max_pixels:
            return t, w_pad
    # Degenerate (extremely wide rows): fall back to a full-image tile, which
    # is always a legal block (block dims equal the full array dims).
    return H, W


def _pick_tile_cin(Cin, cap):
    if Cin <= cap:
        return Cin
    t = (cap // 128) * 128
    while t >= 128:
        if Cin % t == 0:
            return t
        t -= 128
    return Cin


def _vmem_capacity_bytes():
    try:
        cap = int(pltpu.get_tpu_info().vmem_capacity_bytes)
        if cap > 0:
            return cap
    except Exception:
        pass
    return 64 * 1024 * 1024   # conservative fallback (v7x per-core VMEM)


# --------------------------------------------------------------------------
# Kernel
# --------------------------------------------------------------------------
def _make_aspp_kernel(W_pad, Cout, tile_h, maxr, offsets, cin_tile,
                      weights_resident, channel_major):
    U = len(offsets)
    tile_px = tile_h * W_pad

    # Group taps by dx so only one column strip is live at a time.
    by_dx = {}
    for u, (dy, dx) in enumerate(offsets):
        by_dx.setdefault(dx, []).append((u, dy))

    def kernel(x_ref, w_ref, b_ref, o_ref, acc_ref):
        # x_ref  : (tile_h + 2*maxr, Wp, cin_tile)  halo strip, one Cin chunk
        # w_ref  : (n_k*U or U, cin_tile, Cout)     folded tap weights
        # b_ref  : (1, Cout)                        summed biases (f32)
        # o_ref  : (Cout, tile_px) or (tile_px, Cout)
        # acc_ref: (tile_px, Cout) f32              Cin-reduction accumulator
        k = pl.program_id(2)

        @pl.when(k == 0)
        def _init():
            # Fold the summed bias directly into the accumulator init.
            acc_ref[...] = jnp.broadcast_to(b_ref[...], (tile_px, Cout))

        w_base = k * U if weights_resident else 0

        part = None
        for dx in sorted(by_dx):
            # One live column strip per unique dx; the per-dy row windows
            # below are cheap major-dim slices of it.
            strip = x_ref[:, dx + maxr:dx + maxr + W_pad, :]
            for u, dy in by_dx[dx]:
                win = jax.lax.slice_in_dim(strip, dy + maxr,
                                           dy + maxr + tile_h, axis=0)
                win = win.reshape(tile_px, cin_tile)
                contrib = jax.lax.dot_general(
                    win, w_ref[w_base + u], (((1,), (0,)), ((), ())),
                    preferred_element_type=jnp.float32)
                part = contrib if part is None else part + contrib

        # Single accumulator read-modify-write per grid step.
        acc_ref[...] += part

        @pl.when(k == pl.num_programs(2) - 1)
        def _finalize():
            if channel_major:
                # Cout < 128: cast first, then transpose for lane-dense store.
                o_ref[...] = jnp.transpose(acc_ref[...].astype(o_ref.dtype))
            else:
                # Cout >= 128: (tile_px, Cout) is already lane-dense.
                o_ref[...] = acc_ref[...].astype(o_ref.dtype)

    return kernel


# --------------------------------------------------------------------------
# Wrapper
# --------------------------------------------------------------------------
@functools.partial(jax.jit, static_argnames=("rates", "compute_dtype",
                                              "cin_tile", "max_tile_pixels",
                                              "weights_resident"))
def aspp_forward(x_nchw, weights, biases, rates, compute_dtype=jnp.float32,
                 cin_tile=None, max_tile_pixels=None, weights_resident=None):
    """ASPP forward.

    x_nchw  : (N, Cin, H, W)
    weights : (S, Cout, Cin, 3, 3)  PyTorch OIHW layout, one conv per rate
    biases  : (S, Cout)
    rates   : tuple of ints (static)
    returns : (N, Cout, H, W)
    """
    N, Cin, H, W = x_nchw.shape
    S, Cout = biases.shape
    rates = tuple(int(r) for r in rates)
    assert S == len(rates) and weights.shape == (S, Cout, Cin, 3, 3)
    maxr = max(rates)
    offsets = _unique_offsets(rates)
    U = len(offsets)

    # ---- generation-aware tiling parameters -------------------------------
    vmem_cap = _vmem_capacity_bytes()
    small_vmem = vmem_cap <= 64 * 1024 * 1024
    if max_tile_pixels is None:
        base_px = 2048 if small_vmem else 4096
        max_tile_pixels = max(128, min(base_px, (4 << 20) // max(4 * Cout, 1)))
    if cin_tile is None:
        cin_tile = _pick_tile_cin(Cin, 256 if small_vmem else 512)
    assert Cin % cin_tile == 0 and (cin_tile == Cin or cin_tile % 128 == 0)
    n_k = Cin // cin_tile

    tile_h, W_pad = _pick_tiling(H, W, max_tile_pixels)
    n_h = H // tile_h
    halo_h = tile_h + 2 * maxr
    tile_px = tile_h * W_pad
    Wp = W_pad + 2 * maxr
    channel_major = Cout < 128

    # ---- operand layout ----------------------------------------------------
    # NCHW -> NHWC, zero-pad (halo + optional lane padding of W), then slice
    # into per-h-tile halo strips so each grid step DMAs only its own strip.
    # TODO(synk): move halo extraction in-kernel (pl.ANY + make_async_copy)
    # to avoid this extra HBM copy of the input.
    x_nhwc = jnp.transpose(x_nchw, (0, 2, 3, 1)).astype(compute_dtype)
    xpad = jnp.pad(x_nhwc, ((0, 0), (maxr, maxr),
                            (maxr, maxr + (W_pad - W)), (0, 0)))
    if n_h == 1:
        strips = xpad[:, None]                       # (N, 1, Hp, Wp, Cin)
    else:
        strips = jnp.stack(
            [xpad[:, h * tile_h:h * tile_h + halo_h] for h in range(n_h)],
            axis=1)                                  # (N, n_h, halo_h, Wp, Cin)

    # Sum weights of taps sharing the same (dy, dx) offset across rates
    # (valid by linearity; the centre tap is shared by every rate).
    tap = {o: None for o in offsets}
    for s, r in enumerate(rates):
        for ky in range(3):
            for kx in range(3):
                o = ((ky - 1) * r, (kx - 1) * r)
                m = jnp.transpose(weights[s, :, :, ky, kx], (1, 0))  # (Cin,Cout)
                tap[o] = m if tap[o] is None else tap[o] + m
    w_u = jnp.stack([tap[o] for o in offsets], axis=0)        # (U, Cin, Cout)
    w_u = w_u.reshape(U, n_k, cin_tile, Cout).transpose(1, 0, 2, 3)
    w_u = w_u.reshape(n_k * U, cin_tile, Cout).astype(compute_dtype)

    # sum_i stage_i(x) == (sum of convs) + (sum of biases)
    b_sum = jnp.sum(biases, axis=0).reshape(1, Cout).astype(jnp.float32)

    # ---- VMEM budget / weight residency ------------------------------------
    isz = jnp.dtype(compute_dtype).itemsize
    osz = jnp.dtype(x_nchw.dtype).itemsize
    in_block = halo_h * Wp * cin_tile * isz
    w_total = n_k * U * cin_tile * Cout * isz
    w_chunk = U * cin_tile * Cout * isz
    out_block = tile_px * Cout * osz
    acc_bytes = tile_px * Cout * 4
    base_bytes = (2 * in_block          # double-buffered halo strip
                  + 2 * out_block       # double-buffered output tile
                  + acc_bytes           # f32 accumulator scratch
                  + 2 * in_block        # strip-slice temporaries headroom
                  + 2 * acc_bytes)      # local f32 partial headroom
    if weights_resident is None:
        weights_resident = (base_bytes + 2 * w_total) <= int(0.6 * vmem_cap)
    w_bytes = 2 * (w_total if weights_resident else w_chunk)
    vmem_limit = int(min(max(base_bytes + w_bytes + (8 << 20), 32 << 20),
                         0.95 * vmem_cap))

    kernel = _make_aspp_kernel(W_pad, Cout, tile_h, maxr, offsets, cin_tile,
                               weights_resident, channel_major)

    if weights_resident:
        w_spec = pl.BlockSpec((n_k * U, cin_tile, Cout),
                              lambda n, h, k: (0, 0, 0))
    else:
        w_spec = pl.BlockSpec((U, cin_tile, Cout),
                              lambda n, h, k: (k, 0, 0))

    if channel_major:
        out_shape = jax.ShapeDtypeStruct((N, Cout, H * W_pad), x_nchw.dtype)
        out_spec = pl.BlockSpec((None, Cout, tile_px),
                                lambda n, h, k: (n, 0, h))
    else:
        out_shape = jax.ShapeDtypeStruct((N, H * W_pad, Cout), x_nchw.dtype)
        out_spec = pl.BlockSpec((None, tile_px, Cout),
                                lambda n, h, k: (n, h, 0))

    out_flat = pl.pallas_call(
        kernel,
        out_shape=out_shape,
        grid_spec=pltpu.PrefetchScalarGridSpec(
            num_scalar_prefetch=0,
            grid=(N, n_h, n_k),                     # Cin reduction innermost
            in_specs=[
                pl.BlockSpec((None, None, halo_h, Wp, cin_tile),
                             lambda n, h, k: (n, h, 0, 0, k)),
                w_spec,
                pl.BlockSpec((1, Cout), lambda n, h, k: (0, 0)),
            ],
            out_specs=out_spec,
            scratch_shapes=[pltpu.VMEM((tile_px, Cout), jnp.float32)],
        ),
        compiler_params=pltpu.CompilerParams(
            dimension_semantics=("parallel", "parallel", "arbitrary"),
            vmem_limit_bytes=vmem_limit,
        ),
    )(strips, w_u, b_sum)

    if channel_major:
        out = out_flat.reshape(N, Cout, H, W_pad)
        if W_pad != W:
            out = out[:, :, :, :W]
    else:
        out = out_flat.reshape(N, H, W_pad, Cout)
        if W_pad != W:
            out = out[:, :, :W, :]
        out = jnp.transpose(out, (0, 3, 1, 2))
    return out


# --------------------------------------------------------------------------
# Pure-JAX reference & tests
# --------------------------------------------------------------------------
def _reference_aspp(x_nchw, weights, biases, rates):
    out = 0.0
    for i, r in enumerate(rates):
        y = jax.lax.conv_general_dilated(
            x_nchw, weights[i],
            window_strides=(1, 1),
            padding=((r, r), (r, r)),
            rhs_dilation=(r, r),
            dimension_numbers=("NCHW", "OIHW", "NCHW"))
        out = out + y + biases[i][None, :, None, None]
    return out


def _check(name, out, ref, atol, rtol):
    assert out.shape == ref.shape, (name, out.shape, ref.shape)
    err = float(jnp.max(jnp.abs(out.astype(jnp.float32) - ref)))
    assert jnp.allclose(out, ref, atol=atol, rtol=rtol), (name, err)


if __name__ == "__main__":
    key = jax.random.PRNGKey(0)
    ks = jax.random.split(key, 10)

    # --- Test 1: module-sized shapes, f32, zero bias (PyTorch init) --------
    N, Cin, Cout, H, W = 2, 4, 8, 16, 16
    rates = (1, 2, 3)
    x1 = jax.random.normal(ks[0], (N, Cin, H, W), dtype=jnp.float32)
    w1 = 0.01 * jax.random.normal(ks[1], (len(rates), Cout, Cin, 3, 3),
                                  dtype=jnp.float32)
    b1 = jnp.zeros((len(rates), Cout), dtype=jnp.float32)
    out1 = jax.block_until_ready(aspp_forward(x1, w1, b1, rates))
    ref1 = _reference_aspp(x1, w1, b1, rates)
    _check("t1", out1, ref1, 1e-5, 1e-5)

    # --- Test 2: Cin-reduction (n_k=2), halo-tiled H (n_h=2), streamed W ---
    rates2 = (2, 4)
    x2 = jax.random.normal(ks[2], (1, 256, 16, 16), dtype=jnp.float32)
    w2 = 0.01 * jax.random.normal(ks[3], (2, 32, 256, 3, 3), dtype=jnp.float32)
    b2 = 0.01 * jnp.arange(2 * 32, dtype=jnp.float32).reshape(2, 32)
    out2 = jax.block_until_ready(
        aspp_forward(x2, w2, b2, rates2, cin_tile=128, max_tile_pixels=128,
                     weights_resident=False))
    ref2 = _reference_aspp(x2, w2, b2, rates2)
    _check("t2", out2, ref2, 5e-4, 5e-4)

    # --- Test 3: Cout >= 128 path (no in-kernel transpose) -----------------
    rates3 = (1, 2)
    x3 = jax.random.normal(ks[4], (1, 128, 8, 16), dtype=jnp.float32)
    w3 = 0.01 * jax.random.normal(ks[5], (2, 128, 128, 3, 3), dtype=jnp.float32)
    b3 = 0.01 * jnp.arange(2 * 128, dtype=jnp.float32).reshape(2, 128)
    out3 = jax.block_until_ready(aspp_forward(x3, w3, b3, rates3))
    ref3 = _reference_aspp(x3, w3, b3, rates3)
    _check("t3", out3, ref3, 5e-4, 5e-4)

    # --- Test 4: awkward W (12): minimal lane padding, sliced off ----------
    rates4 = (1, 2)
    x4 = jax.random.normal(ks[6], (1, 4, 8, 12), dtype=jnp.float32)
    w4 = 0.01 * jax.random.normal(ks[7], (2, 8, 4, 3, 3), dtype=jnp.float32)
    b4 = 0.01 * jnp.arange(2 * 8, dtype=jnp.float32).reshape(2, 8)
    out4 = jax.block_until_ready(aspp_forward(x4, w4, b4, rates4))
    ref4 = _reference_aspp(x4, w4, b4, rates4)
    _check("t4", out4, ref4, 1e-5, 1e-5)

    # --- Test 5: bf16 operands, f32 accumulation (loose tolerance) ---------
    out5 = jax.block_until_ready(
        aspp_forward(x1, w1, b1, rates, compute_dtype=jnp.bfloat16))
    _check("t5", out5, ref1, 2e-2, 2e-2)

    print("KERNEL_OK")
</pallas_src>

<mosaic_0001>
module attributes {stable_mosaic.version = 11 : i64} {
  func.func @kernel(%arg0: i32, %arg1: i32, %arg2: i32, %arg3: memref<1x1x22x22x4xf32, #tpu.memory_space<vmem>>, %arg4: memref<25x4x8xf32, #tpu.memory_space<vmem>>, %arg5: memref<1x8xf32, #tpu.memory_space<vmem>>, %arg6: memref<1x8x256xf32, #tpu.memory_space<vmem>>, %arg7: memref<256x8xf32, #tpu.memory_space<vmem>>) attributes {dimension_semantics = [#tpu.dimension_semantics<parallel>, #tpu.dimension_semantics<parallel>, #tpu.dimension_semantics<arbitrary>], iteration_bounds = array<i64: 2, 1, 1>, scalar_prefetch = 0 : i64, scratch_operands = 1 : i64, tpu.core_type = #tpu.core_type<tc>, window_params = [{transform_indices = @transform_0, window_bounds = array<i64: 1, 1, 22, 22, 4>}, {pipeline_mode = #tpu.pipeline_mode<synchronous>, transform_indices = @transform_1, window_bounds = array<i64: 25, 4, 8>}, {pipeline_mode = #tpu.pipeline_mode<synchronous>, transform_indices = @transform_2, window_bounds = array<i64: 1, 8>}, {transform_indices = @transform_3, window_bounds = array<i64: 1, 8, 256>}]} {
    %c0_i32 = arith.constant 0 : i32
    %0 = arith.cmpi eq, %arg2, %c0_i32 : i32
    %1 = arith.extui %0 : i1 to i32
    %c0_i32_0 = arith.constant 0 : i32
    %2 = arith.cmpi ne, %1, %c0_i32_0 : i32
    scf.if %2 {
      %c0_110 = arith.constant 0 : index
      %c0_111 = arith.constant 0 : index
      %223 = vector.load %arg5[%c0_110, %c0_111] : memref<1x8xf32, #tpu.memory_space<vmem>>, vector<1x8xf32>
      %224 = vector.shape_cast %223 : vector<1x8xf32> to vector<1x8xf32>
      %225 = vector.broadcast %224 : vector<1x8xf32> to vector<256x8xf32>
      %c0_112 = arith.constant 0 : index
      %c0_113 = arith.constant 0 : index
      %226 = vector.load %arg7[%c0_112, %c0_113] : memref<256x8xf32, #tpu.memory_space<vmem>>, vector<256x8xf32>
      tpu.vector_store %arg7[%c0_112, %c0_113], %225 {strides = array<i32>} : memref<256x8xf32, #tpu.memory_space<vmem>>, vector<256x8xf32>,
    } else {
    }
    %c25_i32 = arith.constant 25 : i32
    %3 = arith.muli %arg2, %c25_i32 : i32
    %c0 = arith.constant 0 : index
    %c0_1 = arith.constant 0 : index
    %c0_2 = arith.constant 0 : index
    %c0_3 = arith.constant 0 : index
    %c0_4 = arith.constant 0 : index
    %4 = vector.load %arg3[%c0, %c0_1, %c0_2, %c0_3, %c0_4] : memref<1x1x22x22x4xf32, #tpu.memory_space<vmem>>, vector<1x1x22x16x4xf32>
    %5 = vector.shape_cast %4 : vector<1x1x22x16x4xf32> to vector<22x16x4xf32>
    %6 = vector.extract_strided_slice %5 {offsets = [0, 0, 0], sizes = [16, 16, 4], strides = [1, 1, 1]} : vector<22x16x4xf32> to vector<16x16x4xf32>
    %7 = vector.shape_cast %6 : vector<16x16x4xf32> to vector<256x4xf32>
    %c0_i32_5 = arith.constant 0 : i32
    %8 = arith.addi %3, %c0_i32_5 : i32
    %9 = arith.index_cast %8 : i32 to index
    %c0_6 = arith.constant 0 : index
    %c0_7 = arith.constant 0 : index
    %10 = vector.load %arg4[%9, %c0_6, %c0_7] : memref<25x4x8xf32, #tpu.memory_space<vmem>>, vector<1x4x8xf32>
    %11 = vector.shape_cast %10 : vector<1x4x8xf32> to vector<4x8xf32>
    %cst = arith.constant dense<0.000000e+00> : vector<256x8xf32>
    %12 = tpu.matmul %7, %11, %cst {dimension_numbers = #tpu.dot_dimension_numbers<[1], [0], [0], [1], [0, 0, 1, 1], [], []>} : vector<256x4xf32>, vector<4x8xf32>, vector<256x8xf32> -> vector<256x8xf32>
    %13 = vector.extract_strided_slice %5 {offsets = [3, 0, 0], sizes = [16, 16, 4], strides = [1, 1, 1]} : vector<22x16x4xf32> to vector<16x16x4xf32>
    %14 = vector.shape_cast %13 : vector<16x16x4xf32> to vector<256x4xf32>
    %c9_i32 = arith.constant 9 : i32
    %15 = arith.addi %3, %c9_i32 : i32
    %16 = arith.index_cast %15 : i32 to index
    %c0_8 = arith.constant 0 : index
    %c0_9 = arith.constant 0 : index
    %17 = vector.load %arg4[%16, %c0_8, %c0_9] : memref<25x4x8xf32, #tpu.memory_space<vmem>>, vector<1x4x8xf32>
    %18 = vector.shape_cast %17 : vector<1x4x8xf32> to vector<4x8xf32>
    %cst_10 = arith.constant dense<0.000000e+00> : vector<256x8xf32>
    %19 = tpu.matmul %14, %18, %cst_10 {dimension_numbers = #tpu.dot_dimension_numbers<[1], [0], [0], [1], [0, 0, 1, 1], [], []>} : vector<256x4xf32>, vector<4x8xf32>, vector<256x8xf32> -> vector<256x8xf32>
    %20 = arith.addf %12, %19 : vector<256x8xf32>
    %21 = vector.extract_strided_slice %5 {offsets = [6, 0, 0], sizes = [16, 16, 4], strides = [1, 1, 1]} : vector<22x16x4xf32> to vector<16x16x4xf32>
    %22 = vector.shape_cast %21 : vector<16x16x4xf32> to vector<256x4xf32>
    %c22_i32 = arith.constant 22 : i32
    %23 = arith.addi %3, %c22_i32 : i32
    %24 = arith.index_cast %23 : i32 to index
    %c0_11 = arith.constant 0 : index
    %c0_12 = arith.constant 0 : index
    %25 = vector.load %arg4[%24, %c0_11, %c0_12] : memref<25x4x8xf32, #tpu.memory_space<vmem>>, vector<1x4x8xf32>
    %26 = vector.shape_cast %25 : vector<1x4x8xf32> to vector<4x8xf32>
    %cst_13 = arith.constant dense<0.000000e+00> : vector<256x8xf32>
    %27 = tpu.matmul %22, %26, %cst_13 {dimension_numbers = #tpu.dot_dimension_numbers<[1], [0], [0], [1], [0, 0, 1, 1], [], []>} : vector<256x4xf32>, vector<4x8xf32>, vector<256x8xf32> -> vector<256x8xf32>
    %28 = arith.addf %20, %27 : vector<256x8xf32>
    %c0_14 = arith.constant 0 : index
    %c0_15 = arith.constant 0 : index
    %c0_16 = arith.constant 0 : index
    %c1 = arith.constant 1 : index
    %c0_17 = arith.constant 0 : index
    %29 = vector.load %arg3[%c0_14, %c0_15, %c0_16, %c1, %c0_17] : memref<1x1x22x22x4xf32, #tpu.memory_space<vmem>>, vector<1x1x22x16x4xf32>
    %30 = vector.shape_cast %29 : vector<1x1x22x16x4xf32> to vector<22x16x4xf32>
    %31 = vector.extract_strided_slice %30 {offsets = [1, 0, 0], sizes = [16, 16, 4], strides = [1, 1, 1]} : vector<22x16x4xf32> to vector<16x16x4xf32>
    %32 = vector.shape_cast %31 : vector<16x16x4xf32> to vector<256x4xf32>
    %c3_i32 = arith.constant 3 : i32
    %33 = arith.addi %3, %c3_i32 : i32
    %34 = arith.index_cast %33 : i32 to index
    %c0_18 = arith.constant 0 : index
    %c0_19 = arith.constant 0 : index
    %35 = vector.load %arg4[%34, %c0_18, %c0_19] : memref<25x4x8xf32, #tpu.memory_space<vmem>>, vector<1x4x8xf32>
    %36 = vector.shape_cast %35 : vector<1x4x8xf32> to vector<4x8xf32>
    %cst_20 = arith.constant dense<0.000000e+00> : vector<256x8xf32>
    %37 = tpu.matmul %32, %36, %cst_20 {dimension_numbers = #tpu.dot_dimension_numbers<[1], [0], [0], [1], [0, 0, 1, 1], [], []>} : vector<256x4xf32>, vector<4x8xf32>, vector<256x8xf32> -> vector<256x8xf32>
    %38 = arith.addf %28, %37 : vector<256x8xf32>
    %39 = vector.extract_strided_slice %30 {offsets = [3, 0, 0], sizes = [16, 16, 4], strides = [1, 1, 1]} : vector<22x16x4xf32> to vector<16x16x4xf32>
    %40 = vector.shape_cast %39 : vector<16x16x4xf32> to vector<256x4xf32>
    %c10_i32 = arith.constant 10 : i32
    %41 = arith.addi %3, %c10_i32 : i32
    %42 = arith.index_cast %41 : i32 to index
    %c0_21 = arith.constant 0 : index
    %c0_22 = arith.constant 0 : index
    %43 = vector.load %arg4[%42, %c0_21, %c0_22] : memref<25x4x8xf32, #tpu.memory_space<vmem>>, vector<1x4x8xf32>
    %44 = vector.shape_cast %43 : vector<1x4x8xf32> to vector<4x8xf32>
    %cst_23 = arith.constant dense<0.000000e+00> : vector<256x8xf32>
    %45 = tpu.matmul %40, %44, %cst_23 {dimension_numbers = #tpu.dot_dimension_numbers<[1], [0], [0], [1], [0, 0, 1, 1], [], []>} : vector<256x4xf32>, vector<4x8xf32>, vector<256x8xf32> -> vector<256x8xf32>
    %46 = arith.addf %38, %45 : vector<256x8xf32>
    %47 = vector.extract_strided_slice %30 {offsets = [5, 0, 0], sizes = [16, 16, 4], strides = [1, 1, 1]} : vector<22x16x4xf32> to vector<16x16x4xf32>
    %48 = vector.shape_cast %47 : vector<16x16x4xf32> to vector<256x4xf32>
    %c19_i32 = arith.constant 19 : i32
    %49 = arith.addi %3, %c19_i32 : i32
    %50 = arith.index_cast %49 : i32 to index
    %c0_24 = arith.constant 0 : index
    %c0_25 = arith.constant 0 : index
    %51 = vector.load %arg4[%50, %c0_24, %c0_25] : memref<25x4x8xf32, #tpu.memory_space<vmem>>, vector<1x4x8xf32>
    %52 = vector.shape_cast %51 : vector<1x4x8xf32> to vector<4x8xf32>
    %cst_26 = arith.constant dense<0.000000e+00> : vector<256x8xf32>
    %53 = tpu.matmul %48, %52, %cst_26 {dimension_numbers = #tpu.dot_dimension_numbers<[1], [0], [0], [1], [0, 0, 1, 1], [], []>} : vector<256x4xf32>, vector<4x8xf32>, vector<256x8xf32> -> vector<256x8xf32>
    %54 = arith.addf %46, %53 : vector<256x8xf32>
    %c0_27 = arith.constant 0 : index
    %c0_28 = arith.constant 0 : index
    %c0_29 = arith.constant 0 : index
    %c2 = arith.constant 2 : index
    %c0_30 = arith.constant 0 : index
    %55 = vector.load %arg3[%c0_27, %c0_28, %c0_29, %c2, %c0_30] : memref<1x1x22x22x4xf32, #tpu.memory_space<vmem>>, vector<1x1x22x16x4xf32>
    %56 = vector.shape_cast %55 : vector<1x1x22x16x4xf32> to vector<22x16x4xf32>
    %57 = vector.extract_strided_slice %56 {offsets = [2, 0, 0], sizes = [16, 16, 4], strides = [1, 1, 1]} : vector<22x16x4xf32> to vector<16x16x4xf32>
    %58 = vector.shape_cast %57 : vector<16x16x4xf32> to vector<256x4xf32>
    %c6_i32 = arith.constant 6 : i32
    %59 = arith.addi %3, %c6_i32 : i32
    %60 = arith.index_cast %59 : i32 to index
    %c0_31 = arith.constant 0 : index
    %c0_32 = arith.constant 0 : index
    %61 = vector.load %arg4[%60, %c0_31, %c0_32] : memref<25x4x8xf32, #tpu.memory_space<vmem>>, vector<1x4x8xf32>
    %62 = vector.shape_cast %61 : vector<1x4x8xf32> to vector<4x8xf32>
    %cst_33 = arith.constant dense<0.000000e+00> : vector<256x8xf32>
    %63 = tpu.matmul %58, %62, %cst_33 {dimension_numbers = #tpu.dot_dimension_numbers<[1], [0], [0], [1], [0, 0, 1, 1], [], []>} : vector<256x4xf32>, vector<4x8xf32>, vector<256x8xf32> -> vector<256x8xf32>
    %64 = arith.addf %54, %63 : vector<256x8xf32>
    %65 = vector.extract_strided_slice %56 {offsets = [3, 0, 0], sizes = [16, 16, 4], strides = [1, 1, 1]} : vector<22x16x4xf32> to vector<16x16x4xf32>
    %66 = vector.shape_cast %65 : vector<16x16x4xf32> to vector<256x4xf32>
    %c11_i32 = arith.constant 11 : i32
    %67 = arith.addi %3, %c11_i32 : i32
    %68 = arith.index_cast %67 : i32 to index
    %c0_34 = arith.constant 0 : index
    %c0_35 = arith.constant 0 : index
    %69 = vector.load %arg4[%68, %c0_34, %c0_35] : memref<25x4x8xf32, #tpu.memory_space<vmem>>, vector<1x4x8xf32>
    %70 = vector.shape_cast %69 : vector<1x4x8xf32> to vector<4x8xf32>
    %cst_36 = arith.constant dense<0.000000e+00> : vector<256x8xf32>
    %71 = tpu.matmul %66, %70, %cst_36 {dimension_numbers = #tpu.dot_dimension_numbers<[1], [0], [0], [1], [0, 0, 1, 1], [], []>} : vector<256x4xf32>, vector<4x8xf32>, vector<256x8xf32> -> vector<256x8xf32>
    %72 = arith.addf %64, %71 : vector<256x8xf32>
    %73 = vector.extract_strided_slice %56 {offsets = [4, 0, 0], sizes = [16, 16, 4], strides = [1, 1, 1]} : vector<22x16x4xf32> to vector<16x16x4xf32>
    %74 = vector.shape_cast %73 : vector<16x16x4xf32> to vector<256x4xf32>
    %c16_i32 = arith.constant 16 : i32
    %75 = arith.addi %3, %c16_i32 : i32
    %76 = arith.index_cast %75 : i32 to index
    %c0_37 = arith.constant 0 : index
    %c0_38 = arith.constant 0 : index
    %77 = vector.load %arg4[%76, %c0_37, %c0_38] : memref<25x4x8xf32, #tpu.memory_space<vmem>>, vector<1x4x8xf32>
    %78 = vector.shape_cast %77 : vector<1x4x8xf32> to vector<4x8xf32>
    %cst_39 = arith.constant dense<0.000000e+00> : vector<256x8xf32>
    %79 = tpu.matmul %74, %78, %cst_39 {dimension_numbers = #tpu.dot_dimension_numbers<[1], [0], [0], [1], [0, 0, 1, 1], [], []>} : vector<256x4xf32>, vector<4x8xf32>, vector<256x8xf32> -> vector<256x8xf32>
    %80 = arith.addf %72, %79 : vector<256x8xf32>
    %c0_40 = arith.constant 0 : index
    %c0_41 = arith.constant 0 : index
    %c0_42 = arith.constant 0 : index
    %c3 = arith.constant 3 : index
    %c0_43 = arith.constant 0 : index
    %81 = vector.load %arg3[%c0_40, %c0_41, %c0_42, %c3, %c0_43] : memref<1x1x22x22x4xf32, #tpu.memory_space<vmem>>, vector<1x1x22x16x4xf32>
    %82 = vector.shape_cast %81 : vector<1x1x22x16x4xf32> to vector<22x16x4xf32>
    %83 = vector.extract_strided_slice %82 {offsets = [0, 0, 0], sizes = [16, 16, 4], strides = [1, 1, 1]} : vector<22x16x4xf32> to vector<16x16x4xf32>
    %84 = vector.shape_cast %83 : vector<16x16x4xf32> to vector<256x4xf32>
    %c1_i32 = arith.constant 1 : i32
    %85 = arith.addi %3, %c1_i32 : i32
    %86 = arith.index_cast %85 : i32 to index
    %c0_44 = arith.constant 0 : index
    %c0_45 = arith.constant 0 : index
    %87 = vector.load %arg4[%86, %c0_44, %c0_45] : memref<25x4x8xf32, #tpu.memory_space<vmem>>, vector<1x4x8xf32>
    %88 = vector.shape_cast %87 : vector<1x4x8xf32> to vector<4x8xf32>
    %cst_46 = arith.constant dense<0.000000e+00> : vector<256x8xf32>
    %89 = tpu.matmul %84, %88, %cst_46 {dimension_numbers = #tpu.dot_dimension_numbers<[1], [0], [0], [1], [0, 0, 1, 1], [], []>} : vector<256x4xf32>, vector<4x8xf32>, vector<256x8xf32> -> vector<256x8xf32>
    %90 = arith.addf %80, %89 : vector<256x8xf32>
    %91 = vector.extract_strided_slice %82 {offsets = [1, 0, 0], sizes = [16, 16, 4], strides = [1, 1, 1]} : vector<22x16x4xf32> to vector<16x16x4xf32>
    %92 = vector.shape_cast %91 : vector<16x16x4xf32> to vector<256x4xf32>
    %c4_i32 = arith.constant 4 : i32
    %93 = arith.addi %3, %c4_i32 : i32
    %94 = arith.index_cast %93 : i32 to index
    %c0_47 = arith.constant 0 : index
    %c0_48 = arith.constant 0 : index
    %95 = vector.load %arg4[%94, %c0_47, %c0_48] : memref<25x4x8xf32, #tpu.memory_space<vmem>>, vector<1x4x8xf32>
    %96 = vector.shape_cast %95 : vector<1x4x8xf32> to vector<4x8xf32>
    %cst_49 = arith.constant dense<0.000000e+00> : vector<256x8xf32>
    %97 = tpu.matmul %92, %96, %cst_49 {dimension_numbers = #tpu.dot_dimension_numbers<[1], [0], [0], [1], [0, 0, 1, 1], [], []>} : vector<256x4xf32>, vector<4x8xf32>, vector<256x8xf32> -> vector<256x8xf32>
    %98 = arith.addf %90, %97 : vector<256x8xf32>
    %99 = vector.extract_strided_slice %82 {offsets = [2, 0, 0], sizes = [16, 16, 4], strides = [1, 1, 1]} : vector<22x16x4xf32> to vector<16x16x4xf32>
    %100 = vector.shape_cast %99 : vector<16x16x4xf32> to vector<256x4xf32>
    %c7_i32 = arith.constant 7 : i32
    %101 = arith.addi %3, %c7_i32 : i32
    %102 = arith.index_cast %101 : i32 to index
    %c0_50 = arith.constant 0 : index
    %c0_51 = arith.constant 0 : index
    %103 = vector.load %arg4[%102, %c0_50, %c0_51] : memref<25x4x8xf32, #tpu.memory_space<vmem>>, vector<1x4x8xf32>
    %104 = vector.shape_cast %103 : vector<1x4x8xf32> to vector<4x8xf32>
    %cst_52 = arith.constant dense<0.000000e+00> : vector<256x8xf32>
    %105 = tpu.matmul %100, %104, %cst_52 {dimension_numbers = #tpu.dot_dimension_numbers<[1], [0], [0], [1], [0, 0, 1, 1], [], []>} : vector<256x4xf32>, vector<4x8xf32>, vector<256x8xf32> -> vector<256x8xf32>
    %106 = arith.addf %98, %105 : vector<256x8xf32>
    %107 = vector.extract_strided_slice %82 {offsets = [3, 0, 0], sizes = [16, 16, 4], strides = [1, 1, 1]} : vector<22x16x4xf32> to vector<16x16x4xf32>
    %108 = vector.shape_cast %107 : vector<16x16x4xf32> to vector<256x4xf32>
    %c12_i32 = arith.constant 12 : i32
    %109 = arith.addi %3, %c12_i32 : i32
    %110 = arith.index_cast %109 : i32 to index
    %c0_53 = arith.constant 0 : index
    %c0_54 = arith.constant 0 : index
    %111 = vector.load %arg4[%110, %c0_53, %c0_54] : memref<25x4x8xf32, #tpu.memory_space<vmem>>, vector<1x4x8xf32>
    %112 = vector.shape_cast %111 : vector<1x4x8xf32> to vector<4x8xf32>
    %cst_55 = arith.constant dense<0.000000e+00> : vector<256x8xf32>
    %113 = tpu.matmul %108, %112, %cst_55 {dimension_numbers = #tpu.dot_dimension_numbers<[1], [0], [0], [1], [0, 0, 1, 1], [], []>} : vector<256x4xf32>, vector<4x8xf32>, vector<256x8xf32> -> vector<256x8xf32>
    %114 = arith.addf %106, %113 : vector<256x8xf32>
    %115 = vector.extract_strided_slice %82 {offsets = [4, 0, 0], sizes = [16, 16, 4], strides = [1, 1, 1]} : vector<22x16x4xf32> to vector<16x16x4xf32>
    %116 = vector.shape_cast %115 : vector<16x16x4xf32> to vector<256x4xf32>
    %c17_i32 = arith.constant 17 : i32
    %117 = arith.addi %3, %c17_i32 : i32
    %118 = arith.index_cast %117 : i32 to index
    %c0_56 = arith.constant 0 : index
    %c0_57 = arith.constant 0 : index
    %119 = vector.load %arg4[%118, %c0_56, %c0_57] : memref<25x4x8xf32, #tpu.memory_space<vmem>>, vector<1x4x8xf32>
    %120 = vector.shape_cast %119 : vector<1x4x8xf32> to vector<4x8xf32>
    %cst_58 = arith.constant dense<0.000000e+00> : vector<256x8xf32>
    %121 = tpu.matmul %116, %120, %cst_58 {dimension_numbers = #tpu.dot_dimension_numbers<[1], [0], [0], [1], [0, 0, 1, 1], [], []>} : vector<256x4xf32>, vector<4x8xf32>, vector<256x8xf32> -> vector<256x8xf32>
    %122 = arith.addf %114, %121 : vector<256x8xf32>
    %123 = vector.extract_strided_slice %82 {offsets = [5, 0, 0], sizes = [16, 16, 4], strides = [1, 1, 1]} : vector<22x16x4xf32> to vector<16x16x4xf32>
    %124 = vector.shape_cast %123 : vector<16x16x4xf32> to vector<256x4xf32>
    %c20_i32 = arith.constant 20 : i32
    %125 = arith.addi %3, %c20_i32 : i32
    %126 = arith.index_cast %125 : i32 to index
    %c0_59 = arith.constant 0 : index
    %c0_60 = arith.constant 0 : index
    %127 = vector.load %arg4[%126, %c0_59, %c0_60] : memref<25x4x8xf32, #tpu.memory_space<vmem>>, vector<1x4x8xf32>
    %128 = vector.shape_cast %127 : vector<1x4x8xf32> to vector<4x8xf32>
    %cst_61 = arith.constant dense<0.000000e+00> : vector<256x8xf32>
    %129 = tpu.matmul %124, %128, %cst_61 {dimension_numbers = #tpu.dot_dimension_numbers<[1], [0], [0], [1], [0, 0, 1, 1], [], []>} : vector<256x4xf32>, vector<4x8xf32>, vector<256x8xf32> -> vector<256x8xf32>
    %130 = arith.addf %122, %129 : vector<256x8xf32>
    %131 = vector.extract_strided_slice %82 {offsets = [6, 0, 0], sizes = [16, 16, 4], strides = [1, 1, 1]} : vector<22x16x4xf32> to vector<16x16x4xf32>
    %132 = vector.shape_cast %131 : vector<16x16x4xf32> to vector<256x4xf32>
    %c23_i32 = arith.constant 23 : i32
    %133 = arith.addi %3, %c23_i32 : i32
    %134 = arith.index_cast %133 : i32 to index
    %c0_62 = arith.constant 0 : index
    %c0_63 = arith.constant 0 : index
    %135 = vector.load %arg4[%134, %c0_62, %c0_63] : memref<25x4x8xf32, #tpu.memory_space<vmem>>, vector<1x4x8xf32>
    %136 = vector.shape_cast %135 : vector<1x4x8xf32> to vector<4x8xf32>
    %cst_64 = arith.constant dense<0.000000e+00> : vector<256x8xf32>
    %137 = tpu.matmul %132, %136, %cst_64 {dimension_numbers = #tpu.dot_dimension_numbers<[1], [0], [0], [1], [0, 0, 1, 1], [], []>} : vector<256x4xf32>, vector<4x8xf32>, vector<256x8xf32> -> vector<256x8xf32>
    %138 = arith.addf %130, %137 : vector<256x8xf32>
    %c0_65 = arith.constant 0 : index
    %c0_66 = arith.constant 0 : index
    %c0_67 = arith.constant 0 : index
    %c4 = arith.constant 4 : index
    %c0_68 = arith.constant 0 : index
    %139 = vector.load %arg3[%c0_65, %c0_66, %c0_67, %c4, %c0_68] : memref<1x1x22x22x4xf32, #tpu.memory_space<vmem>>, vector<1x1x22x16x4xf32>
    %140 = vector.shape_cast %139 : vector<1x1x22x16x4xf32> to vector<22x16x4xf32>
    %141 = vector.extract_strided_slice %140 {offsets = [2, 0, 0], sizes = [16, 16, 4], strides = [1, 1, 1]} : vector<22x16x4xf32> to vector<16x16x4xf32>
    %142 = vector.shape_cast %141 : vector<16x16x4xf32> to vector<256x4xf32>
    %c8_i32 = arith.constant 8 : i32
    %143 = arith.addi %3, %c8_i32 : i32
    %144 = arith.index_cast %143 : i32 to index
    %c0_69 = arith.constant 0 : index
    %c0_70 = arith.constant 0 : index
    %145 = vector.load %arg4[%144, %c0_69, %c0_70] : memref<25x4x8xf32, #tpu.memory_space<vmem>>, vector<1x4x8xf32>
    %146 = vector.shape_cast %145 : vector<1x4x8xf32> to vector<4x8xf32>
    %cst_71 = arith.constant dense<0.000000e+00> : vector<256x8xf32>
    %147 = tpu.matmul %142, %146, %cst_71 {dimension_numbers = #tpu.dot_dimension_numbers<[1], [0], [0], [1], [0, 0, 1, 1], [], []>} : vector<256x4xf32>, vector<4x8xf32>, vector<256x8xf32> -> vector<256x8xf32>
    %148 = arith.addf %138, %147 : vector<256x8xf32>
    %149 = vector.extract_strided_slice %140 {offsets = [3, 0, 0], sizes = [16, 16, 4], strides = [1, 1, 1]} : vector<22x16x4xf32> to vector<16x16x4xf32>
    %150 = vector.shape_cast %149 : vector<16x16x4xf32> to vector<256x4xf32>
    %c13_i32 = arith.constant 13 : i32
    %151 = arith.addi %3, %c13_i32 : i32
    %152 = arith.index_cast %151 : i32 to index
    %c0_72 = arith.constant 0 : index
    %c0_73 = arith.constant 0 : index
    %153 = vector.load %arg4[%152, %c0_72, %c0_73] : memref<25x4x8xf32, #tpu.memory_space<vmem>>, vector<1x4x8xf32>
    %154 = vector.shape_cast %153 : vector<1x4x8xf32> to vector<4x8xf32>
    %cst_74 = arith.constant dense<0.000000e+00> : vector<256x8xf32>
    %155 = tpu.matmul %150, %154, %cst_74 {dimension_numbers = #tpu.dot_dimension_numbers<[1], [0], [0], [1], [0, 0, 1, 1], [], []>} : vector<256x4xf32>, vector<4x8xf32>, vector<256x8xf32> -> vector<256x8xf32>
    %156 = arith.addf %148, %155 : vector<256x8xf32>
    %157 = vector.extract_strided_slice %140 {offsets = [4, 0, 0], sizes = [16, 16, 4], strides = [1, 1, 1]} : vector<22x16x4xf32> to vector<16x16x4xf32>
    %158 = vector.shape_cast %157 : vector<16x16x4xf32> to vector<256x4xf32>
    %c18_i32 = arith.constant 18 : i32
    %159 = arith.addi %3, %c18_i32 : i32
    %160 = arith.index_cast %159 : i32 to index
    %c0_75 = arith.constant 0 : index
    %c0_76 = arith.constant 0 : index
    %161 = vector.load %arg4[%160, %c0_75, %c0_76] : memref<25x4x8xf32, #tpu.memory_space<vmem>>, vector<1x4x8xf32>
    %162 = vector.shape_cast %161 : vector<1x4x8xf32> to vector<4x8xf32>
    %cst_77 = arith.constant dense<0.000000e+00> : vector<256x8xf32>
    %163 = tpu.matmul %158, %162, %cst_77 {dimension_numbers = #tpu.dot_dimension_numbers<[1], [0], [0], [1], [0, 0, 1, 1], [], []>} : vector<256x4xf32>, vector<4x8xf32>, vector<256x8xf32> -> vector<256x8xf32>
    %164 = arith.addf %156, %163 : vector<256x8xf32>
    %c0_78 = arith.constant 0 : index
    %c0_79 = arith.constant 0 : index
    %c0_80 = arith.constant 0 : index
    %c5 = arith.constant 5 : index
    %c0_81 = arith.constant 0 : index
    %165 = vector.load %arg3[%c0_78, %c0_79, %c0_80, %c5, %c0_81] : memref<1x1x22x22x4xf32, #tpu.memory_space<vmem>>, vector<1x1x22x16x4xf32>
    %166 = vector.shape_cast %165 : vector<1x1x22x16x4xf32> to vector<22x16x4xf32>
    %167 = vector.extract_strided_slice %166 {offsets = [1, 0, 0], sizes = [16, 16, 4], strides = [1, 1, 1]} : vector<22x16x4xf32> to vector<16x16x4xf32>
    %168 = vector.shape_cast %167 : vector<16x16x4xf32> to vector<256x4xf32>
    %c5_i32 = arith.constant 5 : i32
    %169 = arith.addi %3, %c5_i32 : i32
    %170 = arith.index_cast %169 : i32 to index
    %c0_82 = arith.constant 0 : index
    %c0_83 = arith.constant 0 : index
    %171 = vector.load %arg4[%170, %c0_82, %c0_83] : memref<25x4x8xf32, #tpu.memory_space<vmem>>, vector<1x4x8xf32>
    %172 = vector.shape_cast %171 : vector<1x4x8xf32> to vector<4x8xf32>
    %cst_84 = arith.constant dense<0.000000e+00> : vector<256x8xf32>
    %173 = tpu.matmul %168, %172, %cst_84 {dimension_numbers = #tpu.dot_dimension_numbers<[1], [0], [0], [1], [0, 0, 1, 1], [], []>} : vector<256x4xf32>, vector<4x8xf32>, vector<256x8xf32> -> vector<256x8xf32>
    %174 = arith.addf %164, %173 : vector<256x8xf32>
    %175 = vector.extract_strided_slice %166 {offsets = [3, 0, 0], sizes = [16, 16, 4], strides = [1, 1, 1]} : vector<22x16x4xf32> to vector<16x16x4xf32>
    %176 = vector.shape_cast %175 : vector<16x16x4xf32> to vector<256x4xf32>
    %c14_i32 = arith.constant 14 : i32
    %177 = arith.addi %3, %c14_i32 : i32
    %178 = arith.index_cast %177 : i32 to index
    %c0_85 = arith.constant 0 : index
    %c0_86 = arith.constant 0 : index
    %179 = vector.load %arg4[%178, %c0_85, %c0_86] : memref<25x4x8xf32, #tpu.memory_space<vmem>>, vector<1x4x8xf32>
    %180 = vector.shape_cast %179 : vector<1x4x8xf32> to vector<4x8xf32>
    %cst_87 = arith.constant dense<0.000000e+00> : vector<256x8xf32>
    %181 = tpu.matmul %176, %180, %cst_87 {dimension_numbers = #tpu.dot_dimension_numbers<[1], [0], [0], [1], [0, 0, 1, 1], [], []>} : vector<256x4xf32>, vector<4x8xf32>, vector<256x8xf32> -> vector<256x8xf32>
    %182 = arith.addf %174, %181 : vector<256x8xf32>
    %183 = vector.extract_strided_slice %166 {offsets = [5, 0, 0], sizes = [16, 16, 4], strides = [1, 1, 1]} : vector<22x16x4xf32> to vector<16x16x4xf32>
    %184 = vector.shape_cast %183 : vector<16x16x4xf32> to vector<256x4xf32>
    %c21_i32 = arith.constant 21 : i32
    %185 = arith.addi %3, %c21_i32 : i32
    %186 = arith.index_cast %185 : i32 to index
    %c0_88 = arith.constant 0 : index
    %c0_89 = arith.constant 0 : index
    %187 = vector.load %arg4[%186, %c0_88, %c0_89] : memref<25x4x8xf32, #tpu.memory_space<vmem>>, vector<1x4x8xf32>
    %188 = vector.shape_cast %187 : vector<1x4x8xf32> to vector<4x8xf32>
    %cst_90 = arith.constant dense<0.000000e+00> : vector<256x8xf32>
    %189 = tpu.matmul %184, %188, %cst_90 {dimension_numbers = #tpu.dot_dimension_numbers<[1], [0], [0], [1], [0, 0, 1, 1], [], []>} : vector<256x4xf32>, vector<4x8xf32>, vector<256x8xf32> -> vector<256x8xf32>
    %190 = arith.addf %182, %189 : vector<256x8xf32>
    %c0_91 = arith.constant 0 : index
    %c0_92 = arith.constant 0 : index
    %c0_93 = arith.constant 0 : index
    %c6 = arith.constant 6 : index
    %c0_94 = arith.constant 0 : index
    %191 = vector.load %arg3[%c0_91, %c0_92, %c0_93, %c6, %c0_94] : memref<1x1x22x22x4xf32, #tpu.memory_space<vmem>>, vector<1x1x22x16x4xf32>
    %192 = vector.shape_cast %191 : vector<1x1x22x16x4xf32> to vector<22x16x4xf32>
    %193 = vector.extract_strided_slice %192 {offsets = [0, 0, 0], sizes = [16, 16, 4], strides = [1, 1, 1]} : vector<22x16x4xf32> to vector<16x16x4xf32>
    %194 = vector.shape_cast %193 : vector<16x16x4xf32> to vector<256x4xf32>
    %c2_i32 = arith.constant 2 : i32
    %195 = arith.addi %3, %c2_i32 : i32
    %196 = arith.index_cast %195 : i32 to index
    %c0_95 = arith.constant 0 : index
    %c0_96 = arith.constant 0 : index
    %197 = vector.load %arg4[%196, %c0_95, %c0_96] : memref<25x4x8xf32, #tpu.memory_space<vmem>>, vector<1x4x8xf32>
    %198 = vector.shape_cast %197 : vector<1x4x8xf32> to vector<4x8xf32>
    %cst_97 = arith.constant dense<0.000000e+00> : vector<256x8xf32>
    %199 = tpu.matmul %194, %198, %cst_97 {dimension_numbers = #tpu.dot_dimension_numbers<[1], [0], [0], [1], [0, 0, 1, 1], [], []>} : vector<256x4xf32>, vector<4x8xf32>, vector<256x8xf32> -> vector<256x8xf32>
    %200 = arith.addf %190, %199 : vector<256x8xf32>
    %201 = vector.extract_strided_slice %192 {offsets = [3, 0, 0], sizes = [16, 16, 4], strides = [1, 1, 1]} : vector<22x16x4xf32> to vector<16x16x4xf32>
    %202 = vector.shape_cast %201 : vector<16x16x4xf32> to vector<256x4xf32>
    %c15_i32 = arith.constant 15 : i32
    %203 = arith.addi %3, %c15_i32 : i32
    %204 = arith.index_cast %203 : i32 to index
    %c0_98 = arith.constant 0 : index
    %c0_99 = arith.constant 0 : index
    %205 = vector.load %arg4[%204, %c0_98, %c0_99] : memref<25x4x8xf32, #tpu.memory_space<vmem>>, vector<1x4x8xf32>
    %206 = vector.shape_cast %205 : vector<1x4x8xf32> to vector<4x8xf32>
    %cst_100 = arith.constant dense<0.000000e+00> : vector<256x8xf32>
    %207 = tpu.matmul %202, %206, %cst_100 {dimension_numbers = #tpu.dot_dimension_numbers<[1], [0], [0], [1], [0, 0, 1, 1], [], []>} : vector<256x4xf32>, vector<4x8xf32>, vector<256x8xf32> -> vector<256x8xf32>
    %208 = arith.addf %200, %207 : vector<256x8xf32>
    %209 = vector.extract_strided_slice %192 {offsets = [6, 0, 0], sizes = [16, 16, 4], strides = [1, 1, 1]} : vector<22x16x4xf32> to vector<16x16x4xf32>
    %210 = vector.shape_cast %209 : vector<16x16x4xf32> to vector<256x4xf32>
    %c24_i32 = arith.constant 24 : i32
    %211 = arith.addi %3, %c24_i32 : i32
    %212 = arith.index_cast %211 : i32 to index
    %c0_101 = arith.constant 0 : index
    %c0_102 = arith.constant 0 : index
    %213 = vector.load %arg4[%212, %c0_101, %c0_102] : memref<25x4x8xf32, #tpu.memory_space<vmem>>, vector<1x4x8xf32>
    %214 = vector.shape_cast %213 : vector<1x4x8xf32> to vector<4x8xf32>
    %cst_103 = arith.constant dense<0.000000e+00> : vector<256x8xf32>
    %215 = tpu.matmul %210, %214, %cst_103 {dimension_numbers = #tpu.dot_dimension_numbers<[1], [0], [0], [1], [0, 0, 1, 1], [], []>} : vector<256x4xf32>, vector<4x8xf32>, vector<256x8xf32> -> vector<256x8xf32>
    %216 = arith.addf %208, %215 : vector<256x8xf32>
    %c0_104 = arith.constant 0 : index
    %c0_105 = arith.constant 0 : index
    %217 = vector.load %arg7[%c0_104, %c0_105] : memref<256x8xf32, #tpu.memory_space<vmem>>, vector<256x8xf32>
    %218 = arith.addf %217, %216 : vector<256x8xf32>
    %c0_106 = arith.constant 0 : index
    %c0_107 = arith.constant 0 : index
    %219 = vector.load %arg7[%c0_106, %c0_107] : memref<256x8xf32, #tpu.memory_space<vmem>>, vector<256x8xf32>
    tpu.vector_store %arg7[%c0_106, %c0_107], %218 {strides = array<i32>} : memref<256x8xf32, #tpu.memory_space<vmem>>, vector<256x8xf32>,
    %c0_i32_108 = arith.constant 0 : i32
    %220 = arith.cmpi eq, %arg2, %c0_i32_108 : i32
    %221 = arith.extui %220 : i1 to i32
    %c0_i32_109 = arith.constant 0 : i32
    %222 = arith.cmpi ne, %221, %c0_i32_109 : i32
    scf.if %222 {
      %c0_110 = arith.constant 0 : index
      %c0_111 = arith.constant 0 : index
      %223 = vector.load %arg7[%c0_110, %c0_111] : memref<256x8xf32, #tpu.memory_space<vmem>>, vector<256x8xf32>
      %224 = tpu.transpose %223, [1, 0] : vector<256x8xf32> -> vector<8x256xf32>
      %c0_112 = arith.constant 0 : index
      %c0_113 = arith.constant 0 : index
      %c0_114 = arith.constant 0 : index
      %225 = vector.load %arg6[%c0_112, %c0_113, %c0_114] : memref<1x8x256xf32, #tpu.memory_space<vmem>>, vector<1x8x256xf32>
      %226 = vector.shape_cast %225 : vector<1x8x256xf32> to vector<8x256xf32>
      %227 = vector.shape_cast %224 : vector<8x256xf32> to vector<1x8x256xf32>
      tpu.vector_store %arg6[%c0_112, %c0_113, %c0_114], %227 {strides = array<i32>} : memref<1x8x256xf32, #tpu.memory_space<vmem>>, vector<1x8x256xf32>,
    } else {
    }
    return
  }
  func.func @transform_0(%arg0: i32, %arg1: i32, %arg2: i32) -> (i32, i32, i32, i32, i32) {
    %c0_i32 = arith.constant 0 : i32
    %c0_i32_0 = arith.constant 0 : i32
    %c0_i32_1 = arith.constant 0 : i32
    return %arg0, %arg1, %c0_i32, %c0_i32_0, %arg2 : i32, i32, i32, i32, i32
  }
  func.func @transform_1(%arg0: i32, %arg1: i32, %arg2: i32) -> (i32, i32, i32) {
    %c0_i32 = arith.constant 0 : i32
    %c0_i32_0 = arith.constant 0 : i32
    %c0_i32_1 = arith.constant 0 : i32
    %c0_i32_2 = arith.constant 0 : i32
    return %c0_i32, %c0_i32_0, %c0_i32_1 : i32, i32, i32
  }
  func.func @transform_2(%arg0: i32, %arg1: i32, %arg2: i32) -> (i32, i32) {
    %c0_i32 = arith.constant 0 : i32
    %c0_i32_0 = arith.constant 0 : i32
    %c0_i32_1 = arith.constant 0 : i32
    return %c0_i32, %c0_i32_0 : i32, i32
  }
  func.func @transform_3(%arg0: i32, %arg1: i32, %arg2: i32) -> (i32, i32, i32) {
    %c0_i32 = arith.constant 0 : i32
    %c0_i32_0 = arith.constant 0 : i32
    return %arg0, %c0_i32, %arg1 : i32, i32, i32
  }
}

</mosaic_0001>

<bundles_post_ra>
// kernel: aspp_forward.1
= control target key start
LH: loop header
LB: loop body
LE: loop exit
PB: predicated region body
PF: predicated region fallthrough
CT: control target
= control target key end

     0   :  { %s11365_s12 = smov 0   ;;  %s11367_s13 = smov 0   ;;  %s15129_s0 = inlined_call_operand.vmem [shape: f32[2,1,22,22,4], index: 0, kind: input, shape index: {}]   ;;  %s15130_s1 = inlined_call_operand.vmem [shape: f32[25,4,8], index: 1, kind: input, shape index: {}]   ;;  %s15131_s2 = inlined_call_operand.vmem [shape: f32[1,8], index: 2, kind: input, shape index: {}]   ;;  %s15132_s3 = inlined_call_operand.vmem [shape: f32[2,8,256], index: 3, kind: output, shape index: {}]  }
   0x1   :  { %s11369_s14 = smov 0  }
   0x2 LB: > { %s32_s15 = sadd.s32 1, %s11339_s13  ;;  %p8340_p0 = scmp.ge.s32.totalorder %s11343_s14, 1  ;;  %s11343_s14 = sphi %s11369_s14, %s13_s14   ;;  %s11339_s13 = sphi %s11367_s13, %s15354_s13   ;;  %s11335_s12 = sphi %s11365_s12, %s15353_s12  }
   0x3   : > { %p34_p1 = scmp.ge.s32.totalorder %s32_s15, 2  ;;  %p169_p2 = scmp.lt.s32.totalorder %s11343_s14, 3 }
   0x5   : > { %s15356_s15 = smov (%p34_p1, %s32_s15), 0  ;;  %p170_p3 = pnand %p8340_p0, %p169_p2 }
   0x7   : > { %173 = sbr.rel (%p170_p3) target bundleno = 1124 (0x464), region = 32 }
   0xc   : > { %v8345_v0 = vld [vmem:[%s15130_s1 + $0x24] sm:$0xf]  ;;  %vm419_vm0 = vcmask 1043456   ;;  %p204_p4 = scmp.lt.s32.totalorder %s11335_s12, 1  ;;  %v317_v1 = vld [vmem:[%s15130_s1] sm:$0xf] }
   0xd   : > { %11272 = vmatprep.subr.msk.mxu1 %vm419_vm0, %v8345_v0  ;;  %10022 = vmatprep.subr.msk.mxu0 %vm419_vm0, %v8345_v0  ;;  %v8412_v2 = vld [vmem:[%s15130_s1 + $0x58] sm:$0xf]  ;;  %vm322_vm1 = vcmask 31744   ;;  %v11435_v9 = vld [vmem:[%s15130_s1 + $0xc] sm:$0xf]  ;;  %vm237_vm2 = vcmask 64512  }
   0xe   : > { %11273 = vmatpush3.msk.msra.mxu1 %vm419_vm0, %v8345_v0  ;;  %10023 = vmatpush3.msk.msra.mxu0 %vm419_vm0, %v8345_v0  ;;  %s15358_s12 = smov (!%p204_p4, %s11335_s12), 1  ;;  %v11440_v10 = vld [vmem:[%s15130_s1 + $0x28] sm:$0xf]  ;;  %v11585_v40 = vld [vmem:[%s15130_s1 + $0x4c] sm:$0xf] }
   0xf   : > { %10072 = vmatprep.subr.msk.mxu1 %vm419_vm0, %v317_v1  ;;  %10122 = vmatprep.subr.msk.mxu0 %vm419_vm0, %v8412_v2  ;;  %s11274_s22 = smul.u32 528, %s15358_s12  ;;  %v11590_v41 = vld [vmem:[%s15130_s1 + $0x18] sm:$0xf]  ;;  %v11726_v57 = vld [vmem:[%s15130_s1 + $0x2c] sm:$0xf] }
  0x10   : > { %v11731_v58 = vld [vmem:[%s15130_s1 + $0x40] sm:$0xf] }
  0x11   : > { %s11404_s25 = scalar_lea.vmem %s15129_s0, %s11274_s22 }
  0x12   : > { %v11407_v3 = vld [vmem:[%s11404_s25 + $0x48] sm:$0xff]  ;;  %v11413_v5 = vld [vmem:[%s11404_s25 + $0x50] sm:$0xff]  ;;  %v11423_v7 = vld [vmem:[%s11404_s25 + $0x60] sm:$0xff] }
  0x13   : > { %v11410_v4 = vld [vmem:[%s11404_s25 + $0x108] sm:$0xff]  ;;  %10024 = vmatprep.mubr.msk.f32.mxu0 %vm322_vm1, %v11407_v3  ;;  %v11420_v6 = vld [vmem:[%s11404_s25 + $0x110] sm:$0xff]  ;;  %v11426_v8 = vld [vmem:[%s11404_s25 + $0x120] sm:$0xff] }
  0x14   : > { %10048 = vmatprep.mubr.msk.f32.mxu1 %vm322_vm1, %v11410_v4  ;;  %10025 = vmatmul.mubr.msk.f32.vlgmr.msra.gmra.mxu0 %vm322_vm1, %v11413_v5  ;;  %v11445_v11 = vld [vmem:[%s11404_s25 + $0x68] sm:$0xff]  ;;  %v11455_v13 = vld [vmem:[%s11404_s25 + $0x78] sm:$0xff]  ;;  %v11473_v15 = vld [vmem:[%s11404_s25 + $0x80] sm:$0xff] }
  0x15   : > { %10049 = vmatmul.mubr.msk.f32.vlgmr.msra.gmra.mxu1 %vm322_vm1, %v11420_v6  ;;  %10123 = vmatpush3.msk.msra.mxu0 %vm419_vm0, %v8412_v2  ;;  %v11448_v12 = vld [vmem:[%s11404_s25 + $0x128] sm:$0xff]  ;;  %v11458_v14 = vld [vmem:[%s11404_s25 + $0x138] sm:$0xff]  ;;  %v11476_v16 = vld [vmem:[%s11404_s25 + $0x140] sm:$0xff] }
  0x16   : > { %10073 = vmatpush3.msk.msra.mxu1 %vm419_vm0, %v317_v1  ;;  %10027 = vmatprep.mubr.msk.f32.mxu0 %vm322_vm1, %v11423_v7  ;;  %v11479_v17 = vld [vmem:[%s11404_s25 + $0x90] sm:$0xff]  ;;  %v11493_v19 = vld [vmem:[%s11404_s25 + $0x98] sm:$0xff]  ;;  %v11499_v21 = vld [vmem:[%s11404_s25 + $0xa8] sm:$0xff] }
  0x17   : > { %10051 = vmatprep.mubr.msk.f32.mxu1 %vm322_vm1, %v11426_v8  ;;  %10172 = vmatprep.subr.msk.mxu1 %vm419_vm0, %v11435_v9  ;;  %v11482_v18 = vld [vmem:[%s11404_s25 + $0x150] sm:$0xff]  ;;  %v11496_v20 = vld [vmem:[%s11404_s25 + $0x158] sm:$0xff]  ;;  %v11502_v22 = vld [vmem:[%s11404_s25 + $0x168] sm:$0xff] }
  0x18   : > { %10222 = vmatprep.subr.msk.mxu0 %vm419_vm0, %v11440_v10  ;;  %10028 = vmatmul.mubr.msk.f32.gmra.mxu0 %vm322_vm1, %v11445_v11  ;;  %v11513_v23 = vld [vmem:[%s11404_s25 + $0xb0] sm:$0xff]  ;;  %v11519_v25 = vld [vmem:[%s11404_s25 + $0xc0] sm:$0xff]  ;;  %v11533_v27 = vld [vmem:[%s11404_s25 + $0xc8] sm:$0xff] }
  0x19   : > { %10052 = vmatmul.mubr.msk.f32.gmra.mxu1 %vm322_vm1, %v11448_v12  ;;  %10030 = vmatprep.mubr.msk.f32.mxu0 %vm322_vm1, %v11455_v13  ;;  %v11516_v24 = vld [vmem:[%s11404_s25 + $0x170] sm:$0xff]  ;;  %v11522_v26 = vld [vmem:[%s11404_s25 + $0x180] sm:$0xff]  ;;  %v11536_v28 = vld [vmem:[%s11404_s25 + $0x188] sm:$0xff] }
  0x1a   : > { %10054 = vmatprep.mubr.msk.f32.mxu1 %vm322_vm1, %v11458_v14  ;;  %v11539_v29 = vld [vmem:[%s11404_s25 + $0xd8] sm:$0xff]  ;;  %v290_v31 = vld [vmem:[%s11404_s25 + $0xe0] sm:$0xff]  ;;  %v291_v33 = vld [vmem:[%s11404_s25 + $0xf0] sm:$0xff] }
  0x1b   : > { %v11542_v30 = vld [vmem:[%s11404_s25 + $0x198] sm:$0xff]  ;;  %v11554_v32 = vld [vmem:[%s11404_s25 + $0x1a0] sm:$0xff]  ;;  %v11558_v34 = vld [vmem:[%s11404_s25 + $0x1b0] sm:$0xff] }
  0x1c   : > { %10031 = vmatmul.mubr.msk.f32.gmra.mxu0 %vm322_vm1, %v11473_v15  ;;  %v292_v35 = vld [vmem:[%s11404_s25 + $0xf8] sm:$0xff]  ;;  %v271_v37 = vld [vmem:[%s11404_s25] sm:$0xff]  ;;  %v272_v38 = vld [vmem:[%s11404_s25 + $0x8] sm:$0xff] }
  0x1d   : > { %10055 = vmatmul.mubr.msk.f32.gmra.mxu1 %vm322_vm1, %v11476_v16  ;;  %10033 = vmatprep.mubr.msk.f32.mxu0 %vm322_vm1, %v11479_v17  ;;  %v11568_v36 = vld [vmem:[%s11404_s25 + $0x1b8] sm:$0xff]  ;;  %v274_v42 = vld [vmem:[%s11404_s25 + $0x20] sm:$0xff]  ;;  %v275_v43 = vld [vmem:[%s11404_s25 + $0x30] sm:$0xff] }
  0x1e   : > { %10057 = vmatprep.mubr.msk.f32.mxu1 %vm322_vm1, %v11482_v18  ;;  %v273_v39 = vld [vmem:[%s11404_s25 + $0x18] sm:$0xff]  ;;  %v309_v45 = vld [vmem:[%s11404_s25 + $0x1c8] sm:$0xff]  ;;  %v310_v46 = vld [vmem:[%s11404_s25 + $0x1d0] sm:$0xff] }
  0x1f   : > { %v276_v44 = vld [vmem:[%s11404_s25 + $0x38] sm:$0xff]  ;;  %v311_v47 = vld [vmem:[%s11404_s25 + $0x1e0] sm:$0xff]  ;;  %v312_v48 = vld [vmem:[%s11404_s25 + $0x1e8] sm:$0xff] }
  0x20   : > { %10034 = vmatmul.mubr.msk.f32.gmra.mxu0 %vm322_vm1, %v11493_v19  ;;  %v313_v49 = vld [vmem:[%s11404_s25 + $0x1f8] sm:$0xff]  ;;  %v314_v50 = vld [vmem:[%s11404_s25 + $0x200] sm:$0xff]  ;;  %v1180_v52 = vld [vmem:[%s11404_s25 + $0x49] sm:$0xff] }
  0x21   : > { %10058 = vmatmul.mubr.msk.f32.gmra.mxu1 %vm322_vm1, %v11496_v20  ;;  %10036 = vmatprep.mubr.msk.f32.mxu0 %vm322_vm1, %v11499_v21  ;;  %v1176_v51 = vld [vmem:[%s11404_s25 + $0x19] sm:$0xff]  ;;  %v1177_v53 = vld [vmem:[%s11404_s25 + $0x21] sm:$0xff]  ;;  %v1181_v54 = vld [vmem:[%s11404_s25 + $0x51] sm:$0xff] }
  0x22   : > { %10060 = vmatprep.mubr.msk.f32.mxu1 %vm322_vm1, %v11502_v22  ;;  %v1178_v55 = vld [vmem:[%s11404_s25 + $0x31] sm:$0xff]  ;;  %v1182_v56 = vld [vmem:[%s11404_s25 + $0x61] sm:$0xff]  ;;  %v1179_v59 = vld [vmem:[%s11404_s25 + $0x39] sm:$0xff] }
  0x23   : > { %v1183_v60 = vld [vmem:[%s11404_s25 + $0x69] sm:$0xff]  ;;  %v11742_v61 = vld [vmem:[%s11404_s25 + $0x79] sm:$0xff]  ;;  %v11754_v62 = vld [vmem:[%s11404_s25 + $0x81] sm:$0xff] }
  0x24   : > { %10037 = vmatmul.mubr.msk.f32.gmra.mxu0 %vm322_vm1, %v11513_v23  ;;  %v11757_v63 = vld [vmem:[%s11404_s25 + $0x91] sm:$0xff]  ;;  %v11766_v0 = vld [vmem:[%s11404_s25 + $0x99] sm:$0xff]  ;;  %v11769_v1 = vld [vmem:[%s11404_s25 + $0xa9] sm:$0xff] }
  0x25   : > { %10061 = vmatmul.mubr.msk.f32.gmra.mxu1 %vm322_vm1, %v11516_v24  ;;  %10039 = vmatprep.mubr.msk.f32.mxu0 %vm322_vm1, %v11519_v25  ;;  %v11779_v2 = vld [vmem:[%s11404_s25 + $0xb1] sm:$0xff] }
  0x26   : > { %10063 = vmatprep.mubr.msk.f32.mxu1 %vm322_vm1, %v11522_v26 }
  0x28   : > { %10040 = vmatmul.mubr.msk.f32.gmra.mxu0 %vm322_vm1, %v11533_v27 }
  0x29   : > { %10064 = vmatmul.mubr.msk.f32.gmra.mxu1 %vm322_vm1, %v11536_v28  ;;  %10042 = vmatprep.mubr.msk.f32.mxu0 %vm322_vm1, %v11539_v29 }
  0x2a   : > { %10066 = vmatprep.mubr.msk.f32.mxu1 %vm322_vm1, %v11542_v30 }
  0x2c   : > { %10043 = vmatmul.mubr.msk.f32.gmra.mxu0 %vm322_vm1, %v290_v31 }
  0x2d   : > { %10067 = vmatmul.mubr.msk.f32.gmra.mxu1 %vm322_vm1, %v11554_v32  ;;  %10045 = vmatprep.mubr.msk.f32.mxu0 %vm322_vm1, %v291_v33 }
  0x2e   : > { %10069 = vmatprep.mubr.msk.f32.mxu1 %vm322_vm1, %v11558_v34 }
  0x30   : > { %10046 = vmatmul.mubr.msk.f32.gmra.mxu0 %vm322_vm1, %v292_v35 }
  0x31   : > { %10070 = vmatmul.mubr.msk.f32.gmra.mxu1 %vm322_vm1, %v11568_v36  ;;  %10124 = vmatprep.mubr.msk.f32.mxu0 %vm322_vm1, %v11479_v17 }
  0x32   : > { %10074 = vmatprep.mubr.msk.f32.mxu1 %vm322_vm1, %v271_v37  ;;  %v12018_v37 = vld [vmem:[%s11404_s25 + $0xaa] sm:$0xff] }
  0x34   : > { %10125 = vmatmul.mubr.msk.f32.vlgmr.msra.gmra.mxu0 %vm322_vm1, %v11493_v19 }
  0x35   : > { %10075 = vmatmul.mubr.msk.f32.vlgmr.msra.gmra.mxu1 %vm322_vm1, %v272_v38  ;;  %10223 = vmatpush3.msk.msra.mxu0 %vm419_vm0, %v11440_v10  ;;  %v11835_v10 = vld [vmem:[%s11404_s25 + $0x111] sm:$0xff] }
  0x36   : > { %10173 = vmatpush3.msk.msra.mxu1 %vm419_vm0, %v11435_v9  ;;  %10077 = vmatprep.mubr.msk.f32.mxu1 %vm322_vm1, %v273_v39  ;;  %v11824_v9 = vld [vmem:[%s11404_s25 + $0x109] sm:$0xff]  ;;  %v12029_v38 = vld [vmem:[%s11404_s25 + $0xb2] sm:$0xff] }
  0x37   : > { %10127 = vmatprep.mubr.msk.f32.mxu0 %vm322_vm1, %v11499_v21  ;;  %10272 = vmatprep.subr.msk.mxu1 %vm419_vm0, %v11585_v40  ;;  %v12032_v39 = vld [vmem:[%s11404_s25 + $0xc2] sm:$0xff] }
  0x38   : > { %10322 = vmatprep.subr.msk.mxu0 %vm419_vm0, %v11590_v41  ;;  %10128 = vmatmul.mubr.msk.f32.gmra.mxu0 %vm322_vm1, %v11513_v23 }
  0x39   : > { %10078 = vmatmul.mubr.msk.f32.gmra.mxu1 %vm322_vm1, %v274_v42  ;;  %10130 = vmatprep.mubr.msk.f32.mxu0 %vm322_vm1, %v11519_v25  ;;  %v12057_v42 = vld [vmem:[%s11404_s25 + $0xe2] sm:$0xff] }
  0x3a   : > { %10080 = vmatprep.mubr.msk.f32.mxu1 %vm322_vm1, %v275_v43  ;;  %v12060_v43 = vld [vmem:[%s11404_s25 + $0xf2] sm:$0xff] }
  0x3c   : > { %10131 = vmatmul.mubr.msk.f32.gmra.mxu0 %vm322_vm1, %v11533_v27 }
  0x3d   : > { %10081 = vmatmul.mubr.msk.f32.gmra.mxu1 %vm322_vm1, %v276_v44  ;;  %10133 = vmatprep.mubr.msk.f32.mxu0 %vm322_vm1, %v11539_v29  ;;  %v12071_v44 = vld [vmem:[%s11404_s25 + $0xfa] sm:$0xff] }
  0x3e   : > { %10083 = vmatprep.mubr.msk.f32.mxu1 %vm322_vm1, %v11407_v3  ;;  %v11782_v3 = vld [vmem:[%s11404_s25 + $0xc1] sm:$0xff] }
  0x40   : > { %10134 = vmatmul.mubr.msk.f32.gmra.mxu0 %vm322_vm1, %v290_v31 }
  0x41   : > { %10084 = vmatmul.mubr.msk.f32.gmra.mxu1 %vm322_vm1, %v11413_v5  ;;  %10136 = vmatprep.mubr.msk.f32.mxu0 %vm322_vm1, %v291_v33  ;;  %v11796_v5 = vld [vmem:[%s11404_s25 + $0xd9] sm:$0xff] }
  0x42   : > { %10086 = vmatprep.mubr.msk.f32.mxu1 %vm322_vm1, %v11423_v7  ;;  %v11810_v7 = vld [vmem:[%s11404_s25 + $0xf1] sm:$0xff] }
  0x44   : > { %10137 = vmatmul.mubr.msk.f32.gmra.mxu0 %vm322_vm1, %v292_v35 }
  0x45   : > { %10087 = vmatmul.mubr.msk.f32.gmra.mxu1 %vm322_vm1, %v11445_v11  ;;  %10139 = vmatprep.mubr.msk.f32.mxu0 %vm322_vm1, %v11410_v4  ;;  %v11838_v11 = vld [vmem:[%s11404_s25 + $0x121] sm:$0xff] }
  0x46   : > { %10089 = vmatprep.mubr.msk.f32.mxu1 %vm322_vm1, %v11455_v13  ;;  %v11852_v13 = vld [vmem:[%s11404_s25 + $0x139] sm:$0xff] }
  0x48   : > { %10140 = vmatmul.mubr.msk.f32.gmra.mxu0 %vm322_vm1, %v11420_v6 }
  0x49   : > { %10090 = vmatmul.mubr.msk.f32.gmra.mxu1 %vm322_vm1, %v11473_v15  ;;  %10142 = vmatprep.mubr.msk.f32.mxu0 %vm322_vm1, %v11426_v8  ;;  %v11866_v15 = vld [vmem:[%s11404_s25 + $0x151] sm:$0xff] }
  0x4a   : > { %10092 = vmatprep.mubr.msk.f32.mxu1 %vm322_vm1, %v11479_v17  ;;  %v11880_v17 = vld [vmem:[%s11404_s25 + $0x169] sm:$0xff] }
  0x4c   : > { %10143 = vmatmul.mubr.msk.f32.gmra.mxu0 %vm322_vm1, %v11448_v12 }
  0x4d   : > { %10093 = vmatmul.mubr.msk.f32.gmra.mxu1 %vm322_vm1, %v11493_v19  ;;  %10145 = vmatprep.mubr.msk.f32.mxu0 %vm322_vm1, %v11458_v14  ;;  %v11894_v19 = vld [vmem:[%s11404_s25 + $0x181] sm:$0xff] }
  0x4e   : > { %10095 = vmatprep.mubr.msk.f32.mxu1 %vm322_vm1, %v11499_v21  ;;  %v11908_v21 = vld [vmem:[%s11404_s25 + $0x199] sm:$0xff] }
  0x50   : > { %10146 = vmatmul.mubr.msk.f32.gmra.mxu0 %vm322_vm1, %v11476_v16 }
  0x51   : > { %10096 = vmatmul.mubr.msk.f32.gmra.mxu1 %vm322_vm1, %v11513_v23  ;;  %10148 = vmatprep.mubr.msk.f32.mxu0 %vm322_vm1, %v11482_v18  ;;  %v11922_v23 = vld [vmem:[%s11404_s25 + $0x1b1] sm:$0xff] }
  0x52   : > { %10098 = vmatprep.mubr.msk.f32.mxu1 %vm322_vm1, %v11519_v25  ;;  %v2128_v25 = vld [vmem:[%s11404_s25 + $0x32] sm:$0xff] }
  0x54   : > { %10149 = vmatmul.mubr.msk.f32.gmra.mxu0 %vm322_vm1, %v11496_v20 }
  0x55   : > { %10099 = vmatmul.mubr.msk.f32.gmra.mxu1 %vm322_vm1, %v11533_v27  ;;  %10151 = vmatprep.mubr.msk.f32.mxu0 %vm322_vm1, %v11502_v22  ;;  %v11945_v27 = vld [vmem:[%s11404_s25 + $0x4a] sm:$0xff] }
  0x56   : > { %10101 = vmatprep.mubr.msk.f32.mxu1 %vm322_vm1, %v11539_v29  ;;  %v11958_v29 = vld [vmem:[%s15130_s1 + $0x10] sm:$0xf] }
  0x58   : > { %10152 = vmatmul.mubr.msk.f32.gmra.mxu0 %vm322_vm1, %v11516_v24 }
  0x59   : > { %10102 = vmatmul.mubr.msk.f32.gmra.mxu1 %vm322_vm1, %v290_v31  ;;  %10154 = vmatprep.mubr.msk.f32.mxu0 %vm322_vm1, %v11522_v26  ;;  %v2129_v26 = vld [vmem:[%s11404_s25 + $0x3a] sm:$0xff]  ;;  %v11972_v31 = vld [vmem:[%s11404_s25 + $0x62] sm:$0xff] }
  0x5a   : > { %10104 = vmatprep.mubr.msk.f32.mxu1 %vm322_vm1, %v291_v33  ;;  %v11990_v33 = vld [vmem:[%s11404_s25 + $0x7a] sm:$0xff] }
  0x5c   : > { %10155 = vmatmul.mubr.msk.f32.gmra.mxu0 %vm322_vm1, %v11536_v28  ;;  %v11953_v28 = vld [vmem:[%s15130_s1 + $0x4] sm:$0xf] }
  0x5d   : > { %10105 = vmatmul.mubr.msk.f32.gmra.mxu1 %vm322_vm1, %v292_v35  ;;  %10157 = vmatprep.mubr.msk.f32.mxu0 %vm322_vm1, %v11542_v30  ;;  %v11965_v30 = vld [vmem:[%s11404_s25 + $0x52] sm:$0xff] }
  0x5e   : > { %10107 = vmatprep.mubr.msk.f32.mxu1 %vm322_vm1, %v11410_v4  ;;  %v11793_v4 = vld [vmem:[%s11404_s25 + $0xc9] sm:$0xff]  ;;  %v12004_v35 = vld [vmem:[%s11404_s25 + $0x92] sm:$0xff] }
  0x60   : > { %10158 = vmatmul.mubr.msk.f32.gmra.mxu0 %vm322_vm1, %v11554_v32  ;;  %v11987_v32 = vld [vmem:[%s11404_s25 + $0x6a] sm:$0xff] }
  0x61   : > { %10108 = vmatmul.mubr.msk.f32.gmra.mxu1 %vm322_vm1, %v11420_v6  ;;  %10160 = vmatprep.mubr.msk.f32.mxu0 %vm322_vm1, %v11558_v34  ;;  %v11807_v6 = vld [vmem:[%s11404_s25 + $0xe1] sm:$0xff] }
  0x62   : > { %10110 = vmatprep.mubr.msk.f32.mxu1 %vm322_vm1, %v11426_v8  ;;  %v11821_v8 = vld [vmem:[%s11404_s25 + $0xf9] sm:$0xff]  ;;  %v12001_v34 = vld [vmem:[%s11404_s25 + $0x82] sm:$0xff] }
  0x64   : > { %10161 = vmatmul.mubr.msk.f32.gmra.mxu0 %vm322_vm1, %v11568_v36  ;;  %v12015_v36 = vld [vmem:[%s11404_s25 + $0x9a] sm:$0xff] }
  0x65   : > { %10111 = vmatmul.mubr.msk.f32.gmra.mxu1 %vm322_vm1, %v11448_v12  ;;  %10163 = vmatprep.mubr.msk.f32.mxu0 %vm322_vm1, %v309_v45  ;;  %v11849_v12 = vld [vmem:[%s11404_s25 + $0x129] sm:$0xff] }
  0x66   : > { %10113 = vmatprep.mubr.msk.f32.mxu1 %vm322_vm1, %v11458_v14  ;;  %v11863_v14 = vld [vmem:[%s11404_s25 + $0x141] sm:$0xff]  ;;  %v12074_v45 = vld [vmem:[%s11404_s25 + $0x10a] sm:$0xff] }
  0x68   : > { %10164 = vmatmul.mubr.msk.f32.gmra.mxu0 %vm322_vm1, %v310_v46 }
  0x69   : > { %10114 = vmatmul.mubr.msk.f32.gmra.mxu1 %vm322_vm1, %v11476_v16  ;;  %10166 = vmatprep.mubr.msk.f32.mxu0 %vm322_vm1, %v311_v47  ;;  %v11877_v16 = vld [vmem:[%s11404_s25 + $0x159] sm:$0xff] }
  0x6a   : > { %10116 = vmatprep.mubr.msk.f32.mxu1 %vm322_vm1, %v11482_v18  ;;  %v11891_v18 = vld [vmem:[%s11404_s25 + $0x171] sm:$0xff] }
  0x6c   : > { %10167 = vmatmul.mubr.msk.f32.gmra.mxu0 %vm322_vm1, %v312_v48  ;;  %v12089_v48 = vld [vmem:[%s11404_s25 + $0x112] sm:$0xff] }
  0x6d   : > { %10117 = vmatmul.mubr.msk.f32.gmra.mxu1 %vm322_vm1, %v11496_v20  ;;  %10169 = vmatprep.mubr.msk.f32.mxu0 %vm322_vm1, %v313_v49  ;;  %v11905_v20 = vld [vmem:[%s11404_s25 + $0x189] sm:$0xff] }
  0x6e   : > { %10119 = vmatprep.mubr.msk.f32.mxu1 %vm322_vm1, %v11502_v22  ;;  %v11919_v22 = vld [vmem:[%s11404_s25 + $0x1a1] sm:$0xff] }
  0x70   : > { %10170 = vmatmul.mubr.msk.f32.gmra.mxu0 %vm322_vm1, %v314_v50 }
  0x71   : > { %10120 = vmatmul.mubr.msk.f32.gmra.mxu1 %vm322_vm1, %v11516_v24  ;;  %10224 = vmatprep.mubr.msk.f32.mxu0 %vm322_vm1, %v1180_v52  ;;  %v11933_v24 = vld [vmem:[%s11404_s25 + $0x1b9] sm:$0xff] }
  0x72   : > { %10174 = vmatprep.mubr.msk.f32.mxu1 %vm322_vm1, %v1176_v51  ;;  %v12096_v51 = vld [vmem:[%s11404_s25 + $0x122] sm:$0xff] }
  0x74   : > { %10225 = vmatmul.mubr.msk.f32.vlgmr.msra.gmra.mxu0 %vm322_vm1, %v1181_v54 }
  0x75   : > { %10175 = vmatmul.mubr.msk.f32.vlgmr.msra.gmra.mxu1 %vm322_vm1, %v1177_v53  ;;  %10323 = vmatpush3.msk.msra.mxu0 %vm419_vm0, %v11590_v41  ;;  %v12046_v41 = vld [vmem:[%s11404_s25 + $0xda] sm:$0xff] }
  0x76   : > { %10273 = vmatpush3.msk.msra.mxu1 %vm419_vm0, %v11585_v40  ;;  %10177 = vmatprep.mubr.msk.f32.mxu1 %vm322_vm1, %v1178_v55  ;;  %v12043_v40 = vld [vmem:[%s11404_s25 + $0xca] sm:$0xff] }
  0x77   : > { %10227 = vmatprep.mubr.msk.f32.mxu0 %vm322_vm1, %v1182_v56  ;;  %10372 = vmatprep.subr.msk.mxu1 %vm419_vm0, %v11726_v57 }
  0x78   : > { %10422 = vmatprep.subr.msk.mxu0 %vm419_vm0, %v11731_v58  ;;  %10228 = vmatmul.mubr.msk.f32.gmra.mxu0 %vm322_vm1, %v1183_v60 }
  0x79   : > { %10178 = vmatmul.mubr.msk.f32.gmra.mxu1 %vm322_vm1, %v1179_v59  ;;  %10230 = vmatprep.mubr.msk.f32.mxu0 %vm322_vm1, %v11742_v61 }
  0x7a   : > { %10180 = vmatprep.mubr.msk.f32.mxu1 %vm322_vm1, %v1180_v52 }
  0x7c   : > { %10231 = vmatmul.mubr.msk.f32.gmra.mxu0 %vm322_vm1, %v11754_v62 }
  0x7d   : > { %10181 = vmatmul.mubr.msk.f32.gmra.mxu1 %vm322_vm1, %v1181_v54  ;;  %10233 = vmatprep.mubr.msk.f32.mxu0 %vm322_vm1, %v11757_v63  ;;  %v12111_v54 = vld [vmem:[%s11404_s25 + $0x12a] sm:$0xff] }
  0x7e   : > { %10183 = vmatprep.mubr.msk.f32.mxu1 %vm322_vm1, %v1182_v56 }
  0x80   : > { %10234 = vmatmul.mubr.msk.f32.gmra.mxu0 %vm322_vm1, %v11766_v0 }
  0x81   : > { %10184 = vmatmul.mubr.msk.f32.gmra.mxu1 %vm322_vm1, %v1183_v60  ;;  %10236 = vmatprep.mubr.msk.f32.mxu0 %vm322_vm1, %v11769_v1  ;;  %v12133_v60 = vld [vmem:[%s11404_s25 + $0x142] sm:$0xff] }
  0x82   : > { %10186 = vmatprep.mubr.msk.f32.mxu1 %vm322_vm1, %v11742_v61 }
  0x84   : > { %10237 = vmatmul.mubr.msk.f32.gmra.mxu0 %vm322_vm1, %v11779_v2 }
  0x85   : > { %10187 = vmatmul.mubr.msk.f32.gmra.mxu1 %vm322_vm1, %v11754_v62  ;;  %10239 = vmatprep.mubr.msk.f32.mxu0 %vm322_vm1, %v11782_v3 }
  0x86   : > { %10189 = vmatprep.mubr.msk.f32.mxu1 %vm322_vm1, %v11757_v63 }
  0x88   : > { %10240 = vmatmul.mubr.msk.f32.gmra.mxu0 %vm322_vm1, %v11793_v4 }
  0x89   : > { %10190 = vmatmul.mubr.msk.f32.gmra.mxu1 %vm322_vm1, %v11766_v0  ;;  %10242 = vmatprep.mubr.msk.f32.mxu0 %vm322_vm1, %v11796_v5 }
  0x8a   : > { %10192 = vmatprep.mubr.msk.f32.mxu1 %vm322_vm1, %v11769_v1 }
  0x8c   : > { %10243 = vmatmul.mubr.msk.f32.gmra.mxu0 %vm322_vm1, %v11807_v6 }
  0x8d   : > { %10193 = vmatmul.mubr.msk.f32.gmra.mxu1 %vm322_vm1, %v11779_v2  ;;  %10245 = vmatprep.mubr.msk.f32.mxu0 %vm322_vm1, %v11810_v7 }
  0x8e   : > { %10195 = vmatprep.mubr.msk.f32.mxu1 %vm322_vm1, %v11782_v3 }
  0x90   : > { %10246 = vmatmul.mubr.msk.f32.gmra.mxu0 %vm322_vm1, %v11821_v8 }
  0x91   : > { %10196 = vmatmul.mubr.msk.f32.gmra.mxu1 %vm322_vm1, %v11793_v4  ;;  %10248 = vmatprep.mubr.msk.f32.mxu0 %vm322_vm1, %v11824_v9 }
  0x92   : > { %10198 = vmatprep.mubr.msk.f32.mxu1 %vm322_vm1, %v11796_v5 }
  0x94   : > { %10249 = vmatmul.mubr.msk.f32.gmra.mxu0 %vm322_vm1, %v11835_v10 }
  0x95   : > { %10199 = vmatmul.mubr.msk.f32.gmra.mxu1 %vm322_vm1, %v11807_v6  ;;  %10251 = vmatprep.mubr.msk.f32.mxu0 %vm322_vm1, %v11838_v11 }
  0x96   : > { %10201 = vmatprep.mubr.msk.f32.mxu1 %vm322_vm1, %v11810_v7 }
  0x98   : > { %10252 = vmatmul.mubr.msk.f32.gmra.mxu0 %vm322_vm1, %v11849_v12 }
  0x99   : > { %10202 = vmatmul.mubr.msk.f32.gmra.mxu1 %vm322_vm1, %v11821_v8  ;;  %10254 = vmatprep.mubr.msk.f32.mxu0 %vm322_vm1, %v11852_v13 }
  0x9a   : > { %10204 = vmatprep.mubr.msk.f32.mxu1 %vm322_vm1, %v11824_v9 }
  0x9c   : > { %10255 = vmatmul.mubr.msk.f32.gmra.mxu0 %vm322_vm1, %v11863_v14 }
  0x9d   : > { %10205 = vmatmul.mubr.msk.f32.gmra.mxu1 %vm322_vm1, %v11835_v10  ;;  %10257 = vmatprep.mubr.msk.f32.mxu0 %vm322_vm1, %v11866_v15 }
  0x9e   : > { %10207 = vmatprep.mubr.msk.f32.mxu1 %vm322_vm1, %v11838_v11 }
  0xa0   : > { %10258 = vmatmul.mubr.msk.f32.gmra.mxu0 %vm322_vm1, %v11877_v16 }
  0xa1   : > { %10208 = vmatmul.mubr.msk.f32.gmra.mxu1 %vm322_vm1, %v11849_v12  ;;  %10260 = vmatprep.mubr.msk.f32.mxu0 %vm322_vm1, %v11880_v17 }
  0xa2   : > { %10210 = vmatprep.mubr.msk.f32.mxu1 %vm322_vm1, %v11852_v13 }
  0xa4   : > { %10261 = vmatmul.mubr.msk.f32.gmra.mxu0 %vm322_vm1, %v11891_v18 }
  0xa5   : > { %10211 = vmatmul.mubr.msk.f32.gmra.mxu1 %vm322_vm1, %v11863_v14  ;;  %10263 = vmatprep.mubr.msk.f32.mxu0 %vm322_vm1, %v11894_v19 }
  0xa6   : > { %10213 = vmatprep.mubr.msk.f32.mxu1 %vm322_vm1, %v11866_v15 }
  0xa8   : > { %10264 = vmatmul.mubr.msk.f32.gmra.mxu0 %vm322_vm1, %v11905_v20 }
  0xa9   : > { %10214 = vmatmul.mubr.msk.f32.gmra.mxu1 %vm322_vm1, %v11877_v16  ;;  %10266 = vmatprep.mubr.msk.f32.mxu0 %vm322_vm1, %v11908_v21 }
  0xaa   : > { %10216 = vmatprep.mubr.msk.f32.mxu1 %vm322_vm1, %v11880_v17 }
  0xac   : > { %10267 = vmatmul.mubr.msk.f32.gmra.mxu0 %vm322_vm1, %v11919_v22 }
  0xad   : > { %10217 = vmatmul.mubr.msk.f32.gmra.mxu1 %vm322_vm1, %v11891_v18  ;;  %10269 = vmatprep.mubr.msk.f32.mxu0 %vm322_vm1, %v11922_v23 }
  0xae   : > { %10219 = vmatprep.mubr.msk.f32.mxu1 %vm322_vm1, %v11894_v19 }
  0xb0   : > { %10270 = vmatmul.mubr.msk.f32.gmra.mxu0 %vm322_vm1, %v11933_v24 }
  0xb1   : > { %10220 = vmatmul.mubr.msk.f32.gmra.mxu1 %vm322_vm1, %v11905_v20  ;;  %10324 = vmatprep.mubr.msk.f32.mxu0 %vm322_vm1, %v2128_v25 }
  0xb2   : > { %10274 = vmatprep.mubr.msk.f32.mxu1 %vm322_vm1, %v11742_v61 }
  0xb4   : > { %10325 = vmatmul.mubr.msk.f32.vlgmr.msra.gmra.mxu0 %vm322_vm1, %v2129_v26 }
  0xb5   : > { %10275 = vmatmul.mubr.msk.f32.vlgmr.msra.gmra.mxu1 %vm322_vm1, %v11754_v62  ;;  %10423 = vmatpush3.msk.msra.mxu0 %vm419_vm0, %v11731_v58 }
  0xb6   : > { %10373 = vmatpush3.msk.msra.mxu1 %vm419_vm0, %v11726_v57  ;;  %10277 = vmatprep.mubr.msk.f32.mxu1 %vm322_vm1, %v11757_v63  ;;  %v12118_v57 = vld [vmem:[%s11404_s25 + $0x13a] sm:$0xff]  ;;  %v12140_v63 = vld [vmem:[%s11404_s25 + $0x152] sm:$0xff] }
  0xb7   : > { %10327 = vmatprep.mubr.msk.f32.mxu0 %vm322_vm1, %v11945_v27  ;;  %10472 = vmatprep.subr.msk.mxu1 %vm419_vm0, %v11953_v28 }
  0xb8   : > { %10522 = vmatprep.subr.msk.mxu0 %vm419_vm0, %v11958_v29  ;;  %10328 = vmatmul.mubr.msk.f32.gmra.mxu0 %vm322_vm1, %v11965_v30 }
  0xb9   : > { %10278 = vmatmul.mubr.msk.f32.gmra.mxu1 %vm322_vm1, %v11766_v0  ;;  %10330 = vmatprep.mubr.msk.f32.mxu0 %vm322_vm1, %v11972_v31 }
  0xba   : > { %10280 = vmatprep.mubr.msk.f32.mxu1 %vm322_vm1, %v11769_v1 }
  0xbc   : > { %10331 = vmatmul.mubr.msk.f32.gmra.mxu0 %vm322_vm1, %v11987_v32 }
  0xbd   : > { %10281 = vmatmul.mubr.msk.f32.gmra.mxu1 %vm322_vm1, %v11779_v2  ;;  %10333 = vmatprep.mubr.msk.f32.mxu0 %vm322_vm1, %v11990_v33  ;;  %v12155_v2 = vld [vmem:[%s11404_s25 + $0x15a] sm:$0xff] }
  0xbe   : > { %10283 = vmatprep.mubr.msk.f32.mxu1 %vm322_vm1, %v11782_v3 }
  0xc0   : > { %10334 = vmatmul.mubr.msk.f32.gmra.mxu0 %vm322_vm1, %v12001_v34 }
  0xc1   : > { %10284 = vmatmul.mubr.msk.f32.gmra.mxu1 %vm322_vm1, %v11793_v4  ;;  %10336 = vmatprep.mubr.msk.f32.mxu0 %vm322_vm1, %v12004_v35 }
  0xc2   : > { %10286 = vmatprep.mubr.msk.f32.mxu1 %vm322_vm1, %v11796_v5  ;;  %v12162_v5 = vld [vmem:[%s11404_s25 + $0x16a] sm:$0xff] }
  0xc4   : > { %10337 = vmatmul.mubr.msk.f32.gmra.mxu0 %vm322_vm1, %v12015_v36 }
  0xc5   : > { %10287 = vmatmul.mubr.msk.f32.gmra.mxu1 %vm322_vm1, %v11807_v6  ;;  %10339 = vmatprep.mubr.msk.f32.mxu0 %vm322_vm1, %v12018_v37 }
  0xc6   : > { %10289 = vmatprep.mubr.msk.f32.mxu1 %vm322_vm1, %v11810_v7 }
  0xc8   : > { %10340 = vmatmul.mubr.msk.f32.gmra.mxu0 %vm322_vm1, %v12029_v38 }
  0xc9   : > { %10290 = vmatmul.mubr.msk.f32.gmra.mxu1 %vm322_vm1, %v11821_v8  ;;  %10342 = vmatprep.mubr.msk.f32.mxu0 %vm322_vm1, %v12032_v39  ;;  %v12177_v8 = vld [vmem:[%s11404_s25 + $0x172] sm:$0xff] }
  0xca   : > { %10292 = vmatprep.mubr.msk.f32.mxu1 %vm322_vm1, %v11824_v9 }
  0xcc   : > { %10343 = vmatmul.mubr.msk.f32.gmra.mxu0 %vm322_vm1, %v12043_v40 }
  0xcd   : > { %10293 = vmatmul.mubr.msk.f32.gmra.mxu1 %vm322_vm1, %v11835_v10  ;;  %10345 = vmatprep.mubr.msk.f32.mxu0 %vm322_vm1, %v12046_v41 }
  0xce   : > { %10295 = vmatprep.mubr.msk.f32.mxu1 %vm322_vm1, %v11838_v11  ;;  %v1212_v11 = vld [vmem:[%s11404_s25 + $0x1c9] sm:$0xff] }
  0xd0   : > { %10346 = vmatmul.mubr.msk.f32.gmra.mxu0 %vm322_vm1, %v12057_v42 }
  0xd1   : > { %10296 = vmatmul.mubr.msk.f32.gmra.mxu1 %vm322_vm1, %v11849_v12  ;;  %10348 = vmatprep.mubr.msk.f32.mxu0 %vm322_vm1, %v12060_v43  ;;  %v12185_v12 = vld [vmem:[%s11404_s25 + $0x182] sm:$0xff] }
  0xd2   : > { %10298 = vmatprep.mubr.msk.f32.mxu1 %vm322_vm1, %v11852_v13 }
  0xd4   : > { %v12076_v46 = vpop.f32.mrf.mxu0  ;;  %10349 = vmatmul.mubr.msk.f32.gmra.mxu0 %vm322_vm1, %v12071_v44 }
  0xd5   : > { %v12078_v47 = vpop.f32.mrf.mxu1  ;;  %10299 = vmatmul.mubr.msk.f32.gmra.mxu1 %vm322_vm1, %v11863_v14  ;;  %10351 = vmatprep.mubr.msk.f32.mxu0 %vm322_vm1, %v12074_v45 }
  0xd6   : > { %10301 = vmatprep.mubr.msk.f32.mxu1 %vm322_vm1, %v11866_v15  ;;  %v12091_v49 = vpop.f32.mrf.mxu0  ;;  %v1213_v15 = vld [vmem:[%s11404_s25 + $0x1d1] sm:$0xff] }
  0xd7   : > { %v12093_v50 = vpop.f32.mrf.mxu1 }
  0xd8   : > { %v12098_v52 = vpop.f32.mrf.mxu0  ;;  %10352 = vmatmul.mubr.msk.f32.gmra.mxu0 %vm322_vm1, %v12089_v48 }
  0xd9   : > { %v12100_v53 = vpop.f32.mrf.mxu1  ;;  %10302 = vmatmul.mubr.msk.f32.gmra.mxu1 %vm322_vm1, %v11877_v16  ;;  %10354 = vmatprep.mubr.msk.f32.mxu0 %vm322_vm1, %v12096_v51  ;;  %v12200_v16 = vld [vmem:[%s11404_s25 + $0x18a] sm:$0xff] }
  0xda   : > { %10304 = vmatprep.mubr.msk.f32.mxu1 %vm322_vm1, %v11880_v17  ;;  %v12113_v55 = vpop.f32.mrf.mxu0 }
  0xdb   : > { %v12115_v56 = vpop.f32.mrf.mxu1 }
  0xdc   : > { %v12120_v58 = vpop.f32.mrf.mxu0  ;;  %10355 = vmatmul.mubr.msk.f32.gmra.mxu0 %vm322_vm1, %v12111_v54 }
  0xdd   : > { %v12122_v59 = vpop.f32.mrf.mxu1  ;;  %10305 = vmatmul.mubr.msk.f32.gmra.mxu1 %vm322_vm1, %v11891_v18  ;;  %10357 = vmatprep.mubr.msk.f32.mxu0 %vm322_vm1, %v12118_v57 }
  0xde   : > { %10307 = vmatprep.mubr.msk.f32.mxu1 %vm322_vm1, %v11894_v19  ;;  %v12135_v61 = vpop.f32.mrf.mxu0  ;;  %v1214_v19 = vld [vmem:[%s11404_s25 + $0x1e1] sm:$0xff] }
  0xdf   : > { %v12137_v62 = vpop.f32.mrf.mxu1 }
  0xe0   : > { %v12142_v0 = vpop.f32.mrf.mxu0  ;;  %10358 = vmatmul.mubr.msk.f32.gmra.mxu0 %vm322_vm1, %v12133_v60 }
  0xe1   : > { %v12144_v1 = vpop.f32.mrf.mxu1  ;;  %10308 = vmatmul.mubr.msk.f32.gmra.mxu1 %vm322_vm1, %v11905_v20  ;;  %10360 = vmatprep.mubr.msk.f32.mxu0 %vm322_vm1, %v12140_v63  ;;  %v12208_v20 = vld [vmem:[%s11404_s25 + $0x19a] sm:$0xff] }
  0xe2   : > { %10310 = vmatprep.mubr.msk.f32.mxu1 %vm322_vm1, %v11908_v21  ;;  %v12157_v3 = vpop.f32.mrf.mxu0 }
  0xe3   : > { %v12159_v4 = vpop.f32.mrf.mxu1 }
  0xe4   : > { %v12164_v6 = vpop.f32.mrf.mxu0  ;;  %10361 = vmatmul.mubr.msk.f32.gmra.mxu0 %vm322_vm1, %v12155_v2 }
  0xe5   : > { %v12166_v7 = vpop.f32.mrf.mxu1  ;;  %10311 = vmatmul.mubr.msk.f32.gmra.mxu1 %vm322_vm1, %v11919_v22  ;;  %10363 = vmatprep.mubr.msk.f32.mxu0 %vm322_vm1, %v12162_v5 }
  0xe6   : > { %10313 = vmatprep.mubr.msk.f32.mxu1 %vm322_vm1, %v11922_v23  ;;  %v12179_v9 = vpop.f32.mrf.mxu0  ;;  %v1215_v23 = vld [vmem:[%s11404_s25 + $0x1e9] sm:$0xff] }
  0xe7   : > { %v12181_v10 = vpop.f32.mrf.mxu1 }
  0xe8   : > { %v12187_v13 = vpop.f32.mrf.mxu0  ;;  %10364 = vmatmul.mubr.msk.f32.gmra.mxu0 %vm322_vm1, %v12177_v8 }
  0xe9   : > { %v12189_v14 = vpop.f32.mrf.mxu1  ;;  %10314 = vmatmul.mubr.msk.f32.gmra.mxu1 %vm322_vm1, %v11933_v24  ;;  %10366 = vmatprep.mubr.msk.f32.mxu0 %vm322_vm1, %v12185_v12  ;;  %v12222_v24 = vld [vmem:[%s11404_s25 + $0x1a2] sm:$0xff] }
  0xea   : > { %15145 = vst [vmem:[#allocation3_spill] sm:$0xff] %v12189_v14  ;;  %10316 = vmatprep.mubr.msk.f32.mxu1 %vm322_vm1, %v1212_v11  ;;  %v12202_v17 = vpop.f32.mrf.mxu0  ;;  %15148 = vst [vmem:[#allocation6_spill] sm:$0xff] %v12222_v24 }
  0xeb   : > { %v12204_v18 = vpop.f32.mrf.mxu1 }
  0xec   : > { %15146 = vst [vmem:[#allocation4_spill] sm:$0xff] %v12204_v18  ;;  %v12210_v21 = vpop.f32.mrf.mxu0  ;;  %10367 = vmatmul.mubr.msk.f32.gmra.mxu0 %vm322_vm1, %v12200_v16 }
  0xed   : > { %v12212_v22 = vpop.f32.mrf.mxu1  ;;  %10317 = vmatmul.mubr.msk.f32.gmra.mxu1 %vm322_vm1, %v1213_v15  ;;  %10369 = vmatprep.mubr.msk.f32.mxu0 %vm322_vm1, %v12208_v20 }
  0xee   : > { %15147 = vst [vmem:[#allocation5_spill] sm:$0xff] %v12212_v22  ;;  %10319 = vmatprep.mubr.msk.f32.mxu1 %vm322_vm1, %v1214_v19  ;;  %v12224_v25 = vpop.f32.mrf.mxu0 }
  0xef   : > { %v12226_v26 = vpop.f32.mrf.mxu1 }
  0xf0   : > { %15149 = vst [vmem:[#allocation7_spill] sm:$0xff] %v12226_v26  ;;  %v12228_v11 = vpop.f32.mrf.mxu0  ;;  %10370 = vmatmul.mubr.msk.f32.gmra.mxu0 %vm322_vm1, %v12222_v24 }
  0xf1   : > { %v12230_v22 = vpop.f32.mrf.mxu1  ;;  %10320 = vmatmul.mubr.msk.f32.gmra.mxu1 %vm322_vm1, %v1215_v23  ;;  %10424 = vmatprep.mubr.msk.f32.mxu0 %vm322_vm1, %v11972_v31  ;;  %v12250_v23 = vld [vmem:[%s15130_s1 + $0x1c] sm:$0xf] }
  0xf2   : > { %15150 = vst [vmem:[#allocation8_spill] sm:$0xff] %v12230_v22  ;;  %10374 = vmatprep.mubr.msk.f32.mxu1 %vm322_vm1, %v11945_v27  ;;  %v12239_v15 = vpop.f32.mrf.mxu0  ;;  %v12255_v27 = vld [vmem:[%s15130_s1 + $0x30] sm:$0xf] }
  0xf3   : > { %v12241_v19 = vpop.f32.mrf.mxu1 }
  0xf4   : > { %15151 = vst [vmem:[#allocation9_spill] sm:$0xff] %v12241_v19  ;;  %v10126_v18 = vpop.f32.mrf.mxu0  ;;  %10425 = vmatmul.mubr.msk.f32.vlgmr.msra.gmra.mxu0 %vm322_vm1, %v11987_v32 }
  0xf5   : > { %v10076_v26 = vpop.f32.mrf.mxu1  ;;  %10375 = vmatmul.mubr.msk.f32.vlgmr.msra.gmra.mxu1 %vm322_vm1, %v11965_v30  ;;  %10523 = vmatpush3.msk.msra.mxu0 %vm419_vm0, %v11958_v29 }
  0xf6   : > { %v741_v19 = vadd.f32 %v10076_v26, %v12076_v46  ;;  %10473 = vmatpush3.msk.msra.mxu1 %vm419_vm0, %v11953_v28  ;;  %v985_v22 = vpop.f32.mrf.mxu0  ;;  %10377 = vmatprep.mubr.msk.f32.mxu1 %vm322_vm1, %v11972_v31 }
  0xf7   : > { %v735_v30 = vpop.f32.mrf.mxu1  ;;  %10427 = vmatprep.mubr.msk.f32.mxu0 %vm322_vm1, %v11990_v33  ;;  %10572 = vmatprep.subr.msk.mxu1 %vm419_vm0, %v12250_v23 }
  0xf8   : > { %v12266_v14 = vadd.f32 %v10126_v18, %v741_v19  ;;  %v736_v24 = vadd.f32 %v735_v30, %v12091_v49  ;;  %10622 = vmatprep.subr.msk.mxu0 %vm419_vm0, %v12255_v27  ;;  %v10129_v29 = vpop.f32.mrf.mxu0  ;;  %10428 = vmatmul.mubr.msk.f32.gmra.mxu0 %vm322_vm1, %v12001_v34 }
  0xf9   : > { %v10079_v28 = vpop.f32.mrf.mxu1  ;;  %10378 = vmatmul.mubr.msk.f32.gmra.mxu1 %vm322_vm1, %v11987_v32  ;;  %10430 = vmatprep.mubr.msk.f32.mxu0 %vm322_vm1, %v12004_v35 }
  0xfa   : > { %v12277_v31 = vadd.f32 %v985_v22, %v736_v24  ;;  %v751_v46 = vadd.f32 %v10079_v28, %v12098_v52  ;;  %10380 = vmatprep.mubr.msk.f32.mxu1 %vm322_vm1, %v11990_v33  ;;  %v995_v18 = vpop.f32.mrf.mxu0 }
  0xfb   : > { %v745_v49 = vpop.f32.mrf.mxu1 }
  0xfc   : > { %v12284_v26 = vadd.f32 %v10129_v29, %v751_v46  ;;  %v746_v19 = vadd.f32 %v745_v49, %v12113_v55  ;;  %v10132_v30 = vpop.f32.mrf.mxu0  ;;  %10431 = vmatmul.mubr.msk.f32.gmra.mxu0 %vm322_vm1, %v12015_v36 }
  0xfd   : > { %v10082_v32 = vpop.f32.mrf.mxu1  ;;  %10381 = vmatmul.mubr.msk.f32.gmra.mxu1 %vm322_vm1, %v12001_v34  ;;  %10433 = vmatprep.mubr.msk.f32.mxu0 %vm322_vm1, %v12018_v37 }
  0xfe   : > { %v12291_v52 = vadd.f32 %v995_v18, %v746_v19  ;;  %v761_v33 = vadd.f32 %v10082_v32, %v12120_v58  ;;  %10383 = vmatprep.mubr.msk.f32.mxu1 %vm322_vm1, %v12004_v35  ;;  %v1005_v55 = vpop.f32.mrf.mxu0 }
  0xff   : > { %v755_v22 = vpop.f32.mrf.mxu1 }
 0x100   : > { %v12298_v24 = vadd.f32 %v10132_v30, %v761_v33  ;;  %v756_v28 = vadd.f32 %v755_v22, %v12135_v61  ;;  %v10135_v29 = vpop.f32.mrf.mxu0  ;;  %10434 = vmatmul.mubr.msk.f32.gmra.mxu0 %vm322_vm1, %v12029_v38 }
 0x101   : > { %v10085_v34 = vpop.f32.mrf.mxu1  ;;  %10384 = vmatmul.mubr.msk.f32.gmra.mxu1 %vm322_vm1, %v12015_v36  ;;  %10436 = vmatprep.mubr.msk.f32.mxu0 %vm322_vm1, %v12032_v39 }
 0x102   : > { %v12305_v58 = vadd.f32 %v1005_v55, %v756_v28  ;;  %v771_v35 = vadd.f32 %v10085_v34, %v12142_v0  ;;  %10386 = vmatprep.mubr.msk.f32.mxu1 %vm322_vm1, %v12018_v37  ;;  %v1015_v61 = vpop.f32.mrf.mxu0 }
 0x103   : > { %v765_v46 = vpop.f32.mrf.mxu1 }
 0x104   : > { %v12312_v49 = vadd.f32 %v10135_v29, %v771_v35  ;;  %v766_v18 = vadd.f32 %v765_v46, %v12157_v3  ;;  %v10138_v19 = vpop.f32.mrf.mxu0  ;;  %10437 = vmatmul.mubr.msk.f32.gmra.mxu0 %vm322_vm1, %v12043_v40 }
 0x105   : > { %v10088_v36 = vpop.f32.mrf.mxu1  ;;  %10387 = vmatmul.mubr.msk.f32.gmra.mxu1 %vm322_vm1, %v12029_v38  ;;  %10439 = vmatprep.mubr.msk.f32.mxu0 %vm322_vm1, %v12046_v41 }
 0x106   : > { %v12319_v0 = vadd.f32 %v1015_v61, %v766_v18  ;;  %v781_v37 = vadd.f32 %v10088_v36, %v12164_v6  ;;  %10389 = vmatprep.mubr.msk.f32.mxu1 %vm322_vm1, %v12032_v39  ;;  %v1025_v3 = vpop.f32.mrf.mxu0 }
 0x107   : > { %v775_v32 = vpop.f32.mrf.mxu1 }
 0x108   : > { %v12326_v30 = vadd.f32 %v10138_v19, %v781_v37  ;;  %v776_v33 = vadd.f32 %v775_v32, %v12179_v9  ;;  %v10141_v22 = vpop.f32.mrf.mxu0  ;;  %10440 = vmatmul.mubr.msk.f32.gmra.mxu0 %vm322_vm1, %v12057_v42 }
 0x109   : > { %v10091_v38 = vpop.f32.mrf.mxu1  ;;  %10390 = vmatmul.mubr.msk.f32.gmra.mxu1 %vm322_vm1, %v12043_v40  ;;  %10442 = vmatprep.mubr.msk.f32.mxu0 %vm322_vm1, %v12060_v43 }
 0x10a   : > { %v12333_v6 = vadd.f32 %v1025_v3, %v776_v33  ;;  %v791_v39 = vadd.f32 %v10091_v38, %v12187_v13  ;;  %10392 = vmatprep.mubr.msk.f32.mxu1 %vm322_vm1, %v12046_v41  ;;  %v1035_v9 = vpop.f32.mrf.mxu0 }
 0x10b   : > { %v785_v55 = vpop.f32.mrf.mxu1 }
 0x10c   : > { %v12340_v28 = vadd.f32 %v10141_v22, %v791_v39  ;;  %v786_v34 = vadd.f32 %v785_v55, %v12202_v17  ;;  %v10144_v29 = vpop.f32.mrf.mxu0  ;;  %10443 = vmatmul.mubr.msk.f32.gmra.mxu0 %vm322_vm1, %v12071_v44 }
 0x10d   : > { %v10094_v40 = vpop.f32.mrf.mxu1  ;;  %10393 = vmatmul.mubr.msk.f32.gmra.mxu1 %vm322_vm1, %v12057_v42  ;;  %10445 = vmatprep.mubr.msk.f32.mxu0 %vm322_vm1, %v12074_v45 }
 0x10e   : > { %v12347_v13 = vadd.f32 %v1035_v9, %v786_v34  ;;  %v801_v41 = vadd.f32 %v10094_v40, %v12210_v21  ;;  %10395 = vmatprep.mubr.msk.f32.mxu1 %vm322_vm1, %v12060_v43  ;;  %v1045_v17 = vpop.f32.mrf.mxu0 }
 0x10f   : > { %v795_v35 = vpop.f32.mrf.mxu1 }
 0x110   : > { %v12354_v46 = vadd.f32 %v10144_v29, %v801_v41  ;;  %v796_v61 = vadd.f32 %v795_v35, %v12224_v25  ;;  %v10147_v18 = vpop.f32.mrf.mxu0  ;;  %10446 = vmatmul.mubr.msk.f32.gmra.mxu0 %vm322_vm1, %v12089_v48 }
 0x111   : > { %v10097_v42 = vpop.f32.mrf.mxu1  ;;  %10396 = vmatmul.mubr.msk.f32.gmra.mxu1 %vm322_vm1, %v12071_v44  ;;  %10448 = vmatprep.mubr.msk.f32.mxu0 %vm322_vm1, %v12096_v51 }
 0x112   : > { %v12361_v21 = vadd.f32 %v1045_v17, %v796_v61  ;;  %v811_v43 = vadd.f32 %v10097_v42, %v12228_v11  ;;  %10398 = vmatprep.mubr.msk.f32.mxu1 %vm322_vm1, %v12074_v45  ;;  %v1055_v25 = vpop.f32.mrf.mxu0 }
 0x113   : > { %v805_v36 = vpop.f32.mrf.mxu1 }
 0x114   : > { %v12368_v19 = vadd.f32 %v10147_v18, %v811_v43  ;;  %v806_v37 = vadd.f32 %v805_v36, %v12239_v15  ;;  %v10150_v32 = vpop.f32.mrf.mxu0  ;;  %10449 = vmatmul.mubr.msk.f32.gmra.mxu0 %vm322_vm1, %v12111_v54  ;;  %v2160_v36 = vld [vmem:[%s11404_s25 + $0x1b2] sm:$0xff] }
 0x115   : > { %v10100_v44 = vpop.f32.mrf.mxu1  ;;  %10399 = vmatmul.mubr.msk.f32.gmra.mxu1 %vm322_vm1, %v12089_v48  ;;  %10451 = vmatprep.mubr.msk.f32.mxu0 %vm322_vm1, %v12118_v57 }
 0x116   : > { %v12375_v11 = vadd.f32 %v1055_v25, %v806_v37  ;;  %v821_v45 = vadd.f32 %v10100_v44, %v12078_v47  ;;  %10401 = vmatprep.mubr.msk.f32.mxu1 %vm322_vm1, %v12096_v51  ;;  %v1065_v15 = vpop.f32.mrf.mxu0 }
 0x117   : > { %v815_v3 = vpop.f32.mrf.mxu1 }
 0x118   : > { %v12382_v33 = vadd.f32 %v10150_v32, %v821_v45  ;;  %v816_v38 = vadd.f32 %v815_v3, %v12093_v50  ;;  %v10153_v22 = vpop.f32.mrf.mxu0  ;;  %10452 = vmatmul.mubr.msk.f32.gmra.mxu0 %vm322_vm1, %v12133_v60  ;;  %v15153_v32 = vld [vmem:[#allocation3_spill] sm:$0xff] }
 0x119   : > { %v10103_v48 = vpop.f32.mrf.mxu1  ;;  %10402 = vmatmul.mubr.msk.f32.gmra.mxu1 %vm322_vm1, %v12111_v54  ;;  %10454 = vmatprep.mubr.msk.f32.mxu0 %vm322_vm1, %v12140_v63  ;;  %v2161_v3 = vld [vmem:[%s11404_s25 + $0x1ba] sm:$0xff] }
 0x11a   : > { %v12389_v47 = vadd.f32 %v1065_v15, %v816_v38  ;;  %v831_v51 = vadd.f32 %v10103_v48, %v12100_v53  ;;  %10404 = vmatprep.mubr.msk.f32.mxu1 %vm322_vm1, %v12118_v57  ;;  %v1075_v50 = vpop.f32.mrf.mxu0  ;;  %v2162_v38 = vld [vmem:[%s11404_s25 + $0x1ca] sm:$0xff] }
 0x11b   : > { %v825_v39 = vpop.f32.mrf.mxu1  ;;  %v15154_v48 = vld [vmem:[#allocation4_spill] sm:$0xff] }
 0x11c   : > { %v12396_v55 = vadd.f32 %v10153_v22, %v831_v51  ;;  %v826_v9 = vadd.f32 %v825_v39, %v12115_v56  ;;  %v10156_v34 = vpop.f32.mrf.mxu0  ;;  %10455 = vmatmul.mubr.msk.f32.gmra.mxu0 %vm322_vm1, %v12155_v2 }
 0x11d   : > { %v10106_v54 = vpop.f32.mrf.mxu1  ;;  %10405 = vmatmul.mubr.msk.f32.gmra.mxu1 %vm322_vm1, %v12133_v60  ;;  %10457 = vmatprep.mubr.msk.f32.mxu0 %vm322_vm1, %v12162_v5 }
 0x11e   : > { %v12403_v53 = vadd.f32 %v1075_v50, %v826_v9  ;;  %v841_v57 = vadd.f32 %v10106_v54, %v12122_v59  ;;  %10407 = vmatprep.mubr.msk.f32.mxu1 %vm322_vm1, %v12140_v63  ;;  %v1085_v56 = vpop.f32.mrf.mxu0  ;;  %v15155_v50 = vld [vmem:[#allocation5_spill] sm:$0xff] }
 0x11f   : > { %v835_v40 = vpop.f32.mrf.mxu1  ;;  %v2163_v54 = vld [vmem:[%s11404_s25 + $0x1d2] sm:$0xff] }
 0x120   : > { %v12410_v29 = vadd.f32 %v10156_v34, %v841_v57  ;;  %v836_v41 = vadd.f32 %v835_v40, %v12137_v62  ;;  %v10159_v35 = vpop.f32.mrf.mxu0  ;;  %10458 = vmatmul.mubr.msk.f32.gmra.mxu0 %vm322_vm1, %v12177_v8  ;;  %v3064_v40 = vld [vmem:[%s11404_s25 + $0x3] sm:$0xff] }
 0x121   : > { %v10109_v60 = vpop.f32.mrf.mxu1  ;;  %10408 = vmatmul.mubr.msk.f32.gmra.mxu1 %vm322_vm1, %v12155_v2  ;;  %10460 = vmatprep.mubr.msk.f32.mxu0 %vm322_vm1, %v12185_v12 }
 0x122   : > { %v12417_v59 = vadd.f32 %v1085_v56, %v836_v41  ;;  %v851_v63 = vadd.f32 %v10109_v60, %v12144_v1  ;;  %10410 = vmatprep.mubr.msk.f32.mxu1 %vm322_vm1, %v12162_v5  ;;  %v1095_v17 = vpop.f32.mrf.mxu0  ;;  %v3066_v56 = vld [vmem:[%s11404_s25 + $0x1b] sm:$0xff] }
 0x123   : > { %v845_v62 = vpop.f32.mrf.mxu1  ;;  %v15156_v60 = vld [vmem:[#allocation7_spill] sm:$0xff] }
 0x124   : > { %v12424_v61 = vadd.f32 %v10159_v35, %v851_v63  ;;  %v846_v2 = vadd.f32 %v845_v62, %v12159_v4  ;;  %v10162_v18 = vpop.f32.mrf.mxu0  ;;  %10461 = vmatmul.mubr.msk.f32.gmra.mxu0 %vm322_vm1, %v12200_v16 }
 0x125   : > { %v10112_v42 = vpop.f32.mrf.mxu1  ;;  %10411 = vmatmul.mubr.msk.f32.gmra.mxu1 %vm322_vm1, %v12177_v8  ;;  %10463 = vmatprep.mubr.msk.f32.mxu0 %vm322_vm1, %v12208_v20 }
 0x126   : > { %v12431_v1 = vadd.f32 %v1095_v17, %v846_v2  ;;  %v861_v5 = vadd.f32 %v10112_v42, %v12166_v7  ;;  %10413 = vmatprep.mubr.msk.f32.mxu1 %vm322_vm1, %v12185_v12  ;;  %v1105_v43 = vpop.f32.mrf.mxu0  ;;  %v15152_v7 = vld [vmem:[#allocation6_spill] sm:$0xff]  ;;  %v15157_v2 = vld [vmem:[#allocation8_spill] sm:$0xff] }
 0x127   : > { %v855_v4 = vpop.f32.mrf.mxu1 }
 0x128   : > { %v12439_v25 = vadd.f32 %v10162_v18, %v861_v5  ;;  %v856_v8 = vadd.f32 %v855_v4, %v12181_v10  ;;  %v10165_v44 = vpop.f32.mrf.mxu0  ;;  %10464 = vmatmul.mubr.msk.f32.gmra.mxu0 %vm322_vm1, %v15152_v7  ;;  %v3065_v18 = vld [vmem:[%s11404_s25 + $0xb] sm:$0xff]  ;;  %v3067_v5 = vld [vmem:[%s11404_s25 + $0x23] sm:$0xff] }
 0x129   : > { %v10115_v37 = vpop.f32.mrf.mxu1  ;;  %10414 = vmatmul.mubr.msk.f32.gmra.mxu1 %vm322_vm1, %v12200_v16  ;;  %10466 = vmatprep.mubr.msk.f32.mxu0 %vm322_vm1, %v2160_v36 }
 0x12a   : > { %v12446_v12 = vadd.f32 %v1105_v43, %v856_v8  ;;  %v871_v45 = vadd.f32 %v10115_v37, %v15153_v32  ;;  %10416 = vmatprep.mubr.msk.f32.mxu1 %vm322_vm1, %v12208_v20  ;;  %v1115_v15 = vpop.f32.mrf.mxu0  ;;  %v15158_v8 = vld [vmem:[#allocation9_spill] sm:$0xff] }
 0x12b   : > { %v865_v10 = vpop.f32.mrf.mxu1 }
 0x12c   : > { %v12454_v16 = vadd.f32 %v10165_v44, %v871_v45  ;;  %v866_v22 = vadd.f32 %v865_v10, %v15154_v48  ;;  %v10168_v39 = vpop.f32.mrf.mxu0  ;;  %10467 = vmatmul.mubr.msk.f32.gmra.mxu0 %vm322_vm1, %v2161_v3  ;;  %v12484_v44 = vld [vmem:[%s11404_s25 + $0x33] sm:$0xff]  ;;  %v12491_v45 = vld [vmem:[%s15130_s1 + $0x44] sm:$0xf] }
 0x12d   : > { %v10118_v51 = vpop.f32.mrf.mxu1  ;;  %10417 = vmatmul.mubr.msk.f32.gmra.mxu1 %vm322_vm1, %v15152_v7  ;;  %10469 = vmatprep.mubr.msk.f32.mxu0 %vm322_vm1, %v2162_v38  ;;  %v12506_v38 = vld [vmem:[%s11404_s25 + $0x3b] sm:$0xff] }
 0x12e   : > { %v12460_v20 = vadd.f32 %v1115_v15, %v866_v22  ;;  %v881_v9 = vadd.f32 %v10118_v51, %v15155_v50  ;;  %10419 = vmatprep.mubr.msk.f32.mxu1 %vm322_vm1, %v2160_v36  ;;  %v1125_v57 = vpop.f32.mrf.mxu0  ;;  %v12512_v51 = vld [vmem:[%s11404_s25 + $0x4b] sm:$0xff] }
 0x12f   : > { %v875_v34 = vpop.f32.mrf.mxu1 }
 0x130   : > { %v12468_v41 = vadd.f32 %v10168_v39, %v881_v9  ;;  %v876_v35 = vadd.f32 %v875_v34, %v15156_v60  ;;  %v10171_v62 = vpop.f32.mrf.mxu0  ;;  %10470 = vmatmul.mubr.msk.f32.gmra.mxu0 %vm322_vm1, %v2163_v54 }
 0x131   : > { %v10121_v63 = vpop.f32.mrf.mxu1  ;;  %10420 = vmatmul.mubr.msk.f32.gmra.mxu1 %vm322_vm1, %v2161_v3  ;;  %10524 = vmatprep.mubr.msk.f32.mxu0 %vm322_vm1, %v3066_v56  ;;  %v12496_v3 = vld [vmem:[%s15130_s1 + $0x50] sm:$0xf] }
 0x132   : > { %v12473_v17 = vadd.f32 %v1125_v57, %v876_v35  ;;  %v891_v42 = vadd.f32 %v10121_v63, %v15157_v2  ;;  %10474 = vmatprep.mubr.msk.f32.mxu1 %vm322_vm1, %v3064_v40  ;;  %v1135_v43 = vpop.f32.mrf.mxu0  ;;  %v12535_v57 = vld [vmem:[%s11404_s25 + $0x63] sm:$0xff] }
 0x133   : > { %v885_v4 = vpop.f32.mrf.mxu1 }
 0x134   : > { %v12480_v36 = vadd.f32 %v10171_v62, %v891_v42  ;;  %v886_v37 = vadd.f32 %v885_v4, %v15158_v8  ;;  %v10226_v32 = vpop.f32.mrf.mxu0  ;;  %10525 = vmatmul.mubr.msk.f32.vlgmr.msra.gmra.mxu0 %vm322_vm1, %v3067_v5  ;;  %v12555_v42 = vld [vmem:[%s11404_s25 + $0x7b] sm:$0xff] }
 0x135   : > { %v10176_v7 = vpop.f32.mrf.mxu1  ;;  %10475 = vmatmul.mubr.msk.f32.vlgmr.msra.gmra.mxu1 %vm322_vm1, %v3065_v18  ;;  %10623 = vmatpush3.msk.msra.mxu0 %vm419_vm0, %v12255_v27 }
 0x136   : > { %v12498_v10 = vadd.f32 %v1135_v43, %v886_v37  ;;  %v1545_v15 = vadd.f32 %v10176_v7, %v12266_v14  ;;  %10573 = vmatpush3.msk.msra.mxu1 %vm419_vm0, %v12250_v23  ;;  %v1661_v22 = vpop.f32.mrf.mxu0  ;;  %10477 = vmatprep.mubr.msk.f32.mxu1 %vm322_vm1, %v3066_v56 }
 0x137   : > { %v1385_v48 = vpop.f32.mrf.mxu1  ;;  %10527 = vmatprep.mubr.msk.f32.mxu0 %vm322_vm1, %v12484_v44  ;;  %10672 = vmatprep.subr.msk.mxu1 %vm419_vm0, %v12491_v45 }
 0x138   : > { %v12514_v14 = vadd.f32 %v10226_v32, %v1545_v15  ;;  %v1544_v23 = vadd.f32 %v1385_v48, %v12277_v31  ;;  %10722 = vmatprep.subr.msk.mxu0 %vm419_vm0, %v12496_v3  ;;  %v10229_v39 = vpop.f32.mrf.mxu0  ;;  %10528 = vmatmul.mubr.msk.f32.gmra.mxu0 %vm322_vm1, %v12506_v38  ;;  %v12532_v31 = vld [vmem:[%s11404_s25 + $0x53] sm:$0xff] }
 0x139   : > { %v10179_v27 = vpop.f32.mrf.mxu1  ;;  %10478 = vmatmul.mubr.msk.f32.gmra.mxu1 %vm322_vm1, %v3067_v5  ;;  %10530 = vmatprep.mubr.msk.f32.mxu0 %vm322_vm1, %v12512_v51  ;;  %v12575_v32 = vld [vmem:[%s11404_s25 + $0x93] sm:$0xff] }
 0x13a   : > { %v12524_v50 = vadd.f32 %v1661_v22, %v1544_v23  ;;  %v1547_v9 = vadd.f32 %v10179_v27, %v12284_v26  ;;  %10480 = vmatprep.mubr.msk.f32.mxu1 %vm322_vm1, %v12484_v44  ;;  %v1671_v34 = vpop.f32.mrf.mxu0 }
 0x13b   : > { %v1395_v54 = vpop.f32.mrf.mxu1 }
 0x13c   : > { %v12537_v40 = vadd.f32 %v10229_v39, %v1547_v9  ;;  %v1546_v56 = vadd.f32 %v1395_v54, %v12291_v52  ;;  %v10232_v26 = vpop.f32.mrf.mxu0  ;;  %10531 = vmatmul.mubr.msk.f32.gmra.mxu0 %vm322_vm1, %v12532_v31  ;;  %v12552_v52 = vld [vmem:[%s11404_s25 + $0x6b] sm:$0xff] }
 0x13d   : > { %v10182_v60 = vpop.f32.mrf.mxu1  ;;  %10481 = vmatmul.mubr.msk.f32.gmra.mxu1 %vm322_vm1, %v12506_v38  ;;  %10533 = vmatprep.mubr.msk.f32.mxu0 %vm322_vm1, %v12535_v57  ;;  %v12595_v54 = vld [vmem:[%s11404_s25 + $0xab] sm:$0xff] }
 0x13e   : > { %v12544_v35 = vadd.f32 %v1671_v34, %v1546_v56  ;;  %v1549_v63 = vadd.f32 %v10182_v60, %v12298_v24  ;;  %10483 = vmatprep.mubr.msk.f32.mxu1 %vm322_vm1, %v12512_v51  ;;  %v1681_v2 = vpop.f32.mrf.mxu0 }
 0x13f   : > { %v1405_v62 = vpop.f32.mrf.mxu1 }
 0x140   : > { %v12557_v18 = vadd.f32 %v10232_v26, %v1549_v63  ;;  %v1548_v5 = vadd.f32 %v1405_v62, %v12305_v58  ;;  %v10235_v24 = vpop.f32.mrf.mxu0  ;;  %10534 = vmatmul.mubr.msk.f32.gmra.mxu0 %vm322_vm1, %v12552_v52  ;;  %v12572_v58 = vld [vmem:[%s11404_s25 + $0x83] sm:$0xff] }
 0x141   : > { %v10185_v4 = vpop.f32.mrf.mxu1  ;;  %10484 = vmatmul.mubr.msk.f32.gmra.mxu1 %vm322_vm1, %v12532_v31  ;;  %10536 = vmatprep.mubr.msk.f32.mxu0 %vm322_vm1, %v12555_v42 }
 0x142   : > { %v12564_v43 = vadd.f32 %v1681_v2, %v1548_v5  ;;  %v1551_v8 = vadd.f32 %v10185_v4, %v12312_v49  ;;  %10486 = vmatprep.mubr.msk.f32.mxu1 %vm322_vm1, %v12535_v57  ;;  %v1691_v7 = vpop.f32.mrf.mxu0  ;;  %v12615_v5 = vld [vmem:[%s11404_s25 + $0xc3] sm:$0xff] }
 0x143   : > { %v1415_v37 = vpop.f32.mrf.mxu1 }
 0x144   : > { %v12577_v15 = vadd.f32 %v10235_v24, %v1551_v8  ;;  %v1550_v48 = vadd.f32 %v1415_v37, %v12319_v0  ;;  %v10238_v49 = vpop.f32.mrf.mxu0  ;;  %10537 = vmatmul.mubr.msk.f32.gmra.mxu0 %vm322_vm1, %v12572_v58  ;;  %v12592_v0 = vld [vmem:[%s11404_s25 + $0x9b] sm:$0xff] }
 0x145   : > { %v10188_v22 = vpop.f32.mrf.mxu1  ;;  %10487 = vmatmul.mubr.msk.f32.gmra.mxu1 %vm322_vm1, %v12552_v52  ;;  %10539 = vmatprep.mubr.msk.f32.mxu0 %vm322_vm1, %v12575_v32 }
 0x146   : > { %v12584_v23 = vadd.f32 %v1691_v7, %v1550_v48  ;;  %v1553_v27 = vadd.f32 %v10188_v22, %v12326_v30  ;;  %10489 = vmatprep.mubr.msk.f32.mxu1 %vm322_vm1, %v12555_v42  ;;  %v1701_v9 = vpop.f32.mrf.mxu0 }
 0x147   : > { %v1425_v39 = vpop.f32.mrf.mxu1 }
 0x148   : > { %v12597_v34 = vadd.f32 %v10238_v49, %v1553_v27  ;;  %v1552_v56 = vadd.f32 %v1425_v39, %v12333_v6  ;;  %v10241_v30 = vpop.f32.mrf.mxu0  ;;  %10540 = vmatmul.mubr.msk.f32.gmra.mxu0 %vm322_vm1, %v12592_v0  ;;  %v12612_v6 = vld [vmem:[%s11404_s25 + $0xb3] sm:$0xff]  ;;  %v12635_v49 = vld [vmem:[%s11404_s25 + $0xdb] sm:$0xff] }
 0x149   : > { %v10191_v60 = vpop.f32.mrf.mxu1  ;;  %10490 = vmatmul.mubr.msk.f32.gmra.mxu1 %vm322_vm1, %v12572_v58  ;;  %10542 = vmatprep.mubr.msk.f32.mxu0 %vm322_vm1, %v12595_v54 }
 0x14a   : > { %v12604_v26 = vadd.f32 %v1701_v9, %v1552_v56  ;;  %v1555_v63 = vadd.f32 %v10191_v60, %v12340_v28  ;;  %10492 = vmatprep.mubr.msk.f32.mxu1 %vm322_vm1, %v12575_v32  ;;  %v1711_v2 = vpop.f32.mrf.mxu0 }
 0x14b   : > { %v1435_v62 = vpop.f32.mrf.mxu1 }
 0x14c   : > { %v12617_v4 = vadd.f32 %v10241_v30, %v1555_v63  ;;  %v1554_v24 = vadd.f32 %v1435_v62, %v12347_v13  ;;  %v10244_v28 = vpop.f32.mrf.mxu0  ;;  %10543 = vmatmul.mubr.msk.f32.gmra.mxu0 %vm322_vm1, %v12612_v6  ;;  %v12632_v13 = vld [vmem:[%s11404_s25 + $0xcb] sm:$0xff]  ;;  %v12655_v62 = vld [vmem:[%s11404_s25 + $0xf3] sm:$0xff] }
 0x14d   : > { %v10194_v8 = vpop.f32.mrf.mxu1  ;;  %10493 = vmatmul.mubr.msk.f32.gmra.mxu1 %vm322_vm1, %v12592_v0  ;;  %10545 = vmatprep.mubr.msk.f32.mxu0 %vm322_vm1, %v12615_v5 }
 0x14e   : > { %v12624_v37 = vadd.f32 %v1711_v2, %v1554_v24  ;;  %v1557_v7 = vadd.f32 %v10194_v8, %v12354_v46  ;;  %10495 = vmatprep.mubr.msk.f32.mxu1 %vm322_vm1, %v12595_v54  ;;  %v1721_v22 = vpop.f32.mrf.mxu0 }
 0x14f   : > { %v1445_v48 = vpop.f32.mrf.mxu1 }
 0x150   : > { %v12637_v27 = vadd.f32 %v10244_v28, %v1557_v7  ;;  %v1556_v39 = vadd.f32 %v1445_v48, %v12361_v21  ;;  %v10247_v46 = vpop.f32.mrf.mxu0  ;;  %10546 = vmatmul.mubr.msk.f32.gmra.mxu0 %vm322_vm1, %v12632_v13  ;;  %v12652_v21 = vld [vmem:[%s11404_s25 + $0xe3] sm:$0xff] }
 0x151   : > { %v10197_v9 = vpop.f32.mrf.mxu1  ;;  %10496 = vmatmul.mubr.msk.f32.gmra.mxu1 %vm322_vm1, %v12612_v6  ;;  %10548 = vmatprep.mubr.msk.f32.mxu0 %vm322_vm1, %v12635_v49 }
 0x152   : > { %v12644_v56 = vadd.f32 %v1721_v22, %v1556_v39  ;;  %v1559_v60 = vadd.f32 %v10197_v9, %v12368_v19  ;;  %10498 = vmatprep.mubr.msk.f32.mxu1 %vm322_vm1, %v12615_v5  ;;  %v1731_v63 = vpop.f32.mrf.mxu0  ;;  %v12675_v39 = vld [vmem:[%s11404_s25 + $0x10b] sm:$0xff] }
 0x153   : > { %v1455_v30 = vpop.f32.mrf.mxu1 }
 0x154   : > { %v12657_v2 = vadd.f32 %v10247_v46, %v1559_v60  ;;  %v1558_v24 = vadd.f32 %v1455_v30, %v12375_v11  ;;  %v10250_v19 = vpop.f32.mrf.mxu0  ;;  %10549 = vmatmul.mubr.msk.f32.gmra.mxu0 %vm322_vm1, %v12652_v21  ;;  %v12672_v11 = vld [vmem:[%s11404_s25 + $0xfb] sm:$0xff] }
 0x155   : > { %v10200_v8 = vpop.f32.mrf.mxu1  ;;  %10499 = vmatmul.mubr.msk.f32.gmra.mxu1 %vm322_vm1, %v12632_v13  ;;  %10551 = vmatprep.mubr.msk.f32.mxu0 %vm322_vm1, %v12655_v62 }
 0x156   : > { %v12664_v28 = vadd.f32 %v1731_v63, %v1558_v24  ;;  %v1561_v7 = vadd.f32 %v10200_v8, %v12382_v33  ;;  %10501 = vmatprep.mubr.msk.f32.mxu1 %vm322_vm1, %v12635_v49  ;;  %v1741_v22 = vpop.f32.mrf.mxu0 }
 0x157   : > { %v1465_v48 = vpop.f32.mrf.mxu1 }
 0x158   : > { %v12677_v9 = vadd.f32 %v10250_v19, %v1561_v7  ;;  %v1560_v46 = vadd.f32 %v1465_v48, %v12389_v47  ;;  %v10253_v33 = vpop.f32.mrf.mxu0  ;;  %10552 = vmatmul.mubr.msk.f32.gmra.mxu0 %vm322_vm1, %v12672_v11  ;;  %v12692_v47 = vld [vmem:[%s11404_s25 + $0x113] sm:$0xff]  ;;  %v12695_v19 = vld [vmem:[%s11404_s25 + $0x123] sm:$0xff] }
 0x159   : > { %v10203_v60 = vpop.f32.mrf.mxu1  ;;  %10502 = vmatmul.mubr.msk.f32.gmra.mxu1 %vm322_vm1, %v12652_v21  ;;  %10554 = vmatprep.mubr.msk.f32.mxu0 %vm322_vm1, %v12675_v39 }
 0x15a   : > { %v12684_v30 = vadd.f32 %v1741_v22, %v1560_v46  ;;  %v1563_v63 = vadd.f32 %v10203_v60, %v12396_v55  ;;  %10504 = vmatprep.mubr.msk.f32.mxu1 %vm322_vm1, %v12655_v62  ;;  %v1751_v8 = vpop.f32.mrf.mxu0 }
 0x15b   : > { %v1475_v24 = vpop.f32.mrf.mxu1 }
 0x15c   : > { %v12697_v7 = vadd.f32 %v10253_v33, %v1563_v63  ;;  %v1562_v48 = vadd.f32 %v1475_v24, %v12403_v53  ;;  %v10256_v55 = vpop.f32.mrf.mxu0  ;;  %10555 = vmatmul.mubr.msk.f32.gmra.mxu0 %vm322_vm1, %v12692_v47  ;;  %v12712_v53 = vld [vmem:[%s11404_s25 + $0x12b] sm:$0xff]  ;;  %v12715_v24 = vld [vmem:[%s11404_s25 + $0x13b] sm:$0xff] }
 0x15d   : > { %v10206_v22 = vpop.f32.mrf.mxu1  ;;  %10505 = vmatmul.mubr.msk.f32.gmra.mxu1 %vm322_vm1, %v12672_v11  ;;  %10557 = vmatprep.mubr.msk.f32.mxu0 %vm322_vm1, %v12695_v19 }
 0x15e   : > { %15159 = vst [vmem:[#allocation6_spill] sm:$0xff] %v12697_v7  ;;  %v12704_v46 = vadd.f32 %v1751_v8, %v1562_v48  ;;  %v1565_v60 = vadd.f32 %v10206_v22, %v12410_v29  ;;  %10507 = vmatprep.mubr.msk.f32.mxu1 %vm322_vm1, %v12675_v39  ;;  %v1761_v63 = vpop.f32.mrf.mxu0 }
 0x15f   : > { %v1485_v33 = vpop.f32.mrf.mxu1 }
 0x160   : > { %15160 = vst [vmem:[#allocation3_spill] sm:$0xff] %v12704_v46  ;;  %v12717_v7 = vadd.f32 %v10256_v55, %v1565_v60  ;;  %v1564_v8 = vadd.f32 %v1485_v33, %v12417_v59  ;;  %v10259_v29 = vpop.f32.mrf.mxu0  ;;  %10558 = vmatmul.mubr.msk.f32.gmra.mxu0 %vm322_vm1, %v12712_v53  ;;  %v12732_v59 = vld [vmem:[%s11404_s25 + $0x143] sm:$0xff]  ;;  %v12735_v33 = vld [vmem:[%s11404_s25 + $0x153] sm:$0xff] }
 0x161   : > { %v10209_v48 = vpop.f32.mrf.mxu1  ;;  %10508 = vmatmul.mubr.msk.f32.gmra.mxu1 %vm322_vm1, %v12692_v47  ;;  %10560 = vmatprep.mubr.msk.f32.mxu0 %vm322_vm1, %v12715_v24  ;;  %15163 = vst [vmem:[#allocation7_spill] sm:$0xff] %v12735_v33 }
 0x162   : > { %15161 = vst [vmem:[#allocation4_spill] sm:$0xff] %v12717_v7  ;;  %v12724_v22 = vadd.f32 %v1761_v63, %v1564_v8  ;;  %v1567_v46 = vadd.f32 %v10209_v48, %v12424_v61  ;;  %10510 = vmatprep.mubr.msk.f32.mxu1 %vm322_vm1, %v12695_v19  ;;  %v1771_v60 = vpop.f32.mrf.mxu0 }
 0x163   : > { %v1495_v55 = vpop.f32.mrf.mxu1 }
 0x164   : > { %15162 = vst [vmem:[#allocation5_spill] sm:$0xff] %v12724_v22  ;;  %v12737_v7 = vadd.f32 %v10259_v29, %v1567_v46  ;;  %v1566_v63 = vadd.f32 %v1495_v55, %v12431_v1  ;;  %v10262_v61 = vpop.f32.mrf.mxu0  ;;  %10561 = vmatmul.mubr.msk.f32.gmra.mxu0 %vm322_vm1, %v12732_v59  ;;  %v12752_v1 = vld [vmem:[%s11404_s25 + $0x15b] sm:$0xff]  ;;  %v12755_v55 = vld [vmem:[%s11404_s25 + $0x16b] sm:$0xff] }
 0x165   : > { %v10212_v8 = vpop.f32.mrf.mxu1  ;;  %10511 = vmatmul.mubr.msk.f32.gmra.mxu1 %vm322_vm1, %v12712_v53  ;;  %10563 = vmatprep.mubr.msk.f32.mxu0 %vm322_vm1, %v12735_v33  ;;  %15166 = vst [vmem:[#allocation10_spill] sm:$0xff] %v12752_v1 }
 0x166   : > { %15164 = vst [vmem:[#allocation8_spill] sm:$0xff] %v12737_v7  ;;  %v12744_v48 = vadd.f32 %v1771_v60, %v1566_v63  ;;  %v1569_v22 = vadd.f32 %v10212_v8, %v12439_v25  ;;  %10513 = vmatprep.mubr.msk.f32.mxu1 %vm322_vm1, %v12715_v24  ;;  %v1781_v29 = vpop.f32.mrf.mxu0 }
 0x167   : > { %v1505_v46 = vpop.f32.mrf.mxu1 }
 0x168   : > { %15165 = vst [vmem:[#allocation9_spill] sm:$0xff] %v12744_v48  ;;  %v12757_v7 = vadd.f32 %v10262_v61, %v1569_v22  ;;  %v1568_v60 = vadd.f32 %v1505_v46, %v12446_v12  ;;  %v10265_v25 = vpop.f32.mrf.mxu0  ;;  %10564 = vmatmul.mubr.msk.f32.gmra.mxu0 %vm322_vm1, %v12752_v1  ;;  %v12772_v12 = vld [vmem:[%s11404_s25 + $0x173] sm:$0xff]  ;;  %v12775_v46 = vld [vmem:[%s11404_s25 + $0x183] sm:$0xff] }
 0x169   : > { %v10215_v63 = vpop.f32.mrf.mxu1  ;;  %10514 = vmatmul.mubr.msk.f32.gmra.mxu1 %vm322_vm1, %v12732_v59  ;;  %10566 = vmatprep.mubr.msk.f32.mxu0 %vm322_vm1, %v12755_v55 }
 0x16a   : > { %15167 = vst [vmem:[#allocation11_spill] sm:$0xff] %v12757_v7  ;;  %v12764_v8 = vadd.f32 %v1781_v29, %v1568_v60  ;;  %v1571_v48 = vadd.f32 %v10215_v63, %v12454_v16  ;;  %10516 = vmatprep.mubr.msk.f32.mxu1 %vm322_vm1, %v12735_v33  ;;  %v1791_v61 = vpop.f32.mrf.mxu0 }
 0x16b   : > { %v1515_v22 = vpop.f32.mrf.mxu1 }
 0x16c   : > { %15168 = vst [vmem:[#allocation12_spill] sm:$0xff] %v12764_v8  ;;  %v12777_v7 = vadd.f32 %v10265_v25, %v1571_v48  ;;  %v1570_v29 = vadd.f32 %v1515_v22, %v12460_v20  ;;  %v10268_v8 = vpop.f32.mrf.mxu0  ;;  %10567 = vmatmul.mubr.msk.f32.gmra.mxu0 %vm322_vm1, %v12772_v12  ;;  %v12792_v48 = vld [vmem:[%s11404_s25 + $0x18b] sm:$0xff] }
 0x16d   : > { %v10218_v60 = vpop.f32.mrf.mxu1  ;;  %10517 = vmatmul.mubr.msk.f32.gmra.mxu1 %vm322_vm1, %v12752_v1  ;;  %10569 = vmatprep.mubr.msk.f32.mxu0 %vm322_vm1, %v12775_v46  ;;  %15170 = vst [vmem:[#allocation14_spill] sm:$0xff] %v12792_v48 }
 0x16e   : > { %15169 = vst [vmem:[#allocation13_spill] sm:$0xff] %v12777_v7  ;;  %v12784_v16 = vadd.f32 %v1791_v61, %v1570_v29  ;;  %v1573_v63 = vadd.f32 %v10218_v60, %v12468_v41  ;;  %10519 = vmatprep.mubr.msk.f32.mxu1 %vm322_vm1, %v12755_v55  ;;  %v1801_v25 = vpop.f32.mrf.mxu0 }
 0x16f   : > { %v1525_v20 = vpop.f32.mrf.mxu1 }
 0x170   : > { %v12794_v22 = vadd.f32 %v10268_v8, %v1573_v63  ;;  %v1572_v7 = vadd.f32 %v1525_v20, %v12473_v17  ;;  %v10271_v33 = vpop.f32.mrf.mxu0  ;;  %10570 = vmatmul.mubr.msk.f32.gmra.mxu0 %vm322_vm1, %v12792_v48 }
 0x171   : > { %v10221_v1 = vpop.f32.mrf.mxu1  ;;  %10520 = vmatmul.mubr.msk.f32.gmra.mxu1 %vm322_vm1, %v12772_v12  ;;  %10624 = vmatprep.mubr.msk.f32.mxu0 %vm322_vm1, %v12512_v51 }
 0x172   : > { %v12801_v41 = vadd.f32 %v1801_v25, %v1572_v7  ;;  %v1575_v61 = vadd.f32 %v10221_v1, %v12480_v36  ;;  %10574 = vmatprep.mubr.msk.f32.mxu1 %vm322_vm1, %v12484_v44  ;;  %v1811_v17 = vpop.f32.mrf.mxu0  ;;  %v12818_v36 = vld [vmem:[%s15130_s1 + $0x5c] sm:$0xf]  ;;  %v12823_v44 = vld [vmem:[%s15130_s1 + $0x20] sm:$0xf] }
 0x173   : > { %v1535_v8 = vpop.f32.mrf.mxu1 }
 0x174   : > { %v12808_v29 = vadd.f32 %v10271_v33, %v1575_v61  ;;  %v1574_v60 = vadd.f32 %v1535_v8, %v12498_v10  ;;  %v10326_v20 = vpop.f32.mrf.mxu0  ;;  %10625 = vmatmul.mubr.msk.f32.vlgmr.msra.gmra.mxu0 %vm322_vm1, %v12532_v31 }
 0x175   : > { %v10276_v63 = vpop.f32.mrf.mxu1  ;;  %10575 = vmatmul.mubr.msk.f32.vlgmr.msra.gmra.mxu1 %vm322_vm1, %v12506_v38  ;;  %10723 = vmatpush3.msk.msra.mxu0 %vm419_vm0, %v12496_v3 }
 0x176   : > { %v12825_v7 = vadd.f32 %v1811_v17, %v1574_v60  ;;  %v2097_v10 = vadd.f32 %v10276_v63, %v12514_v14  ;;  %10673 = vmatpush3.msk.msra.mxu1 %vm419_vm0, %v12491_v45  ;;  %v2333_v33 = vpop.f32.mrf.mxu0  ;;  %10577 = vmatprep.mubr.msk.f32.mxu1 %vm322_vm1, %v12512_v51 }
 0x177   : > { %v1937_v38 = vpop.f32.mrf.mxu1  ;;  %10627 = vmatprep.mubr.msk.f32.mxu0 %vm322_vm1, %v12535_v57  ;;  %10772 = vmatprep.subr.msk.mxu1 %vm419_vm0, %v12818_v36 }
 0x178   : > { %v12836_v1 = vadd.f32 %v10326_v20, %v2097_v10  ;;  %v2096_v25 = vadd.f32 %v1937_v38, %v12524_v50  ;;  %10822 = vmatprep.subr.msk.mxu0 %vm419_vm0, %v12823_v44  ;;  %v10329_v3 = vpop.f32.mrf.mxu0  ;;  %10628 = vmatmul.mubr.msk.f32.gmra.mxu0 %vm322_vm1, %v12552_v52 }
 0x179   : > { %v10279_v45 = vpop.f32.mrf.mxu1  ;;  %10578 = vmatmul.mubr.msk.f32.gmra.mxu1 %vm322_vm1, %v12532_v31  ;;  %10630 = vmatprep.mubr.msk.f32.mxu0 %vm322_vm1, %v12555_v42 }
 0x17a   : > { %v12847_v51 = vadd.f32 %v2333_v33, %v2096_v25  ;;  %v2099_v14 = vadd.f32 %v10279_v45, %v12537_v40  ;;  %10580 = vmatprep.mubr.msk.f32.mxu1 %vm322_vm1, %v12535_v57  ;;  %v2343_v61 = vpop.f32.mrf.mxu0 }
 0x17b   : > { %v1947_v50 = vpop.f32.mrf.mxu1 }
 0x17c   : > { %v12854_v8 = vadd.f32 %v10329_v3, %v2099_v14  ;;  %v2098_v17 = vadd.f32 %v1947_v50, %v12544_v35  ;;  %v10332_v60 = vpop.f32.mrf.mxu0  ;;  %10631 = vmatmul.mubr.msk.f32.gmra.mxu0 %vm322_vm1, %v12572_v58 }
 0x17d   : > { %v10282_v31 = vpop.f32.mrf.mxu1  ;;  %10581 = vmatmul.mubr.msk.f32.gmra.mxu1 %vm322_vm1, %v12552_v52  ;;  %10633 = vmatprep.mubr.msk.f32.mxu0 %vm322_vm1, %v12575_v32 }
 0x17e   : > { %v12861_v40 = vadd.f32 %v2343_v61, %v2098_v17  ;;  %v2101_v63 = vadd.f32 %v10282_v31, %v12557_v18  ;;  %10583 = vmatprep.mubr.msk.f32.mxu1 %vm322_vm1, %v12555_v42  ;;  %v2353_v35 = vpop.f32.mrf.mxu0 }
 0x17f   : > { %v1957_v20 = vpop.f32.mrf.mxu1 }
 0x180   : > { %v12868_v10 = vadd.f32 %v10332_v60, %v2101_v63  ;;  %v2100_v38 = vadd.f32 %v1957_v20, %v12564_v43  ;;  %v10335_v25 = vpop.f32.mrf.mxu0  ;;  %10634 = vmatmul.mubr.msk.f32.gmra.mxu0 %vm322_vm1, %v12592_v0 }
 0x181   : > { %v10285_v33 = vpop.f32.mrf.mxu1  ;;  %10584 = vmatmul.mubr.msk.f32.gmra.mxu1 %vm322_vm1, %v12572_v58  ;;  %10636 = vmatprep.mubr.msk.f32.mxu0 %vm322_vm1, %v12595_v54 }
 0x182   : > { %v12875_v18 = vadd.f32 %v2353_v35, %v2100_v38  ;;  %v2103_v45 = vadd.f32 %v10285_v33, %v12577_v15  ;;  %10586 = vmatprep.mubr.msk.f32.mxu1 %vm322_vm1, %v12575_v32  ;;  %v2363_v43 = vpop.f32.mrf.mxu0 }
 0x183   : > { %v1967_v3 = vpop.f32.mrf.mxu1 }
 0x184   : > { %v12882_v14 = vadd.f32 %v10335_v25, %v2103_v45  ;;  %v2102_v50 = vadd.f32 %v1967_v3, %v12584_v23  ;;  %v10338_v17 = vpop.f32.mrf.mxu0  ;;  %10637 = vmatmul.mubr.msk.f32.gmra.mxu0 %vm322_vm1, %v12612_v6 }
 0x185   : > { %v10288_v61 = vpop.f32.mrf.mxu1  ;;  %10587 = vmatmul.mubr.msk.f32.gmra.mxu1 %vm322_vm1, %v12592_v0  ;;  %10639 = vmatprep.mubr.msk.f32.mxu0 %vm322_vm1, %v12615_v5 }
 0x186   : > { %v12889_v15 = vadd.f32 %v2363_v43, %v2102_v50  ;;  %v2105_v31 = vadd.f32 %v10288_v61, %v12597_v34  ;;  %10589 = vmatprep.mubr.msk.f32.mxu1 %vm322_vm1, %v12595_v54  ;;  %v2373_v23 = vpop.f32.mrf.mxu0 }
 0x187   : > { %v1977_v60 = vpop.f32.mrf.mxu1 }
 0x188   : > { %v12896_v63 = vadd.f32 %v10338_v17, %v2105_v31  ;;  %v2104_v20 = vadd.f32 %v1977_v60, %v12604_v26  ;;  %v10341_v38 = vpop.f32.mrf.mxu0  ;;  %10640 = vmatmul.mubr.msk.f32.gmra.mxu0 %vm322_vm1, %v12632_v13 }
 0x189   : > { %v10291_v35 = vpop.f32.mrf.mxu1  ;;  %10590 = vmatmul.mubr.msk.f32.gmra.mxu1 %vm322_vm1, %v12612_v6  ;;  %10642 = vmatprep.mubr.msk.f32.mxu0 %vm322_vm1, %v12635_v49 }
 0x18a   : > { %v12903_v34 = vadd.f32 %v2373_v23, %v2104_v20  ;;  %v2107_v33 = vadd.f32 %v10291_v35, %v12617_v4  ;;  %10592 = vmatprep.mubr.msk.f32.mxu1 %vm322_vm1, %v12615_v5  ;;  %v2383_v26 = vpop.f32.mrf.mxu0 }
 0x18b   : > { %v1987_v25 = vpop.f32.mrf.mxu1 }
 0x18c   : > { %v12910_v45 = vadd.f32 %v10341_v38, %v2107_v33  ;;  %v2106_v3 = vadd.f32 %v1987_v25, %v12624_v37  ;;  %v10344_v50 = vpop.f32.mrf.mxu0  ;;  %10643 = vmatmul.mubr.msk.f32.gmra.mxu0 %vm322_vm1, %v12652_v21 }
 0x18d   : > { %v10294_v43 = vpop.f32.mrf.mxu1  ;;  %10593 = vmatmul.mubr.msk.f32.gmra.mxu1 %vm322_vm1, %v12632_v13  ;;  %10645 = vmatprep.mubr.msk.f32.mxu0 %vm322_vm1, %v12655_v62 }
 0x18e   : > { %v12917_v4 = vadd.f32 %v2383_v26, %v2106_v3  ;;  %v2109_v61 = vadd.f32 %v10294_v43, %v12637_v27  ;;  %10595 = vmatprep.mubr.msk.f32.mxu1 %vm322_vm1, %v12635_v49  ;;  %v2393_v37 = vpop.f32.mrf.mxu0 }
 0x18f   : > { %v1997_v17 = vpop.f32.mrf.mxu1 }
 0x190   : > { %v12924_v31 = vadd.f32 %v10344_v50, %v2109_v61  ;;  %v2108_v60 = vadd.f32 %v1997_v17, %v12644_v56  ;;  %v10347_v20 = vpop.f32.mrf.mxu0  ;;  %10646 = vmatmul.mubr.msk.f32.gmra.mxu0 %vm322_vm1, %v12672_v11 }
 0x191   : > { %v10297_v23 = vpop.f32.mrf.mxu1  ;;  %10596 = vmatmul.mubr.msk.f32.gmra.mxu1 %vm322_vm1, %v12652_v21  ;;  %10648 = vmatprep.mubr.msk.f32.mxu0 %vm322_vm1, %v12675_v39 }
 0x192   : > { %v12931_v27 = vadd.f32 %v2393_v37, %v2108_v60  ;;  %v2111_v35 = vadd.f32 %v10297_v23, %v12657_v2  ;;  %10598 = vmatprep.mubr.msk.f32.mxu1 %vm322_vm1, %v12655_v62  ;;  %v2403_v56 = vpop.f32.mrf.mxu0  ;;  %v15172_v23 = vld [vmem:[#allocation6_spill] sm:$0xff] }
 0x193   : > { %v2007_v38 = vpop.f32.mrf.mxu1 }
 0x194   : > { %v12938_v33 = vadd.f32 %v10347_v20, %v2111_v35  ;;  %v2110_v25 = vadd.f32 %v2007_v38, %v12664_v28  ;;  %v10350_v3 = vpop.f32.mrf.mxu0  ;;  %10649 = vmatmul.mubr.msk.f32.gmra.mxu0 %vm322_vm1, %v12692_v47 }
 0x195   : > { %v10300_v26 = vpop.f32.mrf.mxu1  ;;  %10599 = vmatmul.mubr.msk.f32.gmra.mxu1 %vm322_vm1, %v12672_v11  ;;  %10651 = vmatprep.mubr.msk.f32.mxu0 %vm322_vm1, %v12695_v19 }
 0x196   : > { %v12945_v2 = vadd.f32 %v2403_v56, %v2110_v25  ;;  %v2113_v43 = vadd.f32 %v10300_v26, %v12677_v9  ;;  %10601 = vmatprep.mubr.msk.f32.mxu1 %vm322_vm1, %v12675_v39  ;;  %v2413_v28 = vpop.f32.mrf.mxu0  ;;  %v15174_v56 = vld [vmem:[#allocation3_spill] sm:$0xff] }
 0x197   : > { %v2017_v50 = vpop.f32.mrf.mxu1 }
 0x198   : > { %v12952_v61 = vadd.f32 %v10350_v3, %v2113_v43  ;;  %v2112_v17 = vadd.f32 %v2017_v50, %v12684_v30  ;;  %v10353_v60 = vpop.f32.mrf.mxu0  ;;  %10652 = vmatmul.mubr.msk.f32.gmra.mxu0 %vm322_vm1, %v12712_v53  ;;  %v15176_v50 = vld [vmem:[#allocation4_spill] sm:$0xff] }
 0x199   : > { %v10303_v37 = vpop.f32.mrf.mxu1  ;;  %10602 = vmatmul.mubr.msk.f32.gmra.mxu1 %vm322_vm1, %v12692_v47  ;;  %10654 = vmatprep.mubr.msk.f32.mxu0 %vm322_vm1, %v12715_v24 }
 0x19a   : > { %v12959_v9 = vadd.f32 %v2413_v28, %v2112_v17  ;;  %v2115_v20 = vadd.f32 %v10303_v37, %v15172_v23  ;;  %10604 = vmatprep.mubr.msk.f32.mxu1 %vm322_vm1, %v12695_v19  ;;  %v2423_v30 = vpop.f32.mrf.mxu0  ;;  %v15177_v17 = vld [vmem:[#allocation7_spill] sm:$0xff] }
 0x19b   : > { %v2027_v35 = vpop.f32.mrf.mxu1 }
 0x19c   : > { %15171 = vst [vmem:[#allocation15_spill] sm:$0xff] %v12959_v9  ;;  %v12966_v38 = vadd.f32 %v10353_v60, %v2115_v20  ;;  %v2114_v25 = vadd.f32 %v2027_v35, %v15174_v56  ;;  %v10356_v3 = vpop.f32.mrf.mxu0  ;;  %10655 = vmatmul.mubr.msk.f32.gmra.mxu0 %vm322_vm1, %v12732_v59  ;;  %v15179_v20 = vld [vmem:[#allocation5_spill] sm:$0xff] }
 0x19d   : > { %v10306_v26 = vpop.f32.mrf.mxu1  ;;  %10605 = vmatmul.mubr.msk.f32.gmra.mxu1 %vm322_vm1, %v12712_v53  ;;  %10657 = vmatprep.mubr.msk.f32.mxu0 %vm322_vm1, %v15177_v17 }
 0x19e   : > { %15173 = vst [vmem:[#allocation6_spill] sm:$0xff] %v12966_v38  ;;  %v12973_v43 = vadd.f32 %v2423_v30, %v2114_v25  ;;  %v2117_v28 = vadd.f32 %v10306_v26, %v15176_v50  ;;  %10607 = vmatprep.mubr.msk.f32.mxu1 %vm322_vm1, %v12715_v24  ;;  %v2433_v60 = vpop.f32.mrf.mxu0  ;;  %v15180_v30 = vld [vmem:[#allocation10_spill] sm:$0xff]  ;;  %v15182_v26 = vld [vmem:[#allocation8_spill] sm:$0xff] }
 0x19f   : > { %v2037_v37 = vpop.f32.mrf.mxu1 }
 0x1a0   : > { %15175 = vst [vmem:[#allocation3_spill] sm:$0xff] %v12973_v43  ;;  %v12980_v23 = vadd.f32 %v10356_v3, %v2117_v28  ;;  %v2116_v35 = vadd.f32 %v2037_v37, %v15179_v20  ;;  %v10359_v38 = vpop.f32.mrf.mxu0  ;;  %10658 = vmatmul.mubr.msk.f32.gmra.mxu0 %vm322_vm1, %v15180_v30  ;;  %v15184_v20 = vld [vmem:[#allocation9_spill] sm:$0xff] }
 0x1a1   : > { %v10309_v56 = vpop.f32.mrf.mxu1  ;;  %10608 = vmatmul.mubr.msk.f32.gmra.mxu1 %vm322_vm1, %v12732_v59  ;;  %10660 = vmatprep.mubr.msk.f32.mxu0 %vm322_vm1, %v12755_v55 }
 0x1a2   : > { %15178 = vst [vmem:[#allocation4_spill] sm:$0xff] %v12980_v23  ;;  %v12987_v25 = vadd.f32 %v2433_v60, %v2116_v35  ;;  %v2119_v50 = vadd.f32 %v10309_v56, %v15182_v26  ;;  %10610 = vmatprep.mubr.msk.f32.mxu1 %vm322_vm1, %v15177_v17  ;;  %v2443_v28 = vpop.f32.mrf.mxu0  ;;  %v15186_v35 = vld [vmem:[#allocation11_spill] sm:$0xff] }
 0x1a3   : > { %v2047_v3 = vpop.f32.mrf.mxu1 }
 0x1a4   : > { %15181 = vst [vmem:[#allocation7_spill] sm:$0xff] %v12987_v25  ;;  %v12994_v37 = vadd.f32 %v10359_v38, %v2119_v50  ;;  %v2118_v23 = vadd.f32 %v2047_v3, %v15184_v20  ;;  %v10362_v9 = vpop.f32.mrf.mxu0  ;;  %10661 = vmatmul.mubr.msk.f32.gmra.mxu0 %vm322_vm1, %v12772_v12  ;;  %v13009_v50 = vld [vmem:[%s11404_s25 + $0x19b] sm:$0xff]  ;;  %v15188_v20 = vld [vmem:[#allocation12_spill] sm:$0xff] }
 0x1a5   : > { %v10312_v43 = vpop.f32.mrf.mxu1  ;;  %10611 = vmatmul.mubr.msk.f32.gmra.mxu1 %vm322_vm1, %v15180_v30  ;;  %10663 = vmatprep.mubr.msk.f32.mxu0 %vm322_vm1, %v12775_v46 }
 0x1a6   : > { %15183 = vst [vmem:[#allocation5_spill] sm:$0xff] %v12994_v37  ;;  %v13001_v60 = vadd.f32 %v2443_v28, %v2118_v23  ;;  %v2121_v56 = vadd.f32 %v10312_v43, %v15186_v35  ;;  %10613 = vmatprep.mubr.msk.f32.mxu1 %vm322_vm1, %v12755_v55  ;;  %v2453_v26 = vpop.f32.mrf.mxu0  ;;  %v15190_v35 = vld [vmem:[#allocation13_spill] sm:$0xff] }
 0x1a7   : > { %v2057_v38 = vpop.f32.mrf.mxu1 }
 0x1a8   : > { %15185 = vst [vmem:[#allocation10_spill] sm:$0xff] %v13001_v60  ;;  %v13011_v3 = vadd.f32 %v10362_v9, %v2121_v56  ;;  %v2120_v37 = vadd.f32 %v2057_v38, %v15188_v20  ;;  %v10365_v28 = vpop.f32.mrf.mxu0  ;;  %10664 = vmatmul.mubr.msk.f32.gmra.mxu0 %vm322_vm1, %v12792_v48  ;;  %v13026_v9 = vld [vmem:[%s11404_s25 + $0x1a3] sm:$0xff]  ;;  %v13029_v20 = vld [vmem:[%s11404_s25 + $0x1b3] sm:$0xff] }
 0x1a9   : > { %v10315_v23 = vpop.f32.mrf.mxu1  ;;  %10614 = vmatmul.mubr.msk.f32.gmra.mxu1 %vm322_vm1, %v12772_v12  ;;  %10666 = vmatprep.mubr.msk.f32.mxu0 %vm322_vm1, %v13009_v50 }
 0x1aa   : > { %15187 = vst [vmem:[#allocation8_spill] sm:$0xff] %v13011_v3  ;;  %v13018_v43 = vadd.f32 %v2453_v26, %v2120_v37  ;;  %v2123_v60 = vadd.f32 %v10315_v23, %v15190_v35  ;;  %10616 = vmatprep.mubr.msk.f32.mxu1 %vm322_vm1, %v12775_v46  ;;  %v2463_v38 = vpop.f32.mrf.mxu0 }
 0x1ab   : > { %v2067_v56 = vpop.f32.mrf.mxu1 }
 0x1ac   : > { %15189 = vst [vmem:[#allocation9_spill] sm:$0xff] %v13018_v43  ;;  %v13031_v3 = vadd.f32 %v10365_v28, %v2123_v60  ;;  %v2122_v37 = vadd.f32 %v2067_v56, %v12784_v16  ;;  %v10368_v43 = vpop.f32.mrf.mxu0  ;;  %10667 = vmatmul.mubr.msk.f32.gmra.mxu0 %vm322_vm1, %v13026_v9  ;;  %v13046_v60 = vld [vmem:[%s11404_s25 + $0x1bb] sm:$0xff] }
 0x1ad   : > { %v10318_v26 = vpop.f32.mrf.mxu1  ;;  %10617 = vmatmul.mubr.msk.f32.gmra.mxu1 %vm322_vm1, %v12792_v48  ;;  %10669 = vmatprep.mubr.msk.f32.mxu0 %vm322_vm1, %v13029_v20 }
 0x1ae   : > { %15191 = vst [vmem:[#allocation11_spill] sm:$0xff] %v13031_v3  ;;  %v13038_v23 = vadd.f32 %v2463_v38, %v2122_v37  ;;  %v2125_v35 = vadd.f32 %v10318_v26, %v12794_v22  ;;  %10619 = vmatprep.mubr.msk.f32.mxu1 %vm322_vm1, %v13009_v50  ;;  %v2473_v28 = vpop.f32.mrf.mxu0 }
 0x1af   : > { %v2077_v16 = vpop.f32.mrf.mxu1 }
 0x1b0   : > { %v13048_v56 = vadd.f32 %v10368_v43, %v2125_v35  ;;  %v2124_v3 = vadd.f32 %v2077_v16, %v12801_v41  ;;  %v10371_v25 = vpop.f32.mrf.mxu0  ;;  %10670 = vmatmul.mubr.msk.f32.gmra.mxu0 %vm322_vm1, %v13046_v60 }
 0x1b1   : > { %v10321_v48 = vpop.f32.mrf.mxu1  ;;  %10620 = vmatmul.mubr.msk.f32.gmra.mxu1 %vm322_vm1, %v13026_v9  ;;  %10724 = vmatprep.mubr.msk.f32.mxu0 %vm322_vm1, %v12555_v42 }
 0x1b2   : > { %v13055_v22 = vadd.f32 %v2473_v28, %v2124_v3  ;;  %v2127_v38 = vadd.f32 %v10321_v48, %v12808_v29  ;;  %10674 = vmatprep.mubr.msk.f32.mxu1 %vm322_vm1, %v12535_v57  ;;  %v2483_v41 = vpop.f32.mrf.mxu0  ;;  %v13072_v57 = vld [vmem:[%s15130_s1 + $0x34] sm:$0xf]  ;;  %v13077_v48 = vld [vmem:[%s15130_s1 + $0x48] sm:$0xf] }
 0x1b3   : > { %v2087_v43 = vpop.f32.mrf.mxu1 }
 0x1b4   : > { %v13062_v37 = vadd.f32 %v10371_v25, %v2127_v38  ;;  %v2126_v26 = vadd.f32 %v2087_v43, %v12825_v7  ;;  %v10426_v16 = vpop.f32.mrf.mxu0  ;;  %10725 = vmatmul.mubr.msk.f32.vlgmr.msra.gmra.mxu0 %vm322_vm1, %v12572_v58 }
 0x1b5   : > { %v10376_v35 = vpop.f32.mrf.mxu1  ;;  %10675 = vmatmul.mubr.msk.f32.vlgmr.msra.gmra.mxu1 %vm322_vm1, %v12552_v52  ;;  %10823 = vmatpush3.msk.msra.mxu0 %vm419_vm0, %v12823_v44 }
 0x1b6   : > { %v13079_v29 = vadd.f32 %v2483_v41, %v2126_v26  ;;  %v2763_v7 = vadd.f32 %v10376_v35, %v12836_v1  ;;  %10773 = vmatpush3.msk.msra.mxu1 %vm419_vm0, %v12818_v36  ;;  %v2873_v25 = vpop.f32.mrf.mxu0  ;;  %10677 = vmatprep.mubr.msk.f32.mxu1 %vm322_vm1, %v12555_v42 }
 0x1b7   : > { %v2603_v52 = vpop.f32.mrf.mxu1  ;;  %10727 = vmatprep.mubr.msk.f32.mxu0 %vm322_vm1, %v12575_v32  ;;  %10872 = vmatprep.subr.msk.mxu1 %vm419_vm0, %v13072_v57 }
 0x1b8   : > { %v13090_v3 = vadd.f32 %v10426_v16, %v2763_v7  ;;  %v2762_v28 = vadd.f32 %v2603_v52, %v12847_v51  ;;  %10922 = vmatprep.subr.msk.mxu0 %vm419_vm0, %v13077_v48  ;;  %v10429_v44 = vpop.f32.mrf.mxu0  ;;  %10728 = vmatmul.mubr.msk.f32.gmra.mxu0 %vm322_vm1, %v12592_v0 }
 0x1b9   : > { %v10379_v36 = vpop.f32.mrf.mxu1  ;;  %10678 = vmatmul.mubr.msk.f32.gmra.mxu1 %vm322_vm1, %v12572_v58  ;;  %10730 = vmatprep.mubr.msk.f32.mxu0 %vm322_vm1, %v12595_v54 }
 0x1ba   : > { %v13101_v42 = vadd.f32 %v2873_v25, %v2762_v28  ;;  %v2765_v1 = vadd.f32 %v10379_v36, %v12854_v8  ;;  %10680 = vmatprep.mubr.msk.f32.mxu1 %vm322_vm1, %v12575_v32  ;;  %v2883_v38 = vpop.f32.mrf.mxu0 }
 0x1bb   : > { %v2613_v51 = vpop.f32.mrf.mxu1 }
 0x1bc   : > { %v13108_v43 = vadd.f32 %v10429_v44, %v2765_v1  ;;  %v2764_v41 = vadd.f32 %v2613_v51, %v12861_v40  ;;  %v10432_v26 = vpop.f32.mrf.mxu0  ;;  %10731 = vmatmul.mubr.msk.f32.gmra.mxu0 %vm322_vm1, %v12612_v6 }
 0x1bd   : > { %v10382_v58 = vpop.f32.mrf.mxu1  ;;  %10681 = vmatmul.mubr.msk.f32.gmra.mxu1 %vm322_vm1, %v12592_v0  ;;  %10733 = vmatprep.mubr.msk.f32.mxu0 %vm322_vm1, %v12615_v5 }
 0x1be   : > { %v13115_v8 = vadd.f32 %v2883_v38, %v2764_v41  ;;  %v2767_v32 = vadd.f32 %v10382_v58, %v12868_v10  ;;  %10683 = vmatprep.mubr.msk.f32.mxu1 %vm322_vm1, %v12595_v54  ;;  %v2893_v40 = vpop.f32.mrf.mxu0 }
 0x1bf   : > { %v2623_v35 = vpop.f32.mrf.mxu1 }
 0x1c0   : > { %v13122_v16 = vadd.f32 %v10432_v26, %v2767_v32  ;;  %v2766_v7 = vadd.f32 %v2623_v35, %v12875_v18  ;;  %v10435_v52 = vpop.f32.mrf.mxu0  ;;  %10734 = vmatmul.mubr.msk.f32.gmra.mxu0 %vm322_vm1, %v12632_v13 }
 0x1c1   : > { %v10385_v0 = vpop.f32.mrf.mxu1  ;;  %10684 = vmatmul.mubr.msk.f32.gmra.mxu1 %vm322_vm1, %v12612_v6  ;;  %10736 = vmatprep.mubr.msk.f32.mxu0 %vm322_vm1, %v12635_v49 }
 0x1c2   : > { %v13129_v10 = vadd.f32 %v2893_v40, %v2766_v7  ;;  %v2769_v54 = vadd.f32 %v10385_v0, %v12882_v14  ;;  %10686 = vmatprep.mubr.msk.f32.mxu1 %vm322_vm1, %v12615_v5  ;;  %v2903_v18 = vpop.f32.mrf.mxu0 }
 0x1c3   : > { %v2633_v25 = vpop.f32.mrf.mxu1 }
 0x1c4   : > { %v13136_v28 = vadd.f32 %v10435_v52, %v2769_v54  ;;  %v2768_v36 = vadd.f32 %v2633_v25, %v12889_v15  ;;  %v10438_v44 = vpop.f32.mrf.mxu0  ;;  %10737 = vmatmul.mubr.msk.f32.gmra.mxu0 %vm322_vm1, %v12652_v21 }
 0x1c5   : > { %v10388_v6 = vpop.f32.mrf.mxu1  ;;  %10687 = vmatmul.mubr.msk.f32.gmra.mxu1 %vm322_vm1, %v12632_v13  ;;  %10739 = vmatprep.mubr.msk.f32.mxu0 %vm322_vm1, %v12655_v62 }
 0x1c6   : > { %v13143_v14 = vadd.f32 %v2903_v18, %v2768_v36  ;;  %v2771_v5 = vadd.f32 %v10388_v6, %v12896_v63  ;;  %10689 = vmatprep.mubr.msk.f32.mxu1 %vm322_vm1, %v12635_v49  ;;  %v2913_v15 = vpop.f32.mrf.mxu0 }
 0x1c7   : > { %v2643_v1 = vpop.f32.mrf.mxu1 }
 0x1c8   : > { %v13150_v51 = vadd.f32 %v10438_v44, %v2771_v5  ;;  %v2770_v38 = vadd.f32 %v2643_v1, %v12903_v34  ;;  %v10441_v41 = vpop.f32.mrf.mxu0  ;;  %10740 = vmatmul.mubr.msk.f32.gmra.mxu0 %vm322_vm1, %v12672_v11  ;;  %v15192_v5 = vld [vmem:[#allocation15_spill] sm:$0xff] }
 0x1c9   : > { %v10391_v13 = vpop.f32.mrf.mxu1  ;;  %10690 = vmatmul.mubr.msk.f32.gmra.mxu1 %vm322_vm1, %v12652_v21  ;;  %10742 = vmatprep.mubr.msk.f32.mxu0 %vm322_vm1, %v12675_v39 }
 0x1ca   : > { %v13157_v63 = vadd.f32 %v2913_v15, %v2770_v38  ;;  %v2773_v49 = vadd.f32 %v10391_v13, %v12910_v45  ;;  %10692 = vmatprep.mubr.msk.f32.mxu1 %vm322_vm1, %v12655_v62  ;;  %v2923_v34 = vpop.f32.mrf.mxu0 }
 0x1cb   : > { %v2653_v58 = vpop.f32.mrf.mxu1 }
 0x1cc   : > { %v13164_v26 = vadd.f32 %v10441_v41, %v2773_v49  ;;  %v2772_v32 = vadd.f32 %v2653_v58, %v12917_v4  ;;  %v10444_v35 = vpop.f32.mrf.mxu0  ;;  %10743 = vmatmul.mubr.msk.f32.gmra.mxu0 %vm322_vm1, %v12692_v47  ;;  %v15194_v58 = vld [vmem:[#allocation3_spill] sm:$0xff] }
 0x1cd   : > { %v10394_v21 = vpop.f32.mrf.mxu1  ;;  %10693 = vmatmul.mubr.msk.f32.gmra.mxu1 %vm322_vm1, %v12672_v11  ;;  %10745 = vmatprep.mubr.msk.f32.mxu0 %vm322_vm1, %v12695_v19 }
 0x1ce   : > { %v13171_v45 = vadd.f32 %v2923_v34, %v2772_v32  ;;  %v2775_v62 = vadd.f32 %v10394_v21, %v12924_v31  ;;  %10695 = vmatprep.mubr.msk.f32.mxu1 %vm322_vm1, %v12675_v39  ;;  %v2933_v4 = vpop.f32.mrf.mxu0 }
 0x1cf   : > { %v2663_v40 = vpop.f32.mrf.mxu1 }
 0x1d0   : > { %v13178_v7 = vadd.f32 %v10444_v35, %v2775_v62  ;;  %v2774_v0 = vadd.f32 %v2663_v40, %v12931_v27  ;;  %v10447_v52 = vpop.f32.mrf.mxu0  ;;  %10746 = vmatmul.mubr.msk.f32.gmra.mxu0 %vm322_vm1, %v12712_v53 }
 0x1d1   : > { %v10397_v11 = vpop.f32.mrf.mxu1  ;;  %10696 = vmatmul.mubr.msk.f32.gmra.mxu1 %vm322_vm1, %v12692_v47  ;;  %10748 = vmatprep.mubr.msk.f32.mxu0 %vm322_vm1, %v12715_v24 }
 0x1d2   : > { %v13185_v31 = vadd.f32 %v2933_v4, %v2774_v0  ;;  %v2777_v39 = vadd.f32 %v10397_v11, %v12938_v33  ;;  %10698 = vmatprep.mubr.msk.f32.mxu1 %vm322_vm1, %v12695_v19  ;;  %v2943_v27 = vpop.f32.mrf.mxu0  ;;  %v15196_v0 = vld [vmem:[#allocation7_spill] sm:$0xff] }
 0x1d3   : > { %v2673_v54 = vpop.f32.mrf.mxu1 }
 0x1d4   : > { %v13192_v25 = vadd.f32 %v10447_v52, %v2777_v39  ;;  %v2776_v18 = vadd.f32 %v2673_v54, %v12945_v2  ;;  %v10450_v36 = vpop.f32.mrf.mxu0  ;;  %10749 = vmatmul.mubr.msk.f32.gmra.mxu0 %vm322_vm1, %v12732_v59  ;;  %v15197_v39 = vld [vmem:[#allocation14_spill] sm:$0xff] }
 0x1d5   : > { %v10400_v47 = vpop.f32.mrf.mxu1  ;;  %10699 = vmatmul.mubr.msk.f32.gmra.mxu1 %vm322_vm1, %v12712_v53  ;;  %10751 = vmatprep.mubr.msk.f32.mxu0 %vm322_vm1, %v15177_v17 }
 0x1d6   : > { %v13199_v33 = vadd.f32 %v2943_v27, %v2776_v18  ;;  %v2779_v19 = vadd.f32 %v10400_v47, %v12952_v61  ;;  %10701 = vmatprep.mubr.msk.f32.mxu1 %vm322_vm1, %v12715_v24  ;;  %v2953_v2 = vpop.f32.mrf.mxu0  ;;  %v15193_v24 = vld [vmem:[#allocation6_spill] sm:$0xff] }
 0x1d7   : > { %v2683_v6 = vpop.f32.mrf.mxu1 }
 0x1d8   : > { %v13206_v44 = vadd.f32 %v10450_v36, %v2779_v19  ;;  %v2778_v1 = vadd.f32 %v2683_v6, %v15192_v5  ;;  %v10453_v15 = vpop.f32.mrf.mxu0  ;;  %10752 = vmatmul.mubr.msk.f32.gmra.mxu0 %vm322_vm1, %v15180_v30  ;;  %v15199_v19 = vld [vmem:[#allocation10_spill] sm:$0xff] }
 0x1d9   : > { %v10403_v53 = vpop.f32.mrf.mxu1  ;;  %10702 = vmatmul.mubr.msk.f32.gmra.mxu1 %vm322_vm1, %v12732_v59  ;;  %10754 = vmatprep.mubr.msk.f32.mxu0 %vm322_vm1, %v12755_v55 }
 0x1da   : > { %v13213_v61 = vadd.f32 %v2953_v2, %v2778_v1  ;;  %v2781_v38 = vadd.f32 %v10403_v53, %v15193_v24  ;;  %10704 = vmatprep.mubr.msk.f32.mxu1 %vm322_vm1, %v15177_v17  ;;  %v2963_v41 = vpop.f32.mrf.mxu0  ;;  %v15195_v17 = vld [vmem:[#allocation4_spill] sm:$0xff] }
 0x1db   : > { %v2693_v13 = vpop.f32.mrf.mxu1  ;;  %v13263_v24 = vld [vmem:[%s11404_s25 + $0x1cb] sm:$0xff] }
 0x1dc   : > { %v13220_v49 = vadd.f32 %v10453_v15, %v2781_v38  ;;  %v2780_v34 = vadd.f32 %v2693_v13, %v15194_v58  ;;  %v10456_v32 = vpop.f32.mrf.mxu0  ;;  %10755 = vmatmul.mubr.msk.f32.gmra.mxu0 %vm322_vm1, %v12772_v12  ;;  %v15201_v13 = vld [vmem:[#allocation9_spill] sm:$0xff] }
 0x1dd   : > { %v10406_v59 = vpop.f32.mrf.mxu1  ;;  %10705 = vmatmul.mubr.msk.f32.gmra.mxu1 %vm322_vm1, %v15180_v30  ;;  %10757 = vmatprep.mubr.msk.f32.mxu0 %vm322_vm1, %v12775_v46 }
 0x1de   : > { %v13227_v21 = vadd.f32 %v2963_v41, %v2780_v34  ;;  %v2783_v35 = vadd.f32 %v10406_v59, %v15195_v17  ;;  %10707 = vmatprep.mubr.msk.f32.mxu1 %vm322_vm1, %v12755_v55  ;;  %v2973_v40 = vpop.f32.mrf.mxu0  ;;  %v15198_v55 = vld [vmem:[#allocation5_spill] sm:$0xff] }
 0x1df   : > { %v2703_v62 = vpop.f32.mrf.mxu1 }
 0x1e0   : > { %v13234_v4 = vadd.f32 %v10456_v32, %v2783_v35  ;;  %v2782_v11 = vadd.f32 %v2703_v62, %v15196_v0  ;;  %v10459_v52 = vpop.f32.mrf.mxu0  ;;  %10758 = vmatmul.mubr.msk.f32.gmra.mxu0 %vm322_vm1, %v15197_v39  ;;  %v15202_v32 = vld [vmem:[#allocation11_spill] sm:$0xff]  ;;  %v13280_v35 = vld [vmem:[%s11404_s25 + $0x1d3] sm:$0xff] }
 0x1e1   : > { %v10409_v30 = vpop.f32.mrf.mxu1  ;;  %10708 = vmatmul.mubr.msk.f32.gmra.mxu1 %vm322_vm1, %v12772_v12  ;;  %10760 = vmatprep.mubr.msk.f32.mxu0 %vm322_vm1, %v13009_v50  ;;  %v13283_v0 = vld [vmem:[%s11404_s25 + $0x1e3] sm:$0xff] }
 0x1e2   : > { %v13241_v54 = vadd.f32 %v2973_v40, %v2782_v11  ;;  %v2785_v27 = vadd.f32 %v10409_v30, %v15198_v55  ;;  %10710 = vmatprep.mubr.msk.f32.mxu1 %vm322_vm1, %v12775_v46  ;;  %v2983_v47 = vpop.f32.mrf.mxu0  ;;  %v15200_v46 = vld [vmem:[#allocation8_spill] sm:$0xff] }
 0x1e3   : > { %v2713_v18 = vpop.f32.mrf.mxu1 }
 0x1e4   : > { %v13248_v36 = vadd.f32 %v10459_v52, %v2785_v27  ;;  %v2784_v12 = vadd.f32 %v2713_v18, %v15199_v19  ;;  %v10462_v2 = vpop.f32.mrf.mxu0  ;;  %10761 = vmatmul.mubr.msk.f32.gmra.mxu0 %vm322_vm1, %v13026_v9  ;;  %v5088_v19 = vld [vmem:[%s11404_s25 + $0x34] sm:$0xff] }
 0x1e5   : > { %v10412_v6 = vpop.f32.mrf.mxu1  ;;  %10711 = vmatmul.mubr.msk.f32.gmra.mxu1 %vm322_vm1, %v15197_v39  ;;  %10763 = vmatprep.mubr.msk.f32.mxu0 %vm322_vm1, %v13029_v20 }
 0x1e6   : > { %v13255_v5 = vadd.f32 %v2983_v47, %v2784_v12  ;;  %v2787_v1 = vadd.f32 %v10412_v6, %v15200_v46  ;;  %10713 = vmatprep.mubr.msk.f32.mxu1 %vm322_vm1, %v13009_v50  ;;  %v2993_v15 = vpop.f32.mrf.mxu0 }
 0x1e7   : > { %v2723_v53 = vpop.f32.mrf.mxu1 }
 0x1e8   : > { %v13265_v38 = vadd.f32 %v10462_v2, %v2787_v1  ;;  %v2786_v41 = vadd.f32 %v2723_v53, %v15201_v13  ;;  %v10465_v34 = vpop.f32.mrf.mxu0  ;;  %10764 = vmatmul.mubr.msk.f32.gmra.mxu0 %vm322_vm1, %v13046_v60  ;;  %v11299_v53 = vld [vmem:[%s11404_s25 + $0x93] sm:$0xff] }
 0x1e9   : > { %v10415_v58 = vpop.f32.mrf.mxu1  ;;  %10714 = vmatmul.mubr.msk.f32.gmra.mxu1 %vm322_vm1, %v13026_v9  ;;  %10766 = vmatprep.mubr.msk.f32.mxu0 %vm322_vm1, %v13263_v24 }
 0x1ea   : > { %v13272_v59 = vadd.f32 %v2993_v15, %v2786_v41  ;;  %v2789_v17 = vadd.f32 %v10415_v58, %v15202_v32  ;;  %10716 = vmatprep.mubr.msk.f32.mxu1 %vm322_vm1, %v13029_v20  ;;  %v3003_v40 = vpop.f32.mrf.mxu0  ;;  %v5089_v15 = vld [vmem:[%s11404_s25 + $0x3c] sm:$0xff] }
 0x1eb   : > { %v2733_v62 = vpop.f32.mrf.mxu1 }
 0x1ec   : > { %v13285_v11 = vadd.f32 %v10465_v34, %v2789_v17  ;;  %v2788_v30 = vadd.f32 %v2733_v62, %v13038_v23  ;;  %v10468_v39 = vpop.f32.mrf.mxu0  ;;  %10767 = vmatmul.mubr.msk.f32.gmra.mxu0 %vm322_vm1, %v13280_v35  ;;  %v13300_v23 = vld [vmem:[%s11404_s25 + $0x1eb] sm:$0xff]  ;;  %v13329_v62 = vld [vmem:[%s15130_s1 + $0x14] sm:$0xf] }
 0x1ed   : > { %v10418_v52 = vpop.f32.mrf.mxu1  ;;  %10717 = vmatmul.mubr.msk.f32.gmra.mxu1 %vm322_vm1, %v13046_v60  ;;  %10769 = vmatprep.mubr.msk.f32.mxu0 %vm322_vm1, %v13283_v0  ;;  %v13321_v34 = vld [vmem:[%s11404_s25 + $0x4c] sm:$0xff] }
 0x1ee   : > { %v13292_v55 = vadd.f32 %v3003_v40, %v2788_v30  ;;  %v2791_v27 = vadd.f32 %v10418_v52, %v13048_v56  ;;  %10719 = vmatprep.mubr.msk.f32.mxu1 %vm322_vm1, %v13263_v24  ;;  %v3013_v47 = vpop.f32.mrf.mxu0  ;;  %v13344_v52 = vld [vmem:[%s11404_s25 + $0x54] sm:$0xff] }
 0x1ef   : > { %v2743_v18 = vpop.f32.mrf.mxu1 }
 0x1f0   : > { %v13303_v12 = vadd.f32 %v10468_v39, %v2791_v27  ;;  %v2790_v6 = vadd.f32 %v2743_v18, %v13055_v22  ;;  %v10471_v46 = vpop.f32.mrf.mxu0  ;;  %10770 = vmatmul.mubr.msk.f32.gmra.mxu0 %vm322_vm1, %v13300_v23  ;;  %v11301_v18 = vld [vmem:[%s11404_s25 + $0xab] sm:$0xff] }
 0x1f1   : > { %v10421_v2 = vpop.f32.mrf.mxu1  ;;  %10720 = vmatmul.mubr.msk.f32.gmra.mxu1 %vm322_vm1, %v13280_v35  ;;  %10824 = vmatprep.mubr.msk.f32.mxu0 %vm322_vm1, %v5088_v19 }
 0x1f2   : > { %v13310_v56 = vadd.f32 %v3013_v47, %v2790_v6  ;;  %v2793_v1 = vadd.f32 %v10421_v2, %v13062_v37  ;;  %10774 = vmatprep.mubr.msk.f32.mxu1 %vm322_vm1, %v11299_v53  ;;  %v3023_v13 = vpop.f32.mrf.mxu0  ;;  %v11300_v37 = vld [vmem:[%s11404_s25 + $0x9b] sm:$0xff]  ;;  %v11302_v6 = vld [vmem:[%s11404_s25 + $0xb3] sm:$0xff] }
 0x1f3   : > { %v2753_v22 = vpop.f32.mrf.mxu1 }
 0x1f4   : > { %v13317_v41 = vadd.f32 %v10471_v46, %v2793_v1  ;;  %v2792_v58 = vadd.f32 %v2753_v22, %v13079_v29  ;;  %v10526_v17 = vpop.f32.mrf.mxu0  ;;  %10825 = vmatmul.mubr.msk.f32.vlgmr.msra.gmra.mxu0 %vm322_vm1, %v5089_v15  ;;  %v13334_v29 = vld [vmem:[%s15130_s1 + $0x38] sm:$0xf]  ;;  %v11303_v46 = vld [vmem:[%s11404_s25 + $0xc3] sm:$0xff]  ;;  %v13372_v1 = vld [vmem:[%s11404_s25 + $0x6c] sm:$0xff] }
 0x1f5   : > { %v10476_v32 = vpop.f32.mrf.mxu1  ;;  %10775 = vmatmul.mubr.msk.f32.vlgmr.msra.gmra.mxu1 %vm322_vm1, %v11300_v37  ;;  %10923 = vmatpush3.msk.msra.mxu0 %vm419_vm0, %v13077_v48  ;;  %v13375_v22 = vld [vmem:[%s11404_s25 + $0x7c] sm:$0xff] }
 0x1f6   : > { %v13336_v40 = vadd.f32 %v3023_v13, %v2792_v58  ;;  %v3437_v30 = vadd.f32 %v10476_v32, %v13090_v3  ;;  %10873 = vmatpush3.msk.msra.mxu1 %vm419_vm0, %v13072_v57  ;;  %v3547_v27 = vpop.f32.mrf.mxu0  ;;  %10777 = vmatprep.mubr.msk.f32.mxu1 %vm322_vm1, %v11301_v18  ;;  %v13351_v3 = vld [vmem:[%s11404_s25 + $0x64] sm:$0xff] }
 0x1f7   : > { %v3277_v39 = vpop.f32.mrf.mxu1  ;;  %10827 = vmatprep.mubr.msk.f32.mxu0 %vm322_vm1, %v13321_v34  ;;  %10972 = vmatprep.subr.msk.mxu1 %vm419_vm0, %v13329_v62 }
 0x1f8   : > { %v13353_v47 = vadd.f32 %v10526_v17, %v3437_v30  ;;  %v3436_v57 = vadd.f32 %v3277_v39, %v13101_v42  ;;  %11022 = vmatprep.subr.msk.mxu0 %vm419_vm0, %v13334_v29  ;;  %v10529_v19 = vpop.f32.mrf.mxu0  ;;  %10828 = vmatmul.mubr.msk.f32.gmra.mxu0 %vm322_vm1, %v13344_v52  ;;  %v11304_v17 = vld [vmem:[%s11404_s25 + $0xcb] sm:$0xff]  ;;  %v11305_v39 = vld [vmem:[%s11404_s25 + $0xdb] sm:$0xff] }
 0x1f9   : > { %v10479_v48 = vpop.f32.mrf.mxu1  ;;  %10778 = vmatmul.mubr.msk.f32.gmra.mxu1 %vm322_vm1, %v11302_v6  ;;  %10830 = vmatprep.mubr.msk.f32.mxu0 %vm322_vm1, %v13351_v3 }
 0x1fa   : > { %v13364_v2 = vadd.f32 %v3547_v27, %v3436_v57  ;;  %v3439_v42 = vadd.f32 %v10479_v48, %v13108_v43  ;;  %10780 = vmatprep.mubr.msk.f32.mxu1 %vm322_vm1, %v11303_v46  ;;  %v3557_v15 = vpop.f32.mrf.mxu0  ;;  %v13395_v57 = vld [vmem:[%s11404_s25 + $0x94] sm:$0xff] }
 0x1fb   : > { %v3287_v53 = vpop.f32.mrf.mxu1 }
 0x1fc   : > { %v13377_v13 = vadd.f32 %v10529_v19, %v3439_v42  ;;  %v3438_v58 = vadd.f32 %v3287_v53, %v13115_v8  ;;  %v10532_v32 = vpop.f32.mrf.mxu0  ;;  %10831 = vmatmul.mubr.msk.f32.gmra.mxu0 %vm322_vm1, %v13372_v1  ;;  %v13392_v8 = vld [vmem:[%s11404_s25 + $0x84] sm:$0xff] }
 0x1fd   : > { %v10482_v43 = vpop.f32.mrf.mxu1  ;;  %10781 = vmatmul.mubr.msk.f32.gmra.mxu1 %vm322_vm1, %v11304_v17  ;;  %10833 = vmatprep.mubr.msk.f32.mxu0 %vm322_vm1, %v13375_v22  ;;  %v11306_v42 = vld [vmem:[%s11404_s25 + $0xe3] sm:$0xff] }
 0x1fe   : > { %v13384_v37 = vadd.f32 %v3557_v15, %v3438_v58  ;;  %v3441_v30 = vadd.f32 %v10482_v43, %v13122_v16  ;;  %10783 = vmatprep.mubr.msk.f32.mxu1 %vm322_vm1, %v11305_v39  ;;  %v3567_v18 = vpop.f32.mrf.mxu0  ;;  %v11307_v15 = vld [vmem:[%s11404_s25 + $0xf3] sm:$0xff] }
 0x1ff   : > { %v3297_v27 = vpop.f32.mrf.mxu1 }
 0x200   : > { %v13397_v48 = vadd.f32 %v10532_v32, %v3441_v30  ;;  %v3440_v19 = vadd.f32 %v3297_v27, %v13129_v10  ;;  %v10535_v6 = vpop.f32.mrf.mxu0  ;;  %10834 = vmatmul.mubr.msk.f32.gmra.mxu0 %vm322_vm1, %v13392_v8  ;;  %v13412_v10 = vld [vmem:[%s11404_s25 + $0x9c] sm:$0xff]  ;;  %v13415_v32 = vld [vmem:[%s11404_s25 + $0xac] sm:$0xff] }
 0x201   : > { %v10485_v16 = vpop.f32.mrf.mxu1  ;;  %10784 = vmatmul.mubr.msk.f32.gmra.mxu1 %vm322_vm1, %v11306_v42  ;;  %10836 = vmatprep.mubr.msk.f32.mxu0 %vm322_vm1, %v13395_v57  ;;  %v11308_v27 = vld [vmem:[%s11404_s25 + $0xfb] sm:$0xff] }
 0x202   : > { %v13404_v46 = vadd.f32 %v3567_v18, %v3440_v19  ;;  %v3443_v53 = vadd.f32 %v10485_v16, %v13136_v28  ;;  %10786 = vmatprep.mubr.msk.f32.mxu1 %vm322_vm1, %v11307_v15  ;;  %v3577_v43 = vpop.f32.mrf.mxu0  ;;  %v11309_v16 = vld [vmem:[%s11404_s25 + $0x10b] sm:$0xff] }
 0x203   : > { %v3307_v58 = vpop.f32.mrf.mxu1 }
 0x204   : > { %v13417_v17 = vadd.f32 %v10535_v6, %v3443_v53  ;;  %v3442_v30 = vadd.f32 %v3307_v58, %v13143_v14  ;;  %v10538_v39 = vpop.f32.mrf.mxu0  ;;  %10837 = vmatmul.mubr.msk.f32.gmra.mxu0 %vm322_vm1, %v13412_v10  ;;  %v13432_v14 = vld [vmem:[%s11404_s25 + $0xb4] sm:$0xff]  ;;  %v13435_v53 = vld [vmem:[%s11404_s25 + $0xc4] sm:$0xff] }
 0x205   : > { %v10488_v28 = vpop.f32.mrf.mxu1  ;;  %10787 = vmatmul.mubr.msk.f32.gmra.mxu1 %vm322_vm1, %v11308_v27  ;;  %10839 = vmatprep.mubr.msk.f32.mxu0 %vm322_vm1, %v13415_v32 }
 0x206   : > { %v13424_v18 = vadd.f32 %v3577_v43, %v3442_v30  ;;  %v3445_v19 = vadd.f32 %v10488_v28, %v13150_v51  ;;  %10789 = vmatprep.mubr.msk.f32.mxu1 %vm322_vm1, %v11309_v16  ;;  %v3587_v42 = vpop.f32.mrf.mxu0  ;;  %v11310_v30 = vld [vmem:[%s11404_s25 + $0x113] sm:$0xff]  ;;  %v11311_v16 = vld [vmem:[%s11404_s25 + $0x123] sm:$0xff] }
 0x207   : > { %v3317_v6 = vpop.f32.mrf.mxu1 }
 0x208   : > { %v13437_v15 = vadd.f32 %v10538_v39, %v3445_v19  ;;  %v3444_v58 = vadd.f32 %v3317_v6, %v13157_v63  ;;  %v10541_v43 = vpop.f32.mrf.mxu0  ;;  %10840 = vmatmul.mubr.msk.f32.gmra.mxu0 %vm322_vm1, %v13432_v14  ;;  %v13452_v63 = vld [vmem:[%s11404_s25 + $0xcc] sm:$0xff]  ;;  %v13455_v6 = vld [vmem:[%s11404_s25 + $0xdc] sm:$0xff] }
 0x209   : > { %v10491_v51 = vpop.f32.mrf.mxu1  ;;  %10790 = vmatmul.mubr.msk.f32.gmra.mxu1 %vm322_vm1, %v11310_v30  ;;  %10842 = vmatprep.mubr.msk.f32.mxu0 %vm322_vm1, %v13435_v53 }
 0x20a   : > { %15203 = vst [vmem:[#allocation12_spill] sm:$0xff] %v13437_v15  ;;  %v13444_v28 = vadd.f32 %v3587_v42, %v3444_v58  ;;  %v3447_v27 = vadd.f32 %v10491_v51, %v13164_v26  ;;  %10792 = vmatprep.mubr.msk.f32.mxu1 %vm322_vm1, %v11311_v16  ;;  %v3597_v19 = vpop.f32.mrf.mxu0  ;;  %v11312_v51 = vld [vmem:[%s11404_s25 + $0x12b] sm:$0xff]  ;;  %v11313_v15 = vld [vmem:[%s11404_s25 + $0x13b] sm:$0xff] }
 0x20b   : > { %v3327_v39 = vpop.f32.mrf.mxu1 }
 0x20c   : > { %15204 = vst [vmem:[#allocation13_spill] sm:$0xff] %v13444_v28  ;;  %v13457_v30 = vadd.f32 %v10541_v43, %v3447_v27  ;;  %v3446_v42 = vadd.f32 %v3327_v39, %v13171_v45  ;;  %v10544_v58 = vpop.f32.mrf.mxu0  ;;  %10843 = vmatmul.mubr.msk.f32.gmra.mxu0 %vm322_vm1, %v13452_v63  ;;  %v13472_v45 = vld [vmem:[%s11404_s25 + $0xe4] sm:$0xff]  ;;  %v13475_v39 = vld [vmem:[%s11404_s25 + $0xf4] sm:$0xff] }
 0x20d   : > { %v10494_v26 = vpop.f32.mrf.mxu1  ;;  %10793 = vmatmul.mubr.msk.f32.gmra.mxu1 %vm322_vm1, %v11312_v51  ;;  %10845 = vmatprep.mubr.msk.f32.mxu0 %vm322_vm1, %v13455_v6 }
 0x20e   : > { %15205 = vst [vmem:[#allocation15_spill] sm:$0xff] %v13457_v30  ;;  %v13464_v16 = vadd.f32 %v3597_v19, %v3446_v42  ;;  %v3449_v28 = vadd.f32 %v10494_v26, %v13178_v7  ;;  %10795 = vmatprep.mubr.msk.f32.mxu1 %vm322_vm1, %v11313_v15  ;;  %v3607_v27 = vpop.f32.mrf.mxu0  ;;  %v11314_v26 = vld [vmem:[%s11404_s25 + $0x143] sm:$0xff]  ;;  %v11315_v30 = vld [vmem:[%s11404_s25 + $0x153] sm:$0xff] }
 0x20f   : > { %v3337_v43 = vpop.f32.mrf.mxu1 }
 0x210   : > { %15206 = vst [vmem:[#allocation6_spill] sm:$0xff] %v13464_v16  ;;  %v13477_v51 = vadd.f32 %v10544_v58, %v3449_v28  ;;  %v3448_v19 = vadd.f32 %v3337_v43, %v13185_v31  ;;  %v10547_v42 = vpop.f32.mrf.mxu0  ;;  %10846 = vmatmul.mubr.msk.f32.gmra.mxu0 %vm322_vm1, %v13472_v45  ;;  %v13492_v31 = vld [vmem:[%s11404_s25 + $0xfc] sm:$0xff]  ;;  %v13495_v43 = vld [vmem:[%s11404_s25 + $0x10c] sm:$0xff] }
 0x211   : > { %v10497_v7 = vpop.f32.mrf.mxu1  ;;  %10796 = vmatmul.mubr.msk.f32.gmra.mxu1 %vm322_vm1, %v11314_v26  ;;  %10848 = vmatprep.mubr.msk.f32.mxu0 %vm322_vm1, %v13475_v39 }
 0x212   : > { %15207 = vst [vmem:[#allocation3_spill] sm:$0xff] %v13477_v51  ;;  %v13484_v15 = vadd.f32 %v3607_v27, %v3448_v19  ;;  %v3451_v16 = vadd.f32 %v10497_v7, %v13192_v25  ;;  %10798 = vmatprep.mubr.msk.f32.mxu1 %vm322_vm1, %v11315_v30  ;;  %v3617_v58 = vpop.f32.mrf.mxu0  ;;  %v11316_v7 = vld [vmem:[%s11404_s25 + $0x15b] sm:$0xff]  ;;  %v11317_v51 = vld [vmem:[%s11404_s25 + $0x16b] sm:$0xff] }
 0x213   : > { %v3347_v28 = vpop.f32.mrf.mxu1 }
 0x214   : > { %15208 = vst [vmem:[#allocation4_spill] sm:$0xff] %v13484_v15  ;;  %v13497_v26 = vadd.f32 %v10547_v42, %v3451_v16  ;;  %v3450_v27 = vadd.f32 %v3347_v28, %v13199_v33  ;;  %v10550_v19 = vpop.f32.mrf.mxu0  ;;  %10849 = vmatmul.mubr.msk.f32.gmra.mxu0 %vm322_vm1, %v13492_v31  ;;  %v13512_v33 = vld [vmem:[%s11404_s25 + $0x114] sm:$0xff]  ;;  %v13515_v28 = vld [vmem:[%s11404_s25 + $0x124] sm:$0xff] }
 0x215   : > { %v10500_v25 = vpop.f32.mrf.mxu1  ;;  %10799 = vmatmul.mubr.msk.f32.gmra.mxu1 %vm322_vm1, %v11316_v7  ;;  %10851 = vmatprep.mubr.msk.f32.mxu0 %vm322_vm1, %v13495_v43 }
 0x216   : > { %15209 = vst [vmem:[#allocation7_spill] sm:$0xff] %v13497_v26  ;;  %v13504_v30 = vadd.f32 %v3617_v58, %v3450_v27  ;;  %v3453_v15 = vadd.f32 %v10500_v25, %v13206_v44  ;;  %10801 = vmatprep.mubr.msk.f32.mxu1 %vm322_vm1, %v11317_v51  ;;  %v3627_v42 = vpop.f32.mrf.mxu0  ;;  %v11318_v25 = vld [vmem:[%s11404_s25 + $0x173] sm:$0xff]  ;;  %v11319_v26 = vld [vmem:[%s11404_s25 + $0x183] sm:$0xff] }
 0x217   : > { %v3357_v16 = vpop.f32.mrf.mxu1 }
 0x218   : > { %15210 = vst [vmem:[#allocation14_spill] sm:$0xff] %v13504_v30  ;;  %v13517_v7 = vadd.f32 %v10550_v19, %v3453_v15  ;;  %v3452_v58 = vadd.f32 %v3357_v16, %v13213_v61  ;;  %v10553_v27 = vpop.f32.mrf.mxu0  ;;  %10852 = vmatmul.mubr.msk.f32.gmra.mxu0 %vm322_vm1, %v13512_v33  ;;  %v13532_v61 = vld [vmem:[%s11404_s25 + $0x12c] sm:$0xff]  ;;  %v13535_v16 = vld [vmem:[%s11404_s25 + $0x13c] sm:$0xff] }
 0x219   : > { %v10503_v44 = vpop.f32.mrf.mxu1  ;;  %10802 = vmatmul.mubr.msk.f32.gmra.mxu1 %vm322_vm1, %v11318_v25  ;;  %10854 = vmatprep.mubr.msk.f32.mxu0 %vm322_vm1, %v13515_v28 }
 0x21a   : > { %v13524_v51 = vadd.f32 %v3627_v42, %v3452_v58  ;;  %v3455_v30 = vadd.f32 %v10503_v44, %v13220_v49  ;;  %10804 = vmatprep.mubr.msk.f32.mxu1 %vm322_vm1, %v11319_v26  ;;  %v3637_v19 = vpop.f32.mrf.mxu0  ;;  %v11320_v44 = vld [vmem:[%s11404_s25 + $0x18b] sm:$0xff] }
 0x21b   : > { %v3367_v15 = vpop.f32.mrf.mxu1 }
 0x21c   : > { %15211 = vst [vmem:[#allocation5_spill] sm:$0xff] %v13524_v51  ;;  %v13537_v25 = vadd.f32 %v10553_v27, %v3455_v30  ;;  %v3454_v42 = vadd.f32 %v3367_v15, %v13227_v21  ;;  %v10556_v49 = vpop.f32.mrf.mxu0  ;;  %10855 = vmatmul.mubr.msk.f32.gmra.mxu0 %vm322_vm1, %v13532_v61  ;;  %v13552_v21 = vld [vmem:[%s11404_s25 + $0x144] sm:$0xff]  ;;  %v13555_v15 = vld [vmem:[%s11404_s25 + $0x154] sm:$0xff] }
 0x21d   : > { %v10506_v58 = vpop.f32.mrf.mxu1  ;;  %10805 = vmatmul.mubr.msk.f32.gmra.mxu1 %vm322_vm1, %v11320_v44  ;;  %10857 = vmatprep.mubr.msk.f32.mxu0 %vm322_vm1, %v13535_v16 }
 0x21e   : > { %v13544_v26 = vadd.f32 %v3637_v19, %v3454_v42  ;;  %v3457_v51 = vadd.f32 %v10506_v58, %v13234_v4  ;;  %10807 = vmatprep.mubr.msk.f32.mxu1 %vm322_vm1, %v13009_v50  ;;  %v3647_v27 = vpop.f32.mrf.mxu0 }
 0x21f   : > { %v3377_v30 = vpop.f32.mrf.mxu1 }
 0x220   : > { %v13557_v44 = vadd.f32 %v10556_v49, %v3457_v51  ;;  %v3456_v19 = vadd.f32 %v3377_v30, %v13241_v54  ;;  %v10559_v4 = vpop.f32.mrf.mxu0  ;;  %10858 = vmatmul.mubr.msk.f32.gmra.mxu0 %vm322_vm1, %v13552_v21  ;;  %v13572_v54 = vld [vmem:[%s11404_s25 + $0x15c] sm:$0xff] }
 0x221   : > { %v10509_v42 = vpop.f32.mrf.mxu1  ;;  %10808 = vmatmul.mubr.msk.f32.gmra.mxu1 %vm322_vm1, %v13026_v9  ;;  %10860 = vmatprep.mubr.msk.f32.mxu0 %vm322_vm1, %v13555_v15  ;;  %v13575_v9 = vld [vmem:[%s11404_s25 + $0x16c] sm:$0xff] }
 0x222   : > { %v13564_v50 = vadd.f32 %v3647_v27, %v3456_v19  ;;  %v3459_v58 = vadd.f32 %v10509_v42, %v13248_v36  ;;  %10810 = vmatprep.mubr.msk.f32.mxu1 %vm322_vm1, %v13029_v20  ;;  %v3657_v49 = vpop.f32.mrf.mxu0 }
 0x223   : > { %v3387_v51 = vpop.f32.mrf.mxu1 }
 0x224   : > { %v13577_v30 = vadd.f32 %v10559_v4, %v3459_v58  ;;  %v3458_v27 = vadd.f32 %v3387_v51, %v13255_v5  ;;  %v10562_v36 = vpop.f32.mrf.mxu0  ;;  %10861 = vmatmul.mubr.msk.f32.gmra.mxu0 %vm322_vm1, %v13572_v54  ;;  %v13592_v5 = vld [vmem:[%s11404_s25 + $0x174] sm:$0xff] }
 0x225   : > { %v10512_v19 = vpop.f32.mrf.mxu1  ;;  %10811 = vmatmul.mubr.msk.f32.gmra.mxu1 %vm322_vm1, %v13046_v60  ;;  %10863 = vmatprep.mubr.msk.f32.mxu0 %vm322_vm1, %v13575_v9  ;;  %v13595_v60 = vld [vmem:[%s11404_s25 + $0x184] sm:$0xff] }
 0x226   : > { %v13584_v20 = vadd.f32 %v3657_v49, %v3458_v27  ;;  %v3461_v42 = vadd.f32 %v10512_v19, %v13265_v38  ;;  %10813 = vmatprep.mubr.msk.f32.mxu1 %vm322_vm1, %v13263_v24  ;;  %v3667_v58 = vpop.f32.mrf.mxu0 }
 0x227   : > { %v3397_v4 = vpop.f32.mrf.mxu1 }
 0x228   : > { %v13597_v51 = vadd.f32 %v10562_v36, %v3461_v42  ;;  %v3460_v49 = vadd.f32 %v3397_v4, %v13272_v59  ;;  %v10565_v27 = vpop.f32.mrf.mxu0  ;;  %10864 = vmatmul.mubr.msk.f32.gmra.mxu0 %vm322_vm1, %v13592_v5  ;;  %v13612_v59 = vld [vmem:[%s11404_s25 + $0x18c] sm:$0xff]  ;;  %v13616_v4 = vld [vmem:[%s11404_s25 + $0x19c] sm:$0xff] }
 0x229   : > { %v10515_v38 = vpop.f32.mrf.mxu1  ;;  %10814 = vmatmul.mubr.msk.f32.gmra.mxu1 %vm322_vm1, %v13280_v35  ;;  %10866 = vmatprep.mubr.msk.f32.mxu0 %vm322_vm1, %v13595_v60  ;;  %15214 = vst [vmem:[#allocation9_spill] sm:$0xff] %v13612_v59  ;;  %v3106_v35 = vld [vmem:[%s11404_s25 + $0x1fb] sm:$0xff] }
 0x22a   : > { %15212 = vst [vmem:[#allocation10_spill] sm:$0xff] %v13597_v51  ;;  %v13604_v24 = vadd.f32 %v3667_v58, %v3460_v49  ;;  %v3463_v19 = vadd.f32 %v10515_v38, %v13285_v11  ;;  %10816 = vmatprep.mubr.msk.f32.mxu1 %vm322_vm1, %v13283_v0  ;;  %v3677_v42 = vpop.f32.mrf.mxu0 }
 0x22b   : > { %v3407_v36 = vpop.f32.mrf.mxu1 }
 0x22c   : > { %15213 = vst [vmem:[#allocation8_spill] sm:$0xff] %v13604_v24  ;;  %v13618_v51 = vadd.f32 %v10565_v27, %v3463_v19  ;;  %v3462_v58 = vadd.f32 %v3407_v36, %v13292_v55  ;;  %v10568_v49 = vpop.f32.mrf.mxu0  ;;  %10867 = vmatmul.mubr.msk.f32.gmra.mxu0 %vm322_vm1, %v13612_v59  ;;  %v3107_v27 = vld [vmem:[%s11404_s25 + $0x203] sm:$0xff] }
 0x22d   : > { %v10518_v11 = vpop.f32.mrf.mxu1  ;;  %10817 = vmatmul.mubr.msk.f32.gmra.mxu1 %vm322_vm1, %v13300_v23  ;;  %10869 = vmatprep.mubr.msk.f32.mxu0 %vm322_vm1, %v13616_v4  ;;  %v13633_v19 = vld [vmem:[%s11404_s25 + $0x1a4] sm:$0xff] }
 0x22e   : > { %15215 = vst [vmem:[#allocation11_spill] sm:$0xff] %v13618_v51  ;;  %v13625_v0 = vadd.f32 %v3677_v42, %v3462_v58  ;;  %v3465_v38 = vadd.f32 %v10518_v11, %v13303_v12  ;;  %10819 = vmatprep.mubr.msk.f32.mxu1 %vm322_vm1, %v3106_v35  ;;  %v3687_v36 = vpop.f32.mrf.mxu0 }
 0x22f   : > { %v3417_v55 = vpop.f32.mrf.mxu1 }
 0x230   : > { %v13635_v51 = vadd.f32 %v10568_v49, %v3465_v38  ;;  %v3464_v23 = vadd.f32 %v3417_v55, %v13310_v56  ;;  %v10571_v59 = vpop.f32.mrf.mxu0  ;;  %10870 = vmatmul.mubr.msk.f32.gmra.mxu0 %vm322_vm1, %v13633_v19 }
 0x231   : > { %v10521_v24 = vpop.f32.mrf.mxu1  ;;  %10820 = vmatmul.mubr.msk.f32.gmra.mxu1 %vm322_vm1, %v3107_v27  ;;  %10924 = vmatprep.mubr.msk.f32.mxu0 %vm322_vm1, %v13351_v3 }
 0x232   : > { %v13641_v12 = vadd.f32 %v3687_v36, %v3464_v23  ;;  %v3467_v42 = vadd.f32 %v10521_v24, %v13317_v41  ;;  %10874 = vmatprep.mubr.msk.f32.mxu1 %vm322_vm1, %v13321_v34  ;;  %v3697_v58 = vpop.f32.mrf.mxu0  ;;  %v13658_v41 = vld [vmem:[%s15130_s1 + $0x54] sm:$0xf]  ;;  %v13663_v34 = vld [vmem:[%s15130_s1 + $0x8] sm:$0xf] }
 0x233   : > { %v3427_v35 = vpop.f32.mrf.mxu1 }
 0x234   : > { %v13648_v56 = vadd.f32 %v10571_v59, %v3467_v42  ;;  %v3466_v11 = vadd.f32 %v3427_v35, %v13336_v40  ;;  %v10626_v38 = vpop.f32.mrf.mxu0  ;;  %10925 = vmatmul.mubr.msk.f32.vlgmr.msra.gmra.mxu0 %vm322_vm1, %v13372_v1 }
 0x235   : > { %v10576_v49 = vpop.f32.mrf.mxu1  ;;  %10875 = vmatmul.mubr.msk.f32.vlgmr.msra.gmra.mxu1 %vm322_vm1, %v13344_v52  ;;  %11023 = vmatpush3.msk.msra.mxu0 %vm419_vm0, %v13334_v29 }
 0x236   : > { %v13665_v24 = vadd.f32 %v3697_v58, %v3466_v11  ;;  %v3977_v40 = vadd.f32 %v10576_v49, %v13353_v47  ;;  %10973 = vmatpush3.msk.msra.mxu1 %vm419_vm0, %v13329_v62  ;;  %v4087_v59 = vpop.f32.mrf.mxu0  ;;  %10877 = vmatprep.mubr.msk.f32.mxu1 %vm322_vm1, %v13351_v3 }
 0x237   : > { %v3817_v52 = vpop.f32.mrf.mxu1  ;;  %10927 = vmatprep.mubr.msk.f32.mxu0 %vm322_vm1, %v13375_v22  ;;  %11072 = vmatprep.subr.msk.mxu1 %vm419_vm0, %v13658_v41 }
 0x238   : > { %v13676_v27 = vadd.f32 %v10626_v38, %v3977_v40  ;;  %v3976_v55 = vadd.f32 %v3817_v52, %v13364_v2  ;;  %11122 = vmatprep.subr.msk.mxu0 %vm419_vm0, %v13663_v34  ;;  %v10629_v29 = vpop.f32.mrf.mxu0  ;;  %10928 = vmatmul.mubr.msk.f32.gmra.mxu0 %vm322_vm1, %v13392_v8 }
 0x239   : > { %v10579_v62 = vpop.f32.mrf.mxu1  ;;  %10878 = vmatmul.mubr.msk.f32.gmra.mxu1 %vm322_vm1, %v13372_v1  ;;  %10930 = vmatprep.mubr.msk.f32.mxu0 %vm322_vm1, %v13395_v57 }
 0x23a   : > { %v13687_v3 = vadd.f32 %v4087_v59, %v3976_v55  ;;  %v3979_v47 = vadd.f32 %v10579_v62, %v13377_v13  ;;  %10880 = vmatprep.mubr.msk.f32.mxu1 %vm322_vm1, %v13375_v22  ;;  %v4097_v36 = vpop.f32.mrf.mxu0 }
 0x23b   : > { %v3827_v2 = vpop.f32.mrf.mxu1 }
 0x23c   : > { %v13694_v23 = vadd.f32 %v10629_v29, %v3979_v47  ;;  %v3978_v42 = vadd.f32 %v3827_v2, %v13384_v37  ;;  %v10632_v35 = vpop.f32.mrf.mxu0  ;;  %10931 = vmatmul.mubr.msk.f32.gmra.mxu0 %vm322_vm1, %v13412_v10  ;;  %v15217_v2 = vld [vmem:[#allocation13_spill] sm:$0xff] }
 0x23d   : > { %v10582_v1 = vpop.f32.mrf.mxu1  ;;  %10881 = vmatmul.mubr.msk.f32.gmra.mxu1 %vm322_vm1, %v13392_v8  ;;  %10933 = vmatprep.mubr.msk.f32.mxu0 %vm322_vm1, %v13415_v32 }
 0x23e   : > { %v13701_v13 = vadd.f32 %v4097_v36, %v3978_v42  ;;  %v3981_v22 = vadd.f32 %v10582_v1, %v13397_v48  ;;  %10883 = vmatprep.mubr.msk.f32.mxu1 %vm322_vm1, %v13395_v57  ;;  %v4107_v37 = vpop.f32.mrf.mxu0 }
 0x23f   : > { %v3837_v58 = vpop.f32.mrf.mxu1 }
 0x240   : > { %v13708_v11 = vadd.f32 %v10632_v35, %v3981_v22  ;;  %v3980_v49 = vadd.f32 %v3837_v58, %v13404_v46  ;;  %v10635_v38 = vpop.f32.mrf.mxu0  ;;  %10934 = vmatmul.mubr.msk.f32.gmra.mxu0 %vm322_vm1, %v13432_v14 }
 0x241   : > { %v10585_v8 = vpop.f32.mrf.mxu1  ;;  %10884 = vmatmul.mubr.msk.f32.gmra.mxu1 %vm322_vm1, %v13412_v10  ;;  %10936 = vmatprep.mubr.msk.f32.mxu0 %vm322_vm1, %v13435_v53 }
 0x242   : > { %v13715_v48 = vadd.f32 %v4107_v37, %v3980_v49  ;;  %v3983_v57 = vadd.f32 %v10585_v8, %v13417_v17  ;;  %10886 = vmatprep.mubr.msk.f32.mxu1 %vm322_vm1, %v13415_v32  ;;  %v4117_v46 = vpop.f32.mrf.mxu0  ;;  %v15216_v32 = vld [vmem:[#allocation12_spill] sm:$0xff]  ;;  %v15219_v49 = vld [vmem:[#allocation6_spill] sm:$0xff] }
 0x243   : > { %v3847_v40 = vpop.f32.mrf.mxu1 }
 0x244   : > { %v13722_v52 = vadd.f32 %v10635_v38, %v3983_v57  ;;  %v3982_v59 = vadd.f32 %v3847_v40, %v13424_v18  ;;  %v10638_v55 = vpop.f32.mrf.mxu0  ;;  %10937 = vmatmul.mubr.msk.f32.gmra.mxu0 %vm322_vm1, %v13452_v63 }
 0x245   : > { %v10588_v10 = vpop.f32.mrf.mxu1  ;;  %10887 = vmatmul.mubr.msk.f32.gmra.mxu1 %vm322_vm1, %v13432_v14  ;;  %10939 = vmatprep.mubr.msk.f32.mxu0 %vm322_vm1, %v13455_v6 }
 0x246   : > { %v13729_v17 = vadd.f32 %v4117_v46, %v3982_v59  ;;  %v3985_v62 = vadd.f32 %v10588_v10, %v15216_v32  ;;  %10889 = vmatprep.mubr.msk.f32.mxu1 %vm322_vm1, %v13435_v53  ;;  %v4127_v18 = vpop.f32.mrf.mxu0  ;;  %v15218_v53 = vld [vmem:[#allocation15_spill] sm:$0xff] }
 0x247   : > { %v3857_v29 = vpop.f32.mrf.mxu1 }
 0x248   : > { %v13736_v47 = vadd.f32 %v10638_v55, %v3985_v62  ;;  %v3984_v36 = vadd.f32 %v3857_v29, %v15217_v2  ;;  %v10641_v42 = vpop.f32.mrf.mxu0  ;;  %10940 = vmatmul.mubr.msk.f32.gmra.mxu0 %vm322_vm1, %v13472_v45  ;;  %v15221_v55 = vld [vmem:[#allocation4_spill] sm:$0xff] }
 0x249   : > { %v10591_v14 = vpop.f32.mrf.mxu1  ;;  %10890 = vmatmul.mubr.msk.f32.gmra.mxu1 %vm322_vm1, %v13452_v63  ;;  %10942 = vmatprep.mubr.msk.f32.mxu0 %vm322_vm1, %v13475_v39 }
 0x24a   : > { %v13743_v1 = vadd.f32 %v4127_v18, %v3984_v36  ;;  %v3987_v35 = vadd.f32 %v10591_v14, %v15218_v53  ;;  %10892 = vmatprep.mubr.msk.f32.mxu1 %vm322_vm1, %v13455_v6  ;;  %v4137_v58 = vpop.f32.mrf.mxu0  ;;  %v15220_v6 = vld [vmem:[#allocation3_spill] sm:$0xff] }
 0x24b   : > { %v3867_v22 = vpop.f32.mrf.mxu1 }
 0x24c   : > { %v13750_v37 = vadd.f32 %v10641_v42, %v3987_v35  ;;  %v3986_v8 = vadd.f32 %v3867_v22, %v15219_v49  ;;  %v10644_v38 = vpop.f32.mrf.mxu0  ;;  %10943 = vmatmul.mubr.msk.f32.gmra.mxu0 %vm322_vm1, %v13492_v31  ;;  %v15223_v42 = vld [vmem:[#allocation14_spill] sm:$0xff] }
 0x24d   : > { %v10594_v63 = vpop.f32.mrf.mxu1  ;;  %10893 = vmatmul.mubr.msk.f32.gmra.mxu1 %vm322_vm1, %v13472_v45  ;;  %10945 = vmatprep.mubr.msk.f32.mxu0 %vm322_vm1, %v13495_v43 }
 0x24e   : > { %v13757_v57 = vadd.f32 %v4137_v58, %v3986_v8  ;;  %v3989_v40 = vadd.f32 %v10594_v63, %v15220_v6  ;;  %10895 = vmatprep.mubr.msk.f32.mxu1 %vm322_vm1, %v13475_v39  ;;  %v4147_v59 = vpop.f32.mrf.mxu0  ;;  %v15222_v39 = vld [vmem:[#allocation7_spill] sm:$0xff]  ;;  %v15224_v63 = vld [vmem:[#allocation5_spill] sm:$0xff] }
 0x24f   : > { %v3877_v46 = vpop.f32.mrf.mxu1 }
 0x250   : > { %v13764_v10 = vadd.f32 %v10644_v38, %v3989_v40  ;;  %v3988_v32 = vadd.f32 %v3877_v46, %v15221_v55  ;;  %v10647_v62 = vpop.f32.mrf.mxu0  ;;  %10946 = vmatmul.mubr.msk.f32.gmra.mxu0 %vm322_vm1, %v13512_v33 }
 0x251   : > { %v10597_v45 = vpop.f32.mrf.mxu1  ;;  %10896 = vmatmul.mubr.msk.f32.gmra.mxu1 %vm322_vm1, %v13492_v31  ;;  %10948 = vmatprep.mubr.msk.f32.mxu0 %vm322_vm1, %v13515_v28 }
 0x252   : > { %v13771_v29 = vadd.f32 %v4147_v59, %v3988_v32  ;;  %v3991_v18 = vadd.f32 %v10597_v45, %v15222_v39  ;;  %10898 = vmatprep.mubr.msk.f32.mxu1 %vm322_vm1, %v13495_v43  ;;  %v4157_v36 = vpop.f32.mrf.mxu0 }
 0x253   : > { %v3887_v2 = vpop.f32.mrf.mxu1 }
 0x254   : > { %v13778_v14 = vadd.f32 %v10647_v62, %v3991_v18  ;;  %v3990_v53 = vadd.f32 %v3887_v2, %v15223_v42  ;;  %v10650_v35 = vpop.f32.mrf.mxu0  ;;  %10949 = vmatmul.mubr.msk.f32.gmra.mxu0 %vm322_vm1, %v13532_v61 }
 0x255   : > { %v10600_v31 = vpop.f32.mrf.mxu1  ;;  %10899 = vmatmul.mubr.msk.f32.gmra.mxu1 %vm322_vm1, %v13512_v33  ;;  %10951 = vmatprep.mubr.msk.f32.mxu0 %vm322_vm1, %v13535_v16 }
 0x256   : > { %v13785_v22 = vadd.f32 %v4157_v36, %v3990_v53  ;;  %v3993_v43 = vadd.f32 %v10600_v31, %v13517_v7  ;;  %10901 = vmatprep.mubr.msk.f32.mxu1 %vm322_vm1, %v13515_v28  ;;  %v4167_v49 = vpop.f32.mrf.mxu0  ;;  %v15225_v31 = vld [vmem:[#allocation9_spill] sm:$0xff] }
 0x257   : > { %v3897_v58 = vpop.f32.mrf.mxu1 }
 0x258   : > { %v13792_v8 = vadd.f32 %v10650_v35, %v3993_v43  ;;  %v3992_v38 = vadd.f32 %v3897_v58, %v15224_v63  ;;  %v10653_v6 = vpop.f32.mrf.mxu0  ;;  %10952 = vmatmul.mubr.msk.f32.gmra.mxu0 %vm322_vm1, %v13552_v21  ;;  %v5120_v58 = vld [vmem:[%s11404_s25 + $0x1b4] sm:$0xff] }
 0x259   : > { %v10603_v33 = vpop.f32.mrf.mxu1  ;;  %10902 = vmatmul.mubr.msk.f32.gmra.mxu1 %vm322_vm1, %v13532_v61  ;;  %10954 = vmatprep.mubr.msk.f32.mxu0 %vm322_vm1, %v13555_v15 }
 0x25a   : > { %v13799_v7 = vadd.f32 %v4167_v49, %v3992_v38  ;;  %v3995_v28 = vadd.f32 %v10603_v33, %v13537_v25  ;;  %10904 = vmatprep.mubr.msk.f32.mxu1 %vm322_vm1, %v13535_v16  ;;  %v4177_v46 = vpop.f32.mrf.mxu0 }
 0x25b   : > { %v3907_v40 = vpop.f32.mrf.mxu1 }
 0x25c   : > { %v13806_v59 = vadd.f32 %v10653_v6, %v3995_v28  ;;  %v3994_v55 = vadd.f32 %v3907_v40, %v13544_v26  ;;  %v10656_v32 = vpop.f32.mrf.mxu0  ;;  %10955 = vmatmul.mubr.msk.f32.gmra.mxu0 %vm322_vm1, %v13572_v54  ;;  %v15228_v6 = vld [vmem:[#allocation11_spill] sm:$0xff] }
 0x25d   : > { %v10606_v61 = vpop.f32.mrf.mxu1  ;;  %10905 = vmatmul.mubr.msk.f32.gmra.mxu1 %vm322_vm1, %v13552_v21  ;;  %10957 = vmatprep.mubr.msk.f32.mxu0 %vm322_vm1, %v13575_v9  ;;  %v5121_v40 = vld [vmem:[%s11404_s25 + $0x1bc] sm:$0xff] }
 0x25e   : > { %v13813_v25 = vadd.f32 %v4177_v46, %v3994_v55  ;;  %v3997_v16 = vadd.f32 %v10606_v61, %v13557_v44  ;;  %10907 = vmatprep.mubr.msk.f32.mxu1 %vm322_vm1, %v13555_v15  ;;  %v4187_v26 = vpop.f32.mrf.mxu0  ;;  %v5122_v61 = vld [vmem:[%s11404_s25 + $0x1cc] sm:$0xff] }
 0x25f   : > { %v3917_v45 = vpop.f32.mrf.mxu1 }
 0x260   : > { %v13820_v62 = vadd.f32 %v10656_v32, %v3997_v16  ;;  %v3996_v39 = vadd.f32 %v3917_v45, %v13564_v50  ;;  %v10659_v18 = vpop.f32.mrf.mxu0  ;;  %10958 = vmatmul.mubr.msk.f32.gmra.mxu0 %vm322_vm1, %v13592_v5 }
 0x261   : > { %v10609_v21 = vpop.f32.mrf.mxu1  ;;  %10908 = vmatmul.mubr.msk.f32.gmra.mxu1 %vm322_vm1, %v13572_v54  ;;  %10960 = vmatprep.mubr.msk.f32.mxu0 %vm322_vm1, %v13595_v60 }
 0x262   : > { %v13827_v44 = vadd.f32 %v4187_v26, %v3996_v39  ;;  %v3999_v15 = vadd.f32 %v10609_v21, %v13577_v30  ;;  %10910 = vmatprep.mubr.msk.f32.mxu1 %vm322_vm1, %v13575_v9  ;;  %v4197_v2 = vpop.f32.mrf.mxu0  ;;  %v15226_v9 = vld [vmem:[#allocation10_spill] sm:$0xff] }
 0x263   : > { %v3927_v50 = vpop.f32.mrf.mxu1  ;;  %v5123_v21 = vld [vmem:[%s11404_s25 + $0x1d4] sm:$0xff] }
 0x264   : > { %v13834_v36 = vadd.f32 %v10659_v18, %v3999_v15  ;;  %v3998_v54 = vadd.f32 %v3927_v50, %v13584_v20  ;;  %v10662_v53 = vpop.f32.mrf.mxu0  ;;  %10961 = vmatmul.mubr.msk.f32.gmra.mxu0 %vm322_vm1, %v15225_v31  ;;  %v6024_v15 = vld [vmem:[%s11404_s25 + $0x1d] sm:$0xff]  ;;  %v6028_v50 = vld [vmem:[%s11404_s25 + $0x4d] sm:$0xff] }
 0x265   : > { %v10612_v42 = vpop.f32.mrf.mxu1  ;;  %10911 = vmatmul.mubr.msk.f32.gmra.mxu1 %vm322_vm1, %v13592_v5  ;;  %10963 = vmatprep.mubr.msk.f32.mxu0 %vm322_vm1, %v13616_v4  ;;  %v15227_v5 = vld [vmem:[#allocation8_spill] sm:$0xff] }
 0x266   : > { %v13841_v30 = vadd.f32 %v4197_v2, %v3998_v54  ;;  %v4001_v35 = vadd.f32 %v10612_v42, %v15226_v9  ;;  %10913 = vmatprep.mubr.msk.f32.mxu1 %vm322_vm1, %v13595_v60  ;;  %v4207_v43 = vpop.f32.mrf.mxu0  ;;  %v6029_v9 = vld [vmem:[%s11404_s25 + $0x55] sm:$0xff] }
 0x267   : > { %v3937_v20 = vpop.f32.mrf.mxu1 }
 0x268   : > { %v13849_v49 = vadd.f32 %v10662_v53, %v4001_v35  ;;  %v4000_v63 = vadd.f32 %v3937_v20, %v15227_v5  ;;  %v10665_v33 = vpop.f32.mrf.mxu0  ;;  %10964 = vmatmul.mubr.msk.f32.gmra.mxu0 %vm322_vm1, %v13633_v19  ;;  %v6030_v5 = vld [vmem:[%s11404_s25 + $0x65] sm:$0xff] }
 0x269   : > { %v10615_v38 = vpop.f32.mrf.mxu1  ;;  %10914 = vmatmul.mubr.msk.f32.gmra.mxu1 %vm322_vm1, %v15225_v31  ;;  %10966 = vmatprep.mubr.msk.f32.mxu0 %vm322_vm1, %v5120_v58  ;;  %v6025_v31 = vld [vmem:[%s11404_s25 + $0x25] sm:$0xff] }
 0x26a   : > { %v13856_v60 = vadd.f32 %v4207_v43, %v4000_v63  ;;  %v4003_v28 = vadd.f32 %v10615_v38, %v15228_v6  ;;  %10916 = vmatprep.mubr.msk.f32.mxu1 %vm322_vm1, %v13616_v4  ;;  %v4217_v55 = vpop.f32.mrf.mxu0 }
 0x26b   : > { %v3947_v46 = vpop.f32.mrf.mxu1 }
 0x26c   : > { %v13864_v32 = vadd.f32 %v10665_v33, %v4003_v28  ;;  %v4002_v16 = vadd.f32 %v3947_v46, %v13625_v0  ;;  %v10668_v26 = vpop.f32.mrf.mxu0  ;;  %10967 = vmatmul.mubr.msk.f32.gmra.mxu0 %vm322_vm1, %v5121_v40  ;;  %v13905_v33 = vld [vmem:[%s15130_s1 + $0x60] sm:$0xf] }
 0x26d   : > { %v10618_v45 = vpop.f32.mrf.mxu1  ;;  %10917 = vmatmul.mubr.msk.f32.gmra.mxu1 %vm322_vm1, %v13633_v19  ;;  %10969 = vmatprep.mubr.msk.f32.mxu0 %vm322_vm1, %v5122_v61  ;;  %v6027_v28 = vld [vmem:[%s11404_s25 + $0x3d] sm:$0xff] }
 0x26e   : > { %v13870_v4 = vadd.f32 %v4217_v55, %v4002_v16  ;;  %v4005_v39 = vadd.f32 %v10618_v45, %v13635_v51  ;;  %10919 = vmatprep.mubr.msk.f32.mxu1 %vm322_vm1, %v5120_v58  ;;  %v4227_v0 = vpop.f32.mrf.mxu0  ;;  %v6026_v58 = vld [vmem:[%s11404_s25 + $0x35] sm:$0xff]  ;;  %v13919_v61 = vld [vmem:[%s11404_s25 + $0x7d] sm:$0xff] }
 0x26f   : > { %v3957_v18 = vpop.f32.mrf.mxu1 }
 0x270   : > { %v13878_v2 = vadd.f32 %v10668_v26, %v4005_v39  ;;  %v4004_v19 = vadd.f32 %v3957_v18, %v13641_v12  ;;  %v10671_v42 = vpop.f32.mrf.mxu0  ;;  %10970 = vmatmul.mubr.msk.f32.gmra.mxu0 %vm322_vm1, %v5123_v21  ;;  %v13940_v18 = vld [vmem:[%s11404_s25 + $0x95] sm:$0xff] }
 0x271   : > { %v10621_v54 = vpop.f32.mrf.mxu1  ;;  %10920 = vmatmul.mubr.msk.f32.gmra.mxu1 %vm322_vm1, %v5121_v40  ;;  %11024 = vmatprep.mubr.msk.f32.mxu0 %vm322_vm1, %v6028_v50  ;;  %v6031_v40 = vld [vmem:[%s11404_s25 + $0x6d] sm:$0xff] }
 0x272   : > { %v13883_v51 = vadd.f32 %v4227_v0, %v4004_v19  ;;  %v4007_v53 = vadd.f32 %v10621_v54, %v13648_v56  ;;  %10974 = vmatprep.mubr.msk.f32.mxu1 %vm322_vm1, %v6024_v15  ;;  %v4237_v12 = vpop.f32.mrf.mxu0  ;;  %v13900_v56 = vld [vmem:[%s15130_s1 + $0x3c] sm:$0xf] }
 0x273   : > { %v3967_v35 = vpop.f32.mrf.mxu1 }
 0x274   : > { %v13890_v20 = vadd.f32 %v10671_v42, %v4007_v53  ;;  %v4006_v43 = vadd.f32 %v3967_v35, %v13665_v24  ;;  %v10726_v38 = vpop.f32.mrf.mxu0  ;;  %11025 = vmatmul.mubr.msk.f32.vlgmr.msra.gmra.mxu0 %vm322_vm1, %v6029_v9  ;;  %v13955_v42 = vld [vmem:[%s11404_s25 + $0x9d] sm:$0xff] }
 0x275   : > { %v10676_v63 = vpop.f32.mrf.mxu1  ;;  %10975 = vmatmul.mubr.msk.f32.vlgmr.msra.gmra.mxu1 %vm322_vm1, %v6025_v31  ;;  %11123 = vmatpush3.msk.msra.mxu0 %vm419_vm0, %v13663_v34  ;;  %v13958_v31 = vld [vmem:[%s11404_s25 + $0xad] sm:$0xff] }
 0x276   : > { %v13907_v24 = vadd.f32 %v4237_v12, %v4006_v43  ;;  %v4517_v6 = vadd.f32 %v10676_v63, %v13676_v27  ;;  %11073 = vmatpush3.msk.msra.mxu1 %vm419_vm0, %v13658_v41  ;;  %v4627_v55 = vpop.f32.mrf.mxu0  ;;  %10977 = vmatprep.mubr.msk.f32.mxu1 %vm322_vm1, %v6026_v58 }
 0x277   : > { %v4357_v46 = vpop.f32.mrf.mxu1  ;;  %11027 = vmatprep.mubr.msk.f32.mxu0 %vm322_vm1, %v6030_v5  ;;  %11172 = vmatprep.subr.msk.mxu1 %vm419_vm0, %v13900_v56 }
 0x278   : > { %v13921_v16 = vadd.f32 %v10726_v38, %v4517_v6  ;;  %v4516_v27 = vadd.f32 %v4357_v46, %v13687_v3  ;;  %11222 = vmatprep.subr.msk.mxu0 %vm419_vm0, %v13905_v33  ;;  %v10729_v34 = vpop.f32.mrf.mxu0  ;;  %11028 = vmatmul.mubr.msk.f32.gmra.mxu0 %vm322_vm1, %v6031_v40  ;;  %v13937_v3 = vld [vmem:[%s11404_s25 + $0x85] sm:$0xff] }
 0x279   : > { %v10679_v41 = vpop.f32.mrf.mxu1  ;;  %10978 = vmatmul.mubr.msk.f32.gmra.mxu1 %vm322_vm1, %v6027_v28  ;;  %11030 = vmatprep.mubr.msk.f32.mxu0 %vm322_vm1, %v13919_v61  ;;  %v13977_v38 = vld [vmem:[%s11404_s25 + $0xc5] sm:$0xff] }
 0x27a   : > { %v13930_v45 = vadd.f32 %v4627_v55, %v4516_v27  ;;  %v4519_v26 = vadd.f32 %v10679_v41, %v13694_v23  ;;  %10980 = vmatprep.mubr.msk.f32.mxu1 %vm322_vm1, %v6028_v50  ;;  %v4637_v21 = vpop.f32.mrf.mxu0 }
 0x27b   : > { %v4367_v39 = vpop.f32.mrf.mxu1 }
 0x27c   : > { %v13942_v0 = vadd.f32 %v10729_v34, %v4519_v26  ;;  %v4518_v15 = vadd.f32 %v4367_v39, %v13701_v13  ;;  %v10732_v54 = vpop.f32.mrf.mxu0  ;;  %11031 = vmatmul.mubr.msk.f32.gmra.mxu0 %vm322_vm1, %v13937_v3  ;;  %v13997_v34 = vld [vmem:[%s11404_s25 + $0xdd] sm:$0xff] }
 0x27d   : > { %v10682_v19 = vpop.f32.mrf.mxu1  ;;  %10981 = vmatmul.mubr.msk.f32.gmra.mxu1 %vm322_vm1, %v6029_v9  ;;  %11033 = vmatprep.mubr.msk.f32.mxu0 %vm322_vm1, %v13940_v18 }
 0x27e   : > { %v13948_v23 = vadd.f32 %v4637_v21, %v4518_v15  ;;  %v4521_v50 = vadd.f32 %v10682_v19, %v13708_v11  ;;  %10983 = vmatprep.mubr.msk.f32.mxu1 %vm322_vm1, %v6030_v5  ;;  %v4647_v53 = vpop.f32.mrf.mxu0  ;;  %v13974_v5 = vld [vmem:[%s11404_s25 + $0xb5] sm:$0xff] }
 0x27f   : > { %v4377_v13 = vpop.f32.mrf.mxu1 }
 0x280   : > { %v13960_v9 = vadd.f32 %v10732_v54, %v4521_v50  ;;  %v4520_v35 = vadd.f32 %v4377_v13, %v13715_v48  ;;  %v10735_v43 = vpop.f32.mrf.mxu0  ;;  %11034 = vmatmul.mubr.msk.f32.gmra.mxu0 %vm322_vm1, %v13955_v42  ;;  %v14017_v13 = vld [vmem:[%s11404_s25 + $0xf5] sm:$0xff] }
 0x281   : > { %v10685_v12 = vpop.f32.mrf.mxu1  ;;  %10984 = vmatmul.mubr.msk.f32.gmra.mxu1 %vm322_vm1, %v6031_v40  ;;  %11036 = vmatprep.mubr.msk.f32.mxu0 %vm322_vm1, %v13958_v31 }
 0x282   : > { %v13966_v11 = vadd.f32 %v4647_v53, %v4520_v35  ;;  %v4523_v58 = vadd.f32 %v10685_v12, %v13722_v52  ;;  %10986 = vmatprep.mubr.msk.f32.mxu1 %vm322_vm1, %v13919_v61  ;;  %v4657_v63 = vpop.f32.mrf.mxu0 }
 0x283   : > { %v4387_v48 = vpop.f32.mrf.mxu1 }
 0x284   : > { %v13979_v6 = vadd.f32 %v10735_v43, %v4523_v58  ;;  %v4522_v28 = vadd.f32 %v4387_v48, %v13729_v17  ;;  %v10738_v52 = vpop.f32.mrf.mxu0  ;;  %11037 = vmatmul.mubr.msk.f32.gmra.mxu0 %vm322_vm1, %v13974_v5  ;;  %v13994_v17 = vld [vmem:[%s11404_s25 + $0xcd] sm:$0xff] }
 0x285   : > { %v10688_v40 = vpop.f32.mrf.mxu1  ;;  %10987 = vmatmul.mubr.msk.f32.gmra.mxu1 %vm322_vm1, %v13937_v3  ;;  %11039 = vmatprep.mubr.msk.f32.mxu0 %vm322_vm1, %v13977_v38 }
 0x286   : > { %v13986_v46 = vadd.f32 %v4657_v63, %v4522_v28  ;;  %v4525_v55 = vadd.f32 %v10688_v40, %v13736_v47  ;;  %10989 = vmatprep.mubr.msk.f32.mxu1 %vm322_vm1, %v13940_v18  ;;  %v4667_v41 = vpop.f32.mrf.mxu0  ;;  %v14037_v28 = vld [vmem:[%s11404_s25 + $0x10d] sm:$0xff] }
 0x287   : > { %v4397_v27 = vpop.f32.mrf.mxu1 }
 0x288   : > { %v13999_v26 = vadd.f32 %v10738_v52, %v4525_v55  ;;  %v4524_v39 = vadd.f32 %v4397_v27, %v13743_v1  ;;  %v10741_v47 = vpop.f32.mrf.mxu0  ;;  %11040 = vmatmul.mubr.msk.f32.gmra.mxu0 %vm322_vm1, %v13994_v17  ;;  %v14014_v1 = vld [vmem:[%s11404_s25 + $0xe5] sm:$0xff] }
 0x289   : > { %v10691_v21 = vpop.f32.mrf.mxu1  ;;  %10990 = vmatmul.mubr.msk.f32.gmra.mxu1 %vm322_vm1, %v13955_v42  ;;  %11042 = vmatprep.mubr.msk.f32.mxu0 %vm322_vm1, %v13997_v34 }
 0x28a   : > { %v14006_v15 = vadd.f32 %v4667_v41, %v4524_v39  ;;  %v4527_v19 = vadd.f32 %v10691_v21, %v13750_v37  ;;  %10992 = vmatprep.mubr.msk.f32.mxu1 %vm322_vm1, %v13958_v31  ;;  %v4677_v50 = vpop.f32.mrf.mxu0 }
 0x28b   : > { %v4407_v54 = vpop.f32.mrf.mxu1 }
 0x28c   : > { %v14019_v53 = vadd.f32 %v10741_v47, %v4527_v19  ;;  %v4526_v35 = vadd.f32 %v4407_v54, %v13757_v57  ;;  %v10744_v37 = vpop.f32.mrf.mxu0  ;;  %11043 = vmatmul.mubr.msk.f32.gmra.mxu0 %vm322_vm1, %v14014_v1  ;;  %v14034_v57 = vld [vmem:[%s11404_s25 + $0xfd] sm:$0xff]  ;;  %v14057_v47 = vld [vmem:[%s11404_s25 + $0x125] sm:$0xff] }
 0x28d   : > { %v10694_v12 = vpop.f32.mrf.mxu1  ;;  %10993 = vmatmul.mubr.msk.f32.gmra.mxu1 %vm322_vm1, %v13974_v5  ;;  %11045 = vmatprep.mubr.msk.f32.mxu0 %vm322_vm1, %v14017_v13 }
 0x28e   : > { %v14026_v43 = vadd.f32 %v4677_v50, %v4526_v35  ;;  %v4529_v58 = vadd.f32 %v10694_v12, %v13764_v10  ;;  %10995 = vmatprep.mubr.msk.f32.mxu1 %vm322_vm1, %v13977_v38  ;;  %v4687_v63 = vpop.f32.mrf.mxu0 }
 0x28f   : > { %v4417_v48 = vpop.f32.mrf.mxu1 }
 0x290   : > { %v14039_v40 = vadd.f32 %v10744_v37, %v4529_v58  ;;  %v4528_v52 = vadd.f32 %v4417_v48, %v13771_v29  ;;  %v10747_v10 = vpop.f32.mrf.mxu0  ;;  %11046 = vmatmul.mubr.msk.f32.gmra.mxu0 %vm322_vm1, %v14034_v57  ;;  %v14054_v29 = vld [vmem:[%s11404_s25 + $0x115] sm:$0xff]  ;;  %v14077_v48 = vld [vmem:[%s11404_s25 + $0x13d] sm:$0xff] }
 0x291   : > { %v10697_v55 = vpop.f32.mrf.mxu1  ;;  %10996 = vmatmul.mubr.msk.f32.gmra.mxu1 %vm322_vm1, %v13994_v17  ;;  %11048 = vmatprep.mubr.msk.f32.mxu0 %vm322_vm1, %v14037_v28 }
 0x292   : > { %v14046_v27 = vadd.f32 %v4687_v63, %v4528_v52  ;;  %v4531_v41 = vadd.f32 %v10697_v55, %v13778_v14  ;;  %10998 = vmatprep.mubr.msk.f32.mxu1 %vm322_vm1, %v13997_v34  ;;  %v4697_v21 = vpop.f32.mrf.mxu0 }
 0x293   : > { %v4427_v39 = vpop.f32.mrf.mxu1 }
 0x294   : > { %v14059_v19 = vadd.f32 %v10747_v10, %v4531_v41  ;;  %v4530_v54 = vadd.f32 %v4427_v39, %v13785_v22  ;;  %v10750_v14 = vpop.f32.mrf.mxu0  ;;  %11049 = vmatmul.mubr.msk.f32.gmra.mxu0 %vm322_vm1, %v14054_v29  ;;  %v14074_v22 = vld [vmem:[%s11404_s25 + $0x12d] sm:$0xff] }
 0x295   : > { %v10700_v50 = vpop.f32.mrf.mxu1  ;;  %10999 = vmatmul.mubr.msk.f32.gmra.mxu1 %vm322_vm1, %v14014_v1  ;;  %11051 = vmatprep.mubr.msk.f32.mxu0 %vm322_vm1, %v14057_v47 }
 0x296   : > { %v14066_v35 = vadd.f32 %v4697_v21, %v4530_v54  ;;  %v4533_v12 = vadd.f32 %v10700_v50, %v13792_v8  ;;  %11001 = vmatprep.mubr.msk.f32.mxu1 %vm322_vm1, %v14017_v13  ;;  %v4707_v58 = vpop.f32.mrf.mxu0  ;;  %v14097_v54 = vld [vmem:[%s11404_s25 + $0x155] sm:$0xff] }
 0x297   : > { %v4437_v37 = vpop.f32.mrf.mxu1 }
 0x298   : > { %v14079_v63 = vadd.f32 %v10750_v14, %v4533_v12  ;;  %v4532_v52 = vadd.f32 %v4437_v37, %v13799_v7  ;;  %v10753_v8 = vpop.f32.mrf.mxu0  ;;  %11052 = vmatmul.mubr.msk.f32.gmra.mxu0 %vm322_vm1, %v14074_v22  ;;  %v14094_v7 = vld [vmem:[%s11404_s25 + $0x145] sm:$0xff] }
 0x299   : > { %v10703_v55 = vpop.f32.mrf.mxu1  ;;  %11002 = vmatmul.mubr.msk.f32.gmra.mxu1 %vm322_vm1, %v14034_v57  ;;  %11054 = vmatprep.mubr.msk.f32.mxu0 %vm322_vm1, %v14077_v48 }
 0x29a   : > { %v14086_v10 = vadd.f32 %v4707_v58, %v4532_v52  ;;  %v4535_v41 = vadd.f32 %v10703_v55, %v13806_v59  ;;  %11004 = vmatprep.mubr.msk.f32.mxu1 %vm322_vm1, %v14037_v28  ;;  %v4717_v21 = vpop.f32.mrf.mxu0 }
 0x29b   : > { %v4447_v39 = vpop.f32.mrf.mxu1 }
 0x29c   : > { %v14099_v50 = vadd.f32 %v10753_v8, %v4535_v41  ;;  %v4534_v14 = vadd.f32 %v4447_v39, %v13813_v25  ;;  %v10756_v59 = vpop.f32.mrf.mxu0  ;;  %11055 = vmatmul.mubr.msk.f32.gmra.mxu0 %vm322_vm1, %v14094_v7  ;;  %v14114_v25 = vld [vmem:[%s11404_s25 + $0x15d] sm:$0xff]  ;;  %v14117_v8 = vld [vmem:[%s11404_s25 + $0x16d] sm:$0xff] }
 0x29d   : > { %v10706_v12 = vpop.f32.mrf.mxu1  ;;  %11005 = vmatmul.mubr.msk.f32.gmra.mxu1 %vm322_vm1, %v14054_v29  ;;  %11057 = vmatprep.mubr.msk.f32.mxu0 %vm322_vm1, %v14097_v54 }
 0x29e   : > { %v14106_v37 = vadd.f32 %v4717_v21, %v4534_v14  ;;  %v4537_v58 = vadd.f32 %v10706_v12, %v13820_v62  ;;  %11007 = vmatprep.mubr.msk.f32.mxu1 %vm322_vm1, %v14057_v47  ;;  %v4727_v55 = vpop.f32.mrf.mxu0 }
 0x29f   : > { %v4457_v52 = vpop.f32.mrf.mxu1 }
 0x2a0   : > { %v14119_v41 = vadd.f32 %v10756_v59, %v4537_v58  ;;  %v4536_v39 = vadd.f32 %v4457_v52, %v13827_v44  ;;  %v10759_v62 = vpop.f32.mrf.mxu0  ;;  %11058 = vmatmul.mubr.msk.f32.gmra.mxu0 %vm322_vm1, %v14114_v25  ;;  %v14134_v44 = vld [vmem:[%s11404_s25 + $0x175] sm:$0xff]  ;;  %v14137_v52 = vld [vmem:[%s11404_s25 + $0x185] sm:$0xff] }
 0x2a1   : > { %v10709_v21 = vpop.f32.mrf.mxu1  ;;  %11008 = vmatmul.mubr.msk.f32.gmra.mxu1 %vm322_vm1, %v14074_v22  ;;  %11060 = vmatprep.mubr.msk.f32.mxu0 %vm322_vm1, %v14117_v8 }
 0x2a2   : > { %15229 = vst [vmem:[#allocation12_spill] sm:$0xff] %v14119_v41  ;;  %v14126_v14 = vadd.f32 %v4727_v55, %v4536_v39  ;;  %v4539_v12 = vadd.f32 %v10709_v21, %v13834_v36  ;;  %11010 = vmatprep.mubr.msk.f32.mxu1 %vm322_vm1, %v14077_v48  ;;  %v4737_v58 = vpop.f32.mrf.mxu0 }
 0x2a3   : > { %v4467_v59 = vpop.f32.mrf.mxu1 }
 0x2a4   : > { %15230 = vst [vmem:[#allocation13_spill] sm:$0xff] %v14126_v14  ;;  %v14139_v41 = vadd.f32 %v10759_v62, %v4539_v12  ;;  %v4538_v55 = vadd.f32 %v4467_v59, %v13841_v30  ;;  %v10762_v36 = vpop.f32.mrf.mxu0  ;;  %11061 = vmatmul.mubr.msk.f32.gmra.mxu0 %vm322_vm1, %v14134_v44  ;;  %v14154_v30 = vld [vmem:[%s11404_s25 + $0x18d] sm:$0xff]  ;;  %v14157_v59 = vld [vmem:[%s11404_s25 + $0x19d] sm:$0xff] }
 0x2a5   : > { %v10712_v39 = vpop.f32.mrf.mxu1  ;;  %11011 = vmatmul.mubr.msk.f32.gmra.mxu1 %vm322_vm1, %v14094_v7  ;;  %11063 = vmatprep.mubr.msk.f32.mxu0 %vm322_vm1, %v14137_v52 }
 0x2a6   : > { %15231 = vst [vmem:[#allocation15_spill] sm:$0xff] %v14139_v41  ;;  %v14146_v21 = vadd.f32 %v4737_v58, %v4538_v55  ;;  %v4541_v14 = vadd.f32 %v10712_v39, %v13849_v49  ;;  %11013 = vmatprep.mubr.msk.f32.mxu1 %vm322_vm1, %v14097_v54  ;;  %v4747_v12 = vpop.f32.mrf.mxu0 }
 0x2a7   : > { %v4477_v62 = vpop.f32.mrf.mxu1 }
 0x2a8   : > { %15232 = vst [vmem:[#allocation6_spill] sm:$0xff] %v14146_v21  ;;  %v14159_v41 = vadd.f32 %v10762_v36, %v4541_v14  ;;  %v4540_v58 = vadd.f32 %v4477_v62, %v13856_v60  ;;  %v10765_v49 = vpop.f32.mrf.mxu0  ;;  %11064 = vmatmul.mubr.msk.f32.gmra.mxu0 %vm322_vm1, %v14154_v30  ;;  %v14174_v60 = vld [vmem:[%s11404_s25 + $0x1a5] sm:$0xff]  ;;  %v14177_v62 = vld [vmem:[%s11404_s25 + $0x1b5] sm:$0xff] }
 0x2a9   : > { %v10715_v55 = vpop.f32.mrf.mxu1  ;;  %11014 = vmatmul.mubr.msk.f32.gmra.mxu1 %vm322_vm1, %v14114_v25  ;;  %11066 = vmatprep.mubr.msk.f32.mxu0 %vm322_vm1, %v14157_v59  ;;  %15235 = vst [vmem:[#allocation7_spill] sm:$0xff] %v14177_v62 }
 0x2aa   : > { %15233 = vst [vmem:[#allocation3_spill] sm:$0xff] %v14159_v41  ;;  %v14166_v39 = vadd.f32 %v4747_v12, %v4540_v58  ;;  %v4543_v21 = vadd.f32 %v10715_v55, %v13864_v32  ;;  %11016 = vmatprep.mubr.msk.f32.mxu1 %vm322_vm1, %v14117_v8  ;;  %v4757_v36 = vpop.f32.mrf.mxu0 }
 0x2ab   : > { %v4487_v14 = vpop.f32.mrf.mxu1 }
 0x2ac   : > { %15234 = vst [vmem:[#allocation4_spill] sm:$0xff] %v14166_v39  ;;  %v14179_v41 = vadd.f32 %v10765_v49, %v4543_v21  ;;  %v4542_v12 = vadd.f32 %v4487_v14, %v13870_v4  ;;  %v10768_v32 = vpop.f32.mrf.mxu0  ;;  %11067 = vmatmul.mubr.msk.f32.gmra.mxu0 %vm322_vm1, %v14174_v60  ;;  %v14194_v4 = vld [vmem:[%s11404_s25 + $0x1bd] sm:$0xff]  ;;  %v6976_v14 = vld [vmem:[%s11404_s25 + $0x6] sm:$0xff] }
 0x2ad   : > { %v10718_v58 = vpop.f32.mrf.mxu1  ;;  %11017 = vmatmul.mubr.msk.f32.gmra.mxu1 %vm322_vm1, %v14134_v44  ;;  %11069 = vmatprep.mubr.msk.f32.mxu0 %vm322_vm1, %v14177_v62  ;;  %15238 = vst [vmem:[#allocation9_spill] sm:$0xff] %v14194_v4  ;;  %v6978_v62 = vld [vmem:[%s11404_s25 + $0x1e] sm:$0xff] }
 0x2ae   : > { %15236 = vst [vmem:[#allocation14_spill] sm:$0xff] %v14179_v41  ;;  %v14186_v55 = vadd.f32 %v4757_v36, %v4542_v12  ;;  %v4545_v39 = vadd.f32 %v10718_v58, %v13878_v2  ;;  %11019 = vmatprep.mubr.msk.f32.mxu1 %vm322_vm1, %v14137_v52  ;;  %v4767_v49 = vpop.f32.mrf.mxu0 }
 0x2af   : > { %v4497_v21 = vpop.f32.mrf.mxu1 }
 0x2b0   : > { %15237 = vst [vmem:[#allocation5_spill] sm:$0xff] %v14186_v55  ;;  %v14197_v41 = vadd.f32 %v10768_v32, %v4545_v39  ;;  %v4544_v36 = vadd.f32 %v4497_v21, %v13883_v51  ;;  %v10771_v55 = vpop.f32.mrf.mxu0  ;;  %11070 = vmatmul.mubr.msk.f32.gmra.mxu0 %vm322_vm1, %v14194_v4  ;;  %v6977_v39 = vld [vmem:[%s11404_s25 + $0xe] sm:$0xff] }
 0x2b1   : > { %v10721_v12 = vpop.f32.mrf.mxu1  ;;  %11020 = vmatmul.mubr.msk.f32.gmra.mxu1 %vm322_vm1, %v14154_v30  ;;  %11124 = vmatprep.mubr.msk.f32.mxu0 %vm322_vm1, %v6976_v14 }
 0x2b2   : > { %15239 = vst [vmem:[#allocation10_spill] sm:$0xff] %v14197_v41  ;;  %v14204_v2 = vadd.f32 %v4767_v49, %v4544_v36  ;;  %v4547_v58 = vadd.f32 %v10721_v12, %v13890_v20  ;;  %11074 = vmatprep.mubr.msk.f32.mxu1 %vm322_vm1, %v13919_v61  ;;  %v4777_v32 = vpop.f32.mrf.mxu0  ;;  %v14244_v12 = vld [vmem:[%s11404_s25 + $0x4e] sm:$0xff] }
 0x2b3   : > { %v4507_v51 = vpop.f32.mrf.mxu1 }
 0x2b4   : > { %v14211_v21 = vadd.f32 %v10771_v55, %v4547_v58  ;;  %v4546_v41 = vadd.f32 %v4507_v51, %v13907_v24  ;;  %v10826_v49 = vpop.f32.mrf.mxu0  ;;  %11125 = vmatmul.mubr.msk.f32.vlgmr.msra.gmra.mxu0 %vm322_vm1, %v6977_v39  ;;  %v6979_v55 = vld [vmem:[%s11404_s25 + $0x26] sm:$0xff] }
 0x2b5   : > { %v10776_v4 = vpop.f32.mrf.mxu1  ;;  %11075 = vmatmul.mubr.msk.f32.vlgmr.msra.gmra.mxu1 %vm322_vm1, %v13937_v3  ;;  %11223 = vmatpush3.msk.msra.mxu0 %vm419_vm0, %v13905_v33  ;;  %v6980_v3 = vld [vmem:[%s11404_s25 + $0x36] sm:$0xff] }
 0x2b6   : > { %v14218_v20 = vadd.f32 %v4777_v32, %v4546_v41  ;;  %v5057_v61 = vadd.f32 %v10776_v4, %v13921_v16  ;;  %11173 = vmatpush3.msk.msra.mxu1 %vm419_vm0, %v13900_v56  ;;  %v5293_v14 = vpop.f32.mrf.mxu0  ;;  %11077 = vmatprep.mubr.msk.f32.mxu1 %vm322_vm1, %v13940_v18  ;;  %v6981_v18 = vld [vmem:[%s11404_s25 + $0x3e] sm:$0xff]  ;;  %v14260_v32 = vld [vmem:[%s11404_s25 + $0x56] sm:$0xff] }
 0x2b7   : > { %v4897_v24 = vpop.f32.mrf.mxu1  ;;  %11127 = vmatprep.mubr.msk.f32.mxu0 %vm322_vm1, %v6978_v62 }
 0x2b8   : > { %v14230_v41 = vadd.f32 %v10826_v49, %v5057_v61  ;;  %v5056_v16 = vadd.f32 %v4897_v24, %v13930_v45  ;;  %v10829_v56 = vpop.f32.mrf.mxu0  ;;  %11128 = vmatmul.mubr.msk.f32.gmra.mxu0 %vm322_vm1, %v6979_v55  ;;  %v14263_v61 = vld [vmem:[%s11404_s25 + $0x66] sm:$0xff] }
 0x2b9   : > { %v10779_v4 = vpop.f32.mrf.mxu1  ;;  %11078 = vmatmul.mubr.msk.f32.gmra.mxu1 %vm322_vm1, %v13955_v42  ;;  %11130 = vmatprep.mubr.msk.f32.mxu0 %vm322_vm1, %v6980_v3 }
 0x2ba   : > { %v14236_v33 = vadd.f32 %v5293_v14, %v5056_v16  ;;  %v5059_v36 = vadd.f32 %v10779_v4, %v13942_v0  ;;  %11080 = vmatprep.mubr.msk.f32.mxu1 %vm322_vm1, %v13958_v31  ;;  %v5303_v45 = vpop.f32.mrf.mxu0 }
 0x2bb   : > { %v4907_v62 = vpop.f32.mrf.mxu1 }
 0x2bc   : > { %v14246_v58 = vadd.f32 %v10829_v56, %v5059_v36  ;;  %v5058_v42 = vadd.f32 %v4907_v62, %v13948_v23  ;;  %v10832_v51 = vpop.f32.mrf.mxu0  ;;  %11131 = vmatmul.mubr.msk.f32.gmra.mxu0 %vm322_vm1, %v6981_v18 }
 0x2bd   : > { %v10782_v39 = vpop.f32.mrf.mxu1  ;;  %11081 = vmatmul.mubr.msk.f32.gmra.mxu1 %vm322_vm1, %v13974_v5  ;;  %11133 = vmatprep.mubr.msk.f32.mxu0 %vm322_vm1, %v14244_v12 }
 0x2be   : > { %v14252_v0 = vadd.f32 %v5303_v45, %v5058_v42  ;;  %v5061_v31 = vadd.f32 %v10782_v39, %v13960_v9  ;;  %11083 = vmatprep.mubr.msk.f32.mxu1 %vm322_vm1, %v13977_v38  ;;  %v5313_v49 = vpop.f32.mrf.mxu0 }
 0x2bf   : > { %v4917_v23 = vpop.f32.mrf.mxu1 }
 0x2c0   : > { %v14265_v5 = vadd.f32 %v10832_v51, %v5061_v31  ;;  %v5060_v55 = vadd.f32 %v4917_v23, %v13966_v11  ;;  %v10835_v9 = vpop.f32.mrf.mxu0  ;;  %11134 = vmatmul.mubr.msk.f32.gmra.mxu0 %vm322_vm1, %v14260_v32  ;;  %v14280_v11 = vld [vmem:[%s11404_s25 + $0x6e] sm:$0xff] }
 0x2c1   : > { %v10785_v24 = vpop.f32.mrf.mxu1  ;;  %11084 = vmatmul.mubr.msk.f32.gmra.mxu1 %vm322_vm1, %v13994_v17  ;;  %11136 = vmatprep.mubr.msk.f32.mxu0 %vm322_vm1, %v14263_v61  ;;  %v14283_v17 = vld [vmem:[%s11404_s25 + $0x7e] sm:$0xff] }
 0x2c2   : > { %v14272_v38 = vadd.f32 %v5313_v49, %v5060_v55  ;;  %v5063_v14 = vadd.f32 %v10785_v24, %v13979_v6  ;;  %11086 = vmatprep.mubr.msk.f32.mxu1 %vm322_vm1, %v13997_v34  ;;  %v5323_v16 = vpop.f32.mrf.mxu0 }
 0x2c3   : > { %v4927_v3 = vpop.f32.mrf.mxu1 }
 0x2c4   : > { %v14285_v4 = vadd.f32 %v10835_v9, %v5063_v14  ;;  %v5062_v56 = vadd.f32 %v4927_v3, %v13986_v46  ;;  %v10838_v6 = vpop.f32.mrf.mxu0  ;;  %11137 = vmatmul.mubr.msk.f32.gmra.mxu0 %vm322_vm1, %v14280_v11  ;;  %v14300_v46 = vld [vmem:[%s11404_s25 + $0x86] sm:$0xff] }
 0x2c5   : > { %v10788_v36 = vpop.f32.mrf.mxu1  ;;  %11087 = vmatmul.mubr.msk.f32.gmra.mxu1 %vm322_vm1, %v14014_v1  ;;  %11139 = vmatprep.mubr.msk.f32.mxu0 %vm322_vm1, %v14283_v17  ;;  %v14303_v1 = vld [vmem:[%s11404_s25 + $0x96] sm:$0xff] }
 0x2c6   : > { %v14292_v34 = vadd.f32 %v5323_v16, %v5062_v56  ;;  %v5065_v18 = vadd.f32 %v10788_v36, %v13999_v26  ;;  %11089 = vmatprep.mubr.msk.f32.mxu1 %vm322_vm1, %v14017_v13  ;;  %v5333_v45 = vpop.f32.mrf.mxu0 }
 0x2c7   : > { %v4937_v62 = vpop.f32.mrf.mxu1 }
 0x2c8   : > { %v14305_v42 = vadd.f32 %v10838_v6, %v5065_v18  ;;  %v5064_v39 = vadd.f32 %v4937_v62, %v14006_v15  ;;  %v10841_v26 = vpop.f32.mrf.mxu0  ;;  %11140 = vmatmul.mubr.msk.f32.gmra.mxu0 %vm322_vm1, %v14300_v46  ;;  %v14320_v15 = vld [vmem:[%s11404_s25 + $0x9e] sm:$0xff] }
 0x2c9   : > { %v10791_v51 = vpop.f32.mrf.mxu1  ;;  %11090 = vmatmul.mubr.msk.f32.gmra.mxu1 %vm322_vm1, %v14034_v57  ;;  %11142 = vmatprep.mubr.msk.f32.mxu0 %vm322_vm1, %v14303_v1  ;;  %v14323_v57 = vld [vmem:[%s11404_s25 + $0xae] sm:$0xff] }
 0x2ca   : > { %v14312_v13 = vadd.f32 %v5333_v45, %v5064_v39  ;;  %v5067_v31 = vadd.f32 %v10791_v51, %v14019_v53  ;;  %11092 = vmatprep.mubr.msk.f32.mxu1 %vm322_vm1, %v14037_v28  ;;  %v5343_v49 = vpop.f32.mrf.mxu0 }
 0x2cb   : > { %v4947_v23 = vpop.f32.mrf.mxu1 }
 0x2cc   : > { %v14325_v55 = vadd.f32 %v10841_v26, %v5067_v31  ;;  %v5066_v24 = vadd.f32 %v4947_v23, %v14026_v43  ;;  %v10844_v53 = vpop.f32.mrf.mxu0  ;;  %11143 = vmatmul.mubr.msk.f32.gmra.mxu0 %vm322_vm1, %v14320_v15  ;;  %v14340_v43 = vld [vmem:[%s11404_s25 + $0xb6] sm:$0xff] }
 0x2cd   : > { %v10794_v9 = vpop.f32.mrf.mxu1  ;;  %11093 = vmatmul.mubr.msk.f32.gmra.mxu1 %vm322_vm1, %v14054_v29  ;;  %11145 = vmatprep.mubr.msk.f32.mxu0 %vm322_vm1, %v14323_v57  ;;  %v14343_v29 = vld [vmem:[%s11404_s25 + $0xc6] sm:$0xff] }
 0x2ce   : > { %v14332_v28 = vadd.f32 %v5343_v49, %v5066_v24  ;;  %v5069_v14 = vadd.f32 %v10794_v9, %v14039_v40  ;;  %11095 = vmatprep.mubr.msk.f32.mxu1 %vm322_vm1, %v14057_v47  ;;  %v5353_v16 = vpop.f32.mrf.mxu0 }
 0x2cf   : > { %v4957_v3 = vpop.f32.mrf.mxu1 }
 0x2d0   : > { %v14345_v56 = vadd.f32 %v10844_v53, %v5069_v14  ;;  %v5068_v36 = vadd.f32 %v4957_v3, %v14046_v27  ;;  %v10847_v40 = vpop.f32.mrf.mxu0  ;;  %11146 = vmatmul.mubr.msk.f32.gmra.mxu0 %vm322_vm1, %v14340_v43  ;;  %v14360_v27 = vld [vmem:[%s11404_s25 + $0xce] sm:$0xff] }
 0x2d1   : > { %v10797_v6 = vpop.f32.mrf.mxu1  ;;  %11096 = vmatmul.mubr.msk.f32.gmra.mxu1 %vm322_vm1, %v14074_v22  ;;  %11148 = vmatprep.mubr.msk.f32.mxu0 %vm322_vm1, %v14343_v29  ;;  %v14363_v22 = vld [vmem:[%s11404_s25 + $0xde] sm:$0xff] }
 0x2d2   : > { %v14352_v47 = vadd.f32 %v5353_v16, %v5068_v36  ;;  %v5071_v18 = vadd.f32 %v10797_v6, %v14059_v19  ;;  %11098 = vmatprep.mubr.msk.f32.mxu1 %vm322_vm1, %v14077_v48  ;;  %v5363_v45 = vpop.f32.mrf.mxu0 }
 0x2d3   : > { %v4967_v62 = vpop.f32.mrf.mxu1 }
 0x2d4   : > { %v14365_v39 = vadd.f32 %v10847_v40, %v5071_v18  ;;  %v5070_v51 = vadd.f32 %v4967_v62, %v14066_v35  ;;  %v10850_v19 = vpop.f32.mrf.mxu0  ;;  %11149 = vmatmul.mubr.msk.f32.gmra.mxu0 %vm322_vm1, %v14360_v27  ;;  %v14380_v35 = vld [vmem:[%s11404_s25 + $0xe6] sm:$0xff] }
 0x2d5   : > { %v10800_v26 = vpop.f32.mrf.mxu1  ;;  %11099 = vmatmul.mubr.msk.f32.gmra.mxu1 %vm322_vm1, %v14094_v7  ;;  %11151 = vmatprep.mubr.msk.f32.mxu0 %vm322_vm1, %v14363_v22  ;;  %v14383_v7 = vld [vmem:[%s11404_s25 + $0xf6] sm:$0xff]  ;;  %v15240_v18 = vld [vmem:[#allocation12_spill] sm:$0xff] }
 0x2d6   : > { %v14372_v48 = vadd.f32 %v5363_v45, %v5070_v51  ;;  %v5073_v31 = vadd.f32 %v10800_v26, %v14079_v63  ;;  %11101 = vmatprep.mubr.msk.f32.mxu1 %vm322_vm1, %v14097_v54  ;;  %v5373_v49 = vpop.f32.mrf.mxu0 }
 0x2d7   : > { %v4977_v23 = vpop.f32.mrf.mxu1 }
 0x2d8   : > { %v14385_v24 = vadd.f32 %v10850_v19, %v5073_v31  ;;  %v5072_v9 = vadd.f32 %v4977_v23, %v14086_v10  ;;  %v10853_v63 = vpop.f32.mrf.mxu0  ;;  %11152 = vmatmul.mubr.msk.f32.gmra.mxu0 %vm322_vm1, %v14380_v35  ;;  %v14400_v10 = vld [vmem:[%s11404_s25 + $0xfe] sm:$0xff]  ;;  %v15242_v19 = vld [vmem:[#allocation13_spill] sm:$0xff] }
 0x2d9   : > { %v10803_v53 = vpop.f32.mrf.mxu1  ;;  %11102 = vmatmul.mubr.msk.f32.gmra.mxu1 %vm322_vm1, %v14114_v25  ;;  %11154 = vmatprep.mubr.msk.f32.mxu0 %vm322_vm1, %v14383_v7  ;;  %v14403_v25 = vld [vmem:[%s11404_s25 + $0x10e] sm:$0xff] }
 0x2da   : > { %v14392_v54 = vadd.f32 %v5373_v49, %v5072_v9  ;;  %v5075_v14 = vadd.f32 %v10803_v53, %v14099_v50  ;;  %11104 = vmatprep.mubr.msk.f32.mxu1 %vm322_vm1, %v14117_v8  ;;  %v5383_v16 = vpop.f32.mrf.mxu0  ;;  %v15244_v9 = vld [vmem:[#allocation15_spill] sm:$0xff] }
 0x2db   : > { %v4987_v3 = vpop.f32.mrf.mxu1 }
 0x2dc   : > { %v14405_v36 = vadd.f32 %v10853_v63, %v5075_v14  ;;  %v5074_v6 = vadd.f32 %v4987_v3, %v14106_v37  ;;  %v10856_v50 = vpop.f32.mrf.mxu0  ;;  %11155 = vmatmul.mubr.msk.f32.gmra.mxu0 %vm322_vm1, %v14400_v10  ;;  %v14420_v37 = vld [vmem:[%s11404_s25 + $0x116] sm:$0xff]  ;;  %v14440_v63 = vld [vmem:[%s11404_s25 + $0x12e] sm:$0xff] }
 0x2dd   : > { %v10806_v40 = vpop.f32.mrf.mxu1  ;;  %11105 = vmatmul.mubr.msk.f32.gmra.mxu1 %vm322_vm1, %v14134_v44  ;;  %11157 = vmatprep.mubr.msk.f32.mxu0 %vm322_vm1, %v14403_v25  ;;  %v14423_v44 = vld [vmem:[%s11404_s25 + $0x126] sm:$0xff] }
 0x2de   : > { %v14412_v8 = vadd.f32 %v5383_v16, %v5074_v6  ;;  %v5077_v62 = vadd.f32 %v10806_v40, %v15240_v18  ;;  %11107 = vmatprep.mubr.msk.f32.mxu1 %vm322_vm1, %v14137_v52  ;;  %v5393_v51 = vpop.f32.mrf.mxu0  ;;  %v15246_v6 = vld [vmem:[#allocation6_spill] sm:$0xff] }
 0x2df   : > { %v4997_v45 = vpop.f32.mrf.mxu1 }
 0x2e0   : > { %v14425_v26 = vadd.f32 %v10856_v50, %v5077_v62  ;;  %v5076_v31 = vadd.f32 %v4997_v45, %v15242_v19  ;;  %v10859_v49 = vpop.f32.mrf.mxu0  ;;  %11158 = vmatmul.mubr.msk.f32.gmra.mxu0 %vm322_vm1, %v14420_v37  ;;  %v15248_v62 = vld [vmem:[#allocation3_spill] sm:$0xff] }
 0x2e1   : > { %v10809_v23 = vpop.f32.mrf.mxu1  ;;  %11108 = vmatmul.mubr.msk.f32.gmra.mxu1 %vm322_vm1, %v14154_v30  ;;  %11160 = vmatprep.mubr.msk.f32.mxu0 %vm322_vm1, %v14423_v44  ;;  %v14443_v30 = vld [vmem:[%s11404_s25 + $0x13e] sm:$0xff]  ;;  %v14460_v19 = vld [vmem:[%s11404_s25 + $0x146] sm:$0xff] }
 0x2e2   : > { %15241 = vst [vmem:[#allocation8_spill] sm:$0xff] %v14425_v26  ;;  %v14432_v52 = vadd.f32 %v5393_v51, %v5076_v31  ;;  %v5079_v53 = vadd.f32 %v10809_v23, %v15244_v9  ;;  %11110 = vmatprep.mubr.msk.f32.mxu1 %vm322_vm1, %v14157_v59  ;;  %v5403_v3 = vpop.f32.mrf.mxu0  ;;  %v15249_v51 = vld [vmem:[#allocation7_spill] sm:$0xff] }
 0x2e3   : > { %v5007_v14 = vpop.f32.mrf.mxu1 }
 0x2e4   : > { %15243 = vst [vmem:[#allocation11_spill] sm:$0xff] %v14432_v52  ;;  %v14445_v16 = vadd.f32 %v10859_v49, %v5079_v53  ;;  %v5078_v40 = vadd.f32 %v5007_v14, %v15246_v6  ;;  %v10862_v18 = vpop.f32.mrf.mxu0  ;;  %11161 = vmatmul.mubr.msk.f32.gmra.mxu0 %vm322_vm1, %v14440_v63  ;;  %v14464_v49 = vld [vmem:[%s11404_s25 + $0x156] sm:$0xff]  ;;  %v15251_v53 = vld [vmem:[#allocation4_spill] sm:$0xff] }
 0x2e5   : > { %v10812_v50 = vpop.f32.mrf.mxu1  ;;  %11111 = vmatmul.mubr.msk.f32.gmra.mxu1 %vm322_vm1, %v14174_v60  ;;  %11163 = vmatprep.mubr.msk.f32.mxu0 %vm322_vm1, %v14443_v30  ;;  %v6060_v60 = vld [vmem:[%s11404_s25 + $0x1cd] sm:$0xff] }
 0x2e6   : > { %15245 = vst [vmem:[#allocation12_spill] sm:$0xff] %v14445_v16  ;;  %v14452_v59 = vadd.f32 %v5403_v3, %v5078_v40  ;;  %v5081_v45 = vadd.f32 %v10812_v50, %v15248_v62  ;;  %11113 = vmatprep.mubr.msk.f32.mxu1 %vm322_vm1, %v15249_v51  ;;  %v5413_v23 = vpop.f32.mrf.mxu0  ;;  %v15252_v40 = vld [vmem:[#allocation9_spill] sm:$0xff]  ;;  %v15254_v62 = vld [vmem:[#allocation14_spill] sm:$0xff] }
 0x2e7   : > { %v5017_v31 = vpop.f32.mrf.mxu1 }
 0x2e8   : > { %15247 = vst [vmem:[#allocation13_spill] sm:$0xff] %v14452_v59  ;;  %v14466_v9 = vadd.f32 %v10862_v18, %v5081_v45  ;;  %v5080_v14 = vadd.f32 %v5017_v31, %v15251_v53  ;;  %v10865_v6 = vpop.f32.mrf.mxu0  ;;  %11164 = vmatmul.mubr.msk.f32.gmra.mxu0 %vm322_vm1, %v14460_v19  ;;  %v6061_v18 = vld [vmem:[%s11404_s25 + $0x1d5] sm:$0xff]  ;;  %v14481_v45 = vld [vmem:[%s11404_s25 + $0x15e] sm:$0xff] }
 0x2e9   : > { %v10815_v3 = vpop.f32.mrf.mxu1  ;;  %11114 = vmatmul.mubr.msk.f32.gmra.mxu1 %vm322_vm1, %v15252_v40  ;;  %11166 = vmatprep.mubr.msk.f32.mxu0 %vm322_vm1, %v14464_v49  ;;  %v6062_v40 = vld [vmem:[%s11404_s25 + $0x1e5] sm:$0xff] }
 0x2ea   : > { %15250 = vst [vmem:[#allocation15_spill] sm:$0xff] %v14466_v9  ;;  %v14473_v50 = vadd.f32 %v5413_v23, %v5080_v14  ;;  %v5083_v51 = vadd.f32 %v10815_v3, %v15254_v62  ;;  %11116 = vmatprep.mubr.msk.f32.mxu1 %vm322_vm1, %v6060_v60  ;;  %v5423_v53 = vpop.f32.mrf.mxu0  ;;  %v14485_v9 = vld [vmem:[%s11404_s25 + $0x16e] sm:$0xff] }
 0x2eb   : > { %v5027_v31 = vpop.f32.mrf.mxu1  ;;  %v15256_v23 = vld [vmem:[#allocation5_spill] sm:$0xff] }
 0x2ec   : > { %15253 = vst [vmem:[#allocation6_spill] sm:$0xff] %v14473_v50  ;;  %v14487_v59 = vadd.f32 %v10865_v6, %v5083_v51  ;;  %v5082_v14 = vadd.f32 %v5027_v31, %v15256_v23  ;;  %v10868_v62 = vpop.f32.mrf.mxu0  ;;  %11167 = vmatmul.mubr.msk.f32.gmra.mxu0 %vm322_vm1, %v14481_v45  ;;  %v15257_v50 = vld [vmem:[#allocation10_spill] sm:$0xff]  ;;  %v6063_v6 = vld [vmem:[%s11404_s25 + $0x1ed] sm:$0xff] }
 0x2ed   : > { %v10818_v3 = vpop.f32.mrf.mxu1  ;;  %11117 = vmatmul.mubr.msk.f32.gmra.mxu1 %vm322_vm1, %v6061_v18  ;;  %11169 = vmatprep.mubr.msk.f32.mxu0 %vm322_vm1, %v14485_v9  ;;  %v14501_v51 = vld [vmem:[%s11404_s25 + $0x176] sm:$0xff] }
 0x2ee   : > { %15255 = vst [vmem:[#allocation3_spill] sm:$0xff] %v14487_v59  ;;  %v14493_v60 = vadd.f32 %v5423_v53, %v5082_v14  ;;  %v5085_v16 = vadd.f32 %v10818_v3, %v15257_v50  ;;  %11119 = vmatprep.mubr.msk.f32.mxu1 %vm322_vm1, %v6062_v40  ;;  %v5433_v23 = vpop.f32.mrf.mxu0 }
 0x2ef   : > { %v5037_v31 = vpop.f32.mrf.mxu1 }
 0x2f0   : > { %v14503_v59 = vadd.f32 %v10868_v62, %v5085_v16  ;;  %v5084_v18 = vadd.f32 %v5037_v31, %v14204_v2  ;;  %v10871_v26 = vpop.f32.mrf.mxu0  ;;  %11170 = vmatmul.mubr.msk.f32.gmra.mxu0 %vm322_vm1, %v14501_v51 }
 0x2f1   : > { %v10821_v52 = vpop.f32.mrf.mxu1  ;;  %11120 = vmatmul.mubr.msk.f32.gmra.mxu1 %vm322_vm1, %v6063_v6  ;;  %11224 = vmatprep.mubr.msk.f32.mxu0 %vm322_vm1, %v14303_v1 }
 0x2f2   : > { %v14509_v50 = vadd.f32 %v5433_v23, %v5084_v18  ;;  %v5087_v53 = vadd.f32 %v10821_v52, %v14211_v21  ;;  %11174 = vmatprep.mubr.msk.f32.mxu1 %vm322_vm1, %v14244_v12  ;;  %v5443_v40 = vpop.f32.mrf.mxu0 }
 0x2f3   : > { %v5047_v16 = vpop.f32.mrf.mxu1 }
 0x2f4   : > { %v14516_v2 = vadd.f32 %v10871_v26, %v5087_v53  ;;  %v5086_v14 = vadd.f32 %v5047_v16, %v14218_v20  ;;  %v10926_v62 = vpop.f32.mrf.mxu0  ;;  %11225 = vmatmul.mubr.msk.f32.vlgmr.msra.gmra.mxu0 %vm322_vm1, %v14320_v15 }
 0x2f5   : > { %v10876_v3 = vpop.f32.mrf.mxu1  ;;  %11175 = vmatmul.mubr.msk.f32.vlgmr.msra.gmra.mxu1 %vm322_vm1, %v14260_v32  ;;  %11227 = vmatprep.mubr.msk.f32.mxu0 %vm322_vm1, %v14323_v57 }
 0x2f6   : > { %v14523_v21 = vadd.f32 %v5443_v40, %v5086_v14  ;;  %v5723_v12 = vadd.f32 %v10876_v3, %v14230_v41  ;;  %11177 = vmatprep.mubr.msk.f32.mxu1 %vm322_vm1, %v14263_v61  ;;  %v5833_v20 = vpop.f32.mrf.mxu0 }
 0x2f7   : > { %v5563_v26 = vpop.f32.mrf.mxu1 }
 0x2f8   : > { %v14530_v52 = vadd.f32 %v10926_v62, %v5723_v12  ;;  %v5722_v6 = vadd.f32 %v5563_v26, %v14236_v33  ;;  %v10929_v31 = vpop.f32.mrf.mxu0  ;;  %11228 = vmatmul.mubr.msk.f32.gmra.mxu0 %vm322_vm1, %v14340_v43 }
 0x2f9   : > { %v10879_v32 = vpop.f32.mrf.mxu1  ;;  %11178 = vmatmul.mubr.msk.f32.gmra.mxu1 %vm322_vm1, %v14280_v11  ;;  %11230 = vmatprep.mubr.msk.f32.mxu0 %vm322_vm1, %v14343_v29 }
 0x2fa   : > { %v14537_v41 = vadd.f32 %v5833_v20, %v5722_v6  ;;  %v5725_v61 = vadd.f32 %v10879_v32, %v14246_v58  ;;  %11180 = vmatprep.mubr.msk.f32.mxu1 %vm322_vm1, %v14283_v17  ;;  %v5843_v33 = vpop.f32.mrf.mxu0 }
 0x2fb   : > { %v5573_v23 = vpop.f32.mrf.mxu1 }
 0x2fc   : > { %v14544_v18 = vadd.f32 %v10929_v31, %v5725_v61  ;;  %v5724_v53 = vadd.f32 %v5573_v23, %v14252_v0  ;;  %v10932_v16 = vpop.f32.mrf.mxu0  ;;  %11231 = vmatmul.mubr.msk.f32.gmra.mxu0 %vm322_vm1, %v14360_v27 }
 0x2fd   : > { %v10882_v11 = vpop.f32.mrf.mxu1  ;;  %11181 = vmatmul.mubr.msk.f32.gmra.mxu1 %vm322_vm1, %v14300_v46  ;;  %11233 = vmatprep.mubr.msk.f32.mxu0 %vm322_vm1, %v14363_v22 }
 0x2fe   : > { %v14551_v58 = vadd.f32 %v5843_v33, %v5724_v53  ;;  %v5727_v17 = vadd.f32 %v10882_v11, %v14265_v5  ;;  %11183 = vmatprep.mubr.msk.f32.mxu1 %vm322_vm1, %v14303_v1  ;;  %v5853_v0 = vpop.f32.mrf.mxu0 }
 0x2ff   : > { %v5583_v40 = vpop.f32.mrf.mxu1 }
 0x300   : > { %v14558_v14 = vadd.f32 %v10932_v16, %v5727_v17  ;;  %v5726_v3 = vadd.f32 %v5583_v40, %v14272_v38  ;;  %v10935_v62 = vpop.f32.mrf.mxu0  ;;  %11234 = vmatmul.mubr.msk.f32.gmra.mxu0 %vm322_vm1, %v14380_v35 }
 0x301   : > { %v10885_v46 = vpop.f32.mrf.mxu1  ;;  %11184 = vmatmul.mubr.msk.f32.gmra.mxu1 %vm322_vm1, %v14320_v15  ;;  %11236 = vmatprep.mubr.msk.f32.mxu0 %vm322_vm1, %v14383_v7 }
 0x302   : > { %v14565_v5 = vadd.f32 %v5853_v0, %v5726_v3  ;;  %v5729_v1 = vadd.f32 %v10885_v46, %v14285_v4  ;;  %11186 = vmatprep.mubr.msk.f32.mxu1 %vm322_vm1, %v14323_v57  ;;  %v5863_v38 = vpop.f32.mrf.mxu0 }
 0x303   : > { %v5593_v12 = vpop.f32.mrf.mxu1 }
 0x304   : > { %v14572_v26 = vadd.f32 %v10935_v62, %v5729_v1  ;;  %v5728_v20 = vadd.f32 %v5593_v12, %v14292_v34  ;;  %v10938_v6 = vpop.f32.mrf.mxu0  ;;  %11237 = vmatmul.mubr.msk.f32.gmra.mxu0 %vm322_vm1, %v14400_v10 }
 0x305   : > { %v10888_v15 = vpop.f32.mrf.mxu1  ;;  %11187 = vmatmul.mubr.msk.f32.gmra.mxu1 %vm322_vm1, %v14340_v43  ;;  %11239 = vmatprep.mubr.msk.f32.mxu0 %vm322_vm1, %v14403_v25 }
 0x306   : > { %v14579_v4 = vadd.f32 %v5863_v38, %v5728_v20  ;;  %v5731_v57 = vadd.f32 %v10888_v15, %v14305_v42  ;;  %11189 = vmatprep.mubr.msk.f32.mxu1 %vm322_vm1, %v14343_v29  ;;  %v5873_v34 = vpop.f32.mrf.mxu0  ;;  %v7008_v20 = vld [vmem:[%s11404_s25 + $0x186] sm:$0xff] }
 0x307   : > { %v5603_v32 = vpop.f32.mrf.mxu1 }
 0x308   : > { %v14586_v31 = vadd.f32 %v10938_v6, %v5731_v57  ;;  %v5730_v61 = vadd.f32 %v5603_v32, %v14312_v13  ;;  %v10941_v23 = vpop.f32.mrf.mxu0  ;;  %11240 = vmatmul.mubr.msk.f32.gmra.mxu0 %vm322_vm1, %v14420_v37  ;;  %v7009_v32 = vld [vmem:[%s11404_s25 + $0x18e] sm:$0xff] }
 0x309   : > { %v10891_v43 = vpop.f32.mrf.mxu1  ;;  %11190 = vmatmul.mubr.msk.f32.gmra.mxu1 %vm322_vm1, %v14360_v27  ;;  %11242 = vmatprep.mubr.msk.f32.mxu0 %vm322_vm1, %v14423_v44 }
 0x30a   : > { %v14593_v42 = vadd.f32 %v5873_v34, %v5730_v61  ;;  %v5733_v29 = vadd.f32 %v10891_v43, %v14325_v55  ;;  %11192 = vmatprep.mubr.msk.f32.mxu1 %vm322_vm1, %v14363_v22  ;;  %v5883_v13 = vpop.f32.mrf.mxu0  ;;  %v7010_v61 = vld [vmem:[%s11404_s25 + $0x19e] sm:$0xff] }
 0x30b   : > { %v5613_v33 = vpop.f32.mrf.mxu1 }
 0x30c   : > { %v14600_v53 = vadd.f32 %v10941_v23, %v5733_v29  ;;  %v5732_v11 = vadd.f32 %v5613_v33, %v14332_v28  ;;  %v10944_v16 = vpop.f32.mrf.mxu0  ;;  %11243 = vmatmul.mubr.msk.f32.gmra.mxu0 %vm322_vm1, %v14440_v63 }
 0x30d   : > { %v10894_v27 = vpop.f32.mrf.mxu1  ;;  %11193 = vmatmul.mubr.msk.f32.gmra.mxu1 %vm322_vm1, %v14380_v35  ;;  %11245 = vmatprep.mubr.msk.f32.mxu0 %vm322_vm1, %v14443_v30 }
 0x30e   : > { %v14607_v55 = vadd.f32 %v5883_v13, %v5732_v11  ;;  %v5735_v22 = vadd.f32 %v10894_v27, %v14345_v56  ;;  %11195 = vmatprep.mubr.msk.f32.mxu1 %vm322_vm1, %v14383_v7  ;;  %v5893_v28 = vpop.f32.mrf.mxu0  ;;  %v7011_v13 = vld [vmem:[%s11404_s25 + $0x1a6] sm:$0xff]  ;;  %v7012_v27 = vld [vmem:[%s11404_s25 + $0x1b6] sm:$0xff] }
 0x30f   : > { %v5623_v17 = vpop.f32.mrf.mxu1 }
 0x310   : > { %v14614_v40 = vadd.f32 %v10944_v16, %v5735_v22  ;;  %v5734_v0 = vadd.f32 %v5623_v17, %v14352_v47  ;;  %v10947_v3 = vpop.f32.mrf.mxu0  ;;  %11246 = vmatmul.mubr.msk.f32.gmra.mxu0 %vm322_vm1, %v14460_v19 }
 0x311   : > { %v10897_v35 = vpop.f32.mrf.mxu1  ;;  %11196 = vmatmul.mubr.msk.f32.gmra.mxu1 %vm322_vm1, %v14400_v10  ;;  %11248 = vmatprep.mubr.msk.f32.mxu0 %vm322_vm1, %v14464_v49 }
 0x312   : > { %v14621_v56 = vadd.f32 %v5893_v28, %v5734_v0  ;;  %v5737_v7 = vadd.f32 %v10897_v35, %v14365_v39  ;;  %11198 = vmatprep.mubr.msk.f32.mxu1 %vm322_vm1, %v14403_v25  ;;  %v5903_v46 = vpop.f32.mrf.mxu0  ;;  %v15260_v0 = vld [vmem:[#allocation12_spill] sm:$0xff] }
 0x313   : > { %v5633_v47 = vpop.f32.mrf.mxu1 }
 0x314   : > { %v14628_v62 = vadd.f32 %v10947_v3, %v5737_v7  ;;  %v5736_v10 = vadd.f32 %v5633_v47, %v14372_v48  ;;  %v10950_v12 = vpop.f32.mrf.mxu0  ;;  %11249 = vmatmul.mubr.msk.f32.gmra.mxu0 %vm322_vm1, %v14481_v45  ;;  %v7013_v3 = vld [vmem:[%s11404_s25 + $0x1be] sm:$0xff] }
 0x315   : > { %v10900_v1 = vpop.f32.mrf.mxu1  ;;  %11199 = vmatmul.mubr.msk.f32.gmra.mxu1 %vm322_vm1, %v14420_v37  ;;  %11251 = vmatprep.mubr.msk.f32.mxu0 %vm322_vm1, %v14485_v9 }
 0x316   : > { %v14635_v39 = vadd.f32 %v5903_v46, %v5736_v10  ;;  %v5739_v25 = vadd.f32 %v10900_v1, %v14385_v24  ;;  %11201 = vmatprep.mubr.msk.f32.mxu1 %vm322_vm1, %v14423_v44  ;;  %v5913_v38 = vpop.f32.mrf.mxu0  ;;  %v7014_v46 = vld [vmem:[%s11404_s25 + $0x1ce] sm:$0xff] }
 0x317   : > { %v5643_v48 = vpop.f32.mrf.mxu1 }
 0x318   : > { %v14643_v15 = vadd.f32 %v10950_v12, %v5739_v25  ;;  %v5738_v37 = vadd.f32 %v5643_v48, %v14392_v54  ;;  %v10953_v57 = vpop.f32.mrf.mxu0  ;;  %11252 = vmatmul.mubr.msk.f32.gmra.mxu0 %vm322_vm1, %v14501_v51  ;;  %v15262_v48 = vld [vmem:[#allocation15_spill] sm:$0xff] }
 0x319   : > { %v10903_v6 = vpop.f32.mrf.mxu1  ;;  %11202 = vmatmul.mubr.msk.f32.gmra.mxu1 %vm322_vm1, %v14440_v63  ;;  %11254 = vmatprep.mubr.msk.f32.mxu0 %vm322_vm1, %v7008_v20 }
 0x31a   : > { %v14650_v24 = vadd.f32 %v5913_v38, %v5738_v37  ;;  %v5741_v44 = vadd.f32 %v10903_v6, %v14405_v36  ;;  %11204 = vmatprep.mubr.msk.f32.mxu1 %vm322_vm1, %v14443_v30  ;;  %v5923_v34 = vpop.f32.mrf.mxu0  ;;  %v15258_v30 = vld [vmem:[#allocation8_spill] sm:$0xff]  ;;  %v7015_v37 = vld [vmem:[%s11404_s25 + $0x1d6] sm:$0xff] }
 0x31b   : > { %v5653_v54 = vpop.f32.mrf.mxu1 }
 0x31c   : > { %v14658_v43 = vadd.f32 %v10953_v57, %v5741_v44  ;;  %v5740_v63 = vadd.f32 %v5653_v54, %v14412_v8  ;;  %v10956_v29 = vpop.f32.mrf.mxu0  ;;  %11255 = vmatmul.mubr.msk.f32.gmra.mxu0 %vm322_vm1, %v7009_v32  ;;  %v7016_v44 = vld [vmem:[%s11404_s25 + $0x1e6] sm:$0xff] }
 0x31d   : > { %v10906_v23 = vpop.f32.mrf.mxu1  ;;  %11205 = vmatmul.mubr.msk.f32.gmra.mxu1 %vm322_vm1, %v14460_v19  ;;  %11257 = vmatprep.mubr.msk.f32.mxu0 %vm322_vm1, %v7010_v61  ;;  %v15259_v19 = vld [vmem:[#allocation11_spill] sm:$0xff] }
 0x31e   : > { %v14664_v36 = vadd.f32 %v5923_v34, %v5740_v63  ;;  %v5743_v33 = vadd.f32 %v10906_v23, %v15258_v30  ;;  %11207 = vmatprep.mubr.msk.f32.mxu1 %vm322_vm1, %v14464_v49  ;;  %v5933_v8 = vpop.f32.mrf.mxu0  ;;  %v15263_v34 = vld [vmem:[#allocation6_spill] sm:$0xff] }
 0x31f   : > { %v5663_v11 = vpop.f32.mrf.mxu1 }
 0x320   : > { %v14672_v16 = vadd.f32 %v10956_v29, %v5743_v33  ;;  %v5742_v22 = vadd.f32 %v5663_v11, %v15259_v19  ;;  %v10959_v28 = vpop.f32.mrf.mxu0  ;;  %11258 = vmatmul.mubr.msk.f32.gmra.mxu0 %vm322_vm1, %v7011_v13  ;;  %v7017_v33 = vld [vmem:[%s11404_s25 + $0x1ee] sm:$0xff]  ;;  %v7018_v19 = vld [vmem:[%s11404_s25 + $0x1fe] sm:$0xff] }
 0x321   : > { %v10909_v17 = vpop.f32.mrf.mxu1  ;;  %11208 = vmatmul.mubr.msk.f32.gmra.mxu1 %vm322_vm1, %v14481_v45  ;;  %11260 = vmatprep.mubr.msk.f32.mxu0 %vm322_vm1, %v7012_v27  ;;  %v15261_v45 = vld [vmem:[#allocation13_spill] sm:$0xff] }
 0x322   : > { %v14678_v49 = vadd.f32 %v5933_v8, %v5742_v22  ;;  %v5745_v35 = vadd.f32 %v10909_v17, %v15260_v0  ;;  %11210 = vmatprep.mubr.msk.f32.mxu1 %vm322_vm1, %v14485_v9  ;;  %v5943_v47 = vpop.f32.mrf.mxu0 }
 0x323   : > { %v5673_v7 = vpop.f32.mrf.mxu1 }
 0x324   : > { %v14686_v10 = vadd.f32 %v10959_v28, %v5745_v35  ;;  %v5744_v1 = vadd.f32 %v5673_v7, %v15261_v45  ;;  %v10962_v25 = vpop.f32.mrf.mxu0  ;;  %11261 = vmatmul.mubr.msk.f32.gmra.mxu0 %vm322_vm1, %v7013_v3  ;;  %v7019_v35 = vld [vmem:[%s11404_s25 + $0x206] sm:$0xff]  ;;  %s9196_s25 = sshll.u32 %s15358_s12, 4 }
 0x325   : > { %v10912_v12 = vpop.f32.mrf.mxu1  ;;  %11211 = vmatmul.mubr.msk.f32.gmra.mxu1 %vm322_vm1, %v14501_v51  ;;  %11263 = vmatprep.mubr.msk.f32.mxu0 %vm322_vm1, %v7014_v46  ;;  %s224_s30 = scalar_lea.vmem %s15132_s3, %s9196_s25 }
 0x326   : > { %v14692_v9 = vadd.f32 %v5943_v47, %v5744_v1  ;;  %v5747_v38 = vadd.f32 %v10912_v12, %v15262_v48  ;;  %11213 = vmatprep.mubr.msk.f32.mxu1 %vm322_vm1, %v7008_v20  ;;  %v5953_v57 = vpop.f32.mrf.mxu0  ;;  %v15264_v20 = vld [vmem:[#allocation3_spill] sm:$0xff] }
 0x327   : > { %v5683_v6 = vpop.f32.mrf.mxu1 }
 0x328   : > { %v14699_v54 = vadd.f32 %v10962_v25, %v5747_v38  ;;  %v5746_v51 = vadd.f32 %v5683_v6, %v15263_v34  ;;  %v10965_v23 = vpop.f32.mrf.mxu0  ;;  %11264 = vmatmul.mubr.msk.f32.gmra.mxu0 %vm322_vm1, %v7015_v37 }
 0x329   : > { %v10915_v63 = vpop.f32.mrf.mxu1  ;;  %11214 = vmatmul.mubr.msk.f32.gmra.mxu1 %vm322_vm1, %v7009_v32  ;;  %11266 = vmatprep.mubr.msk.f32.mxu0 %vm322_vm1, %v7016_v44 }
 0x32a   : > { %v14704_v29 = vadd.f32 %v5953_v57, %v5746_v51  ;;  %v5749_v30 = vadd.f32 %v10915_v63, %v15264_v20  ;;  %11216 = vmatprep.mubr.msk.f32.mxu1 %vm322_vm1, %v7010_v61  ;;  %v5963_v8 = vpop.f32.mrf.mxu0 }
 0x32b   : > { %v5693_v11 = vpop.f32.mrf.mxu1 }
 0x32c   : > { %v14711_v22 = vadd.f32 %v10965_v23, %v5749_v30  ;;  %v5748_v17 = vadd.f32 %v5693_v11, %v14493_v60  ;;  %v10968_v28 = vpop.f32.mrf.mxu0  ;;  %11267 = vmatmul.mubr.msk.f32.gmra.mxu0 %vm322_vm1, %v7017_v33 }
 0x32d   : > { %v10918_v32 = vpop.f32.mrf.mxu1  ;;  %11217 = vmatmul.mubr.msk.f32.gmra.mxu1 %vm322_vm1, %v7011_v13  ;;  %11269 = vmatprep.mubr.msk.f32.mxu0 %vm322_vm1, %v7018_v19 }
 0x32e   : > { %v14716_v0 = vadd.f32 %v5963_v8, %v5748_v17  ;;  %v5751_v61 = vadd.f32 %v10918_v32, %v14503_v59  ;;  %11219 = vmatprep.mubr.msk.f32.mxu1 %vm322_vm1, %v7012_v27  ;;  %v5973_v47 = vpop.f32.mrf.mxu0  ;;  %v8344_v59 = vld [vmem:[%s15131_s2] ss:$0 sm:$0xff] }
 0x32f   : > { %v5703_v7 = vpop.f32.mrf.mxu1  ;;  %239 = vst.msk [vmem:[#allocation2 + $0x8] sm:$0xff] %vm237_vm2, %v8344_v59  ;;  %238 = vst.msk [vmem:[#allocation2] sm:$0xff] %vm237_vm2, %v8344_v59 }
 0x330   : > { %v14722_v46 = vadd.f32 %v10968_v28, %v5751_v61  ;;  %v5750_v60 = vadd.f32 %v5703_v7, %v14509_v50  ;;  %v10971_v1 = vpop.f32.mrf.mxu0  ;;  %11270 = vmatmul.mubr.msk.f32.gmra.mxu0 %vm322_vm1, %v7019_v35  ;;  %240 = vst.msk [vmem:[#allocation2 + $0x10] sm:$0xff] %vm237_vm2, %v8344_v59  ;;  %241 = vst.msk [vmem:[#allocation2 + $0x18] sm:$0xff] %vm237_vm2, %v8344_v59 }
 0x331   : > { %v10921_v45 = vpop.f32.mrf.mxu1  ;;  %11220 = vmatmul.mubr.msk.f32.gmra.mxu1 %vm322_vm1, %v7013_v3  ;;  %242 = vst.msk [vmem:[#allocation2 + $0x20] sm:$0xff] %vm237_vm2, %v8344_v59  ;;  %243 = vst.msk [vmem:[#allocation2 + $0x28] sm:$0xff] %vm237_vm2, %v8344_v59 }
 0x332   : > { %v14730_v13 = vadd.f32 %v5973_v47, %v5750_v60  ;;  %v5753_v27 = vadd.f32 %v10921_v45, %v14516_v2  ;;  %244 = vst.msk [vmem:[#allocation2 + $0x30] sm:$0xff] %vm237_vm2, %v8344_v59  ;;  %245 = vst.msk [vmem:[#allocation2 + $0x38] sm:$0xff] %vm237_vm2, %v8344_v59  ;;  %v5983_v2 = vpop.f32.mrf.mxu0 }
 0x333   : > { %246 = vst.msk [vmem:[#allocation2 + $0x40] sm:$0xff] %vm237_vm2, %v8344_v59  ;;  %247 = vst.msk [vmem:[#allocation2 + $0x48] sm:$0xff] %vm237_vm2, %v8344_v59  ;;  %v5713_v50 = vpop.f32.mrf.mxu1 }
 0x334   : > { %248 = vst.msk [vmem:[#allocation2 + $0x50] sm:$0xff] %vm237_vm2, %v8344_v59  ;;  %249 = vst.msk [vmem:[#allocation2 + $0x58] sm:$0xff] %vm237_vm2, %v8344_v59  ;;  %v14765_v3 = vadd.f32 %v10971_v1, %v5753_v27  ;;  %v5752_v12 = vadd.f32 %v5713_v50, %v14523_v21  ;;  %v11026_v48 = vpop.f32.mrf.mxu0 }
 0x335   : > { %250 = vst.msk [vmem:[#allocation2 + $0x60] sm:$0xff] %vm237_vm2, %v8344_v59  ;;  %251 = vst.msk [vmem:[#allocation2 + $0x68] sm:$0xff] %vm237_vm2, %v8344_v59  ;;  %v10976_v25 = vpop.f32.mrf.mxu1 }
 0x336   : > { %252 = vst.msk [vmem:[#allocation2 + $0x70] sm:$0xff] %vm237_vm2, %v8344_v59  ;;  %253 = vst.msk [vmem:[#allocation2 + $0x78] sm:$0xff] %vm237_vm2, %v8344_v59  ;;  %v14768_v38 = vadd.f32 %v5983_v2, %v5752_v12  ;;  %v6393_v37 = vadd.f32 %v10976_v25, %v14530_v52  ;;  %v6509_v57 = vpop.f32.mrf.mxu0 }
 0x337   : > { %254 = vst.msk [vmem:[#allocation2 + $0x80] sm:$0xff] %vm237_vm2, %v8344_v59  ;;  %255 = vst.msk [vmem:[#allocation2 + $0x88] sm:$0xff] %vm237_vm2, %v8344_v59  ;;  %v6233_v6 = vpop.f32.mrf.mxu1 }
 0x338   : > { %256 = vst.msk [vmem:[#allocation2 + $0x90] sm:$0xff] %vm237_vm2, %v8344_v59  ;;  %257 = vst.msk [vmem:[#allocation2 + $0x98] sm:$0xff] %vm237_vm2, %v8344_v59  ;;  %v14771_v44 = vadd.f32 %v11026_v48, %v6393_v37  ;;  %v6392_v34 = vadd.f32 %v6233_v6, %v14537_v41  ;;  %v11029_v63 = vpop.f32.mrf.mxu0 }
 0x339   : > { %258 = vst.msk [vmem:[#allocation2 + $0xa0] sm:$0xff] %vm237_vm2, %v8344_v59  ;;  %259 = vst.msk [vmem:[#allocation2 + $0xa8] sm:$0xff] %vm237_vm2, %v8344_v59  ;;  %v10979_v51 = vpop.f32.mrf.mxu1 }
 0x33a   : > { %260 = vst.msk [vmem:[#allocation2 + $0xb0] sm:$0xff] %vm237_vm2, %v8344_v59  ;;  %261 = vst.msk [vmem:[#allocation2 + $0xb8] sm:$0xff] %vm237_vm2, %v8344_v59  ;;  %v14774_v23 = vadd.f32 %v6509_v57, %v6392_v34  ;;  %v6395_v20 = vadd.f32 %v10979_v51, %v14544_v18  ;;  %v6519_v21 = vpop.f32.mrf.mxu0 }
 0x33b   : > { %262 = vst.msk [vmem:[#allocation2 + $0xc0] sm:$0xff] %vm237_vm2, %v8344_v59  ;;  %263 = vst.msk [vmem:[#allocation2 + $0xc8] sm:$0xff] %vm237_vm2, %v8344_v59  ;;  %v6243_v30 = vpop.f32.mrf.mxu1 }
 0x33c   : > { %264 = vst.msk [vmem:[#allocation2 + $0xd0] sm:$0xff] %vm237_vm2, %v8344_v59  ;;  %265 = vst.msk [vmem:[#allocation2 + $0xd8] sm:$0xff] %vm237_vm2, %v8344_v59  ;;  %v14777_v33 = vadd.f32 %v11029_v63, %v6395_v20  ;;  %v6394_v11 = vadd.f32 %v6243_v30, %v14551_v58  ;;  %v11032_v52 = vpop.f32.mrf.mxu0 }
 0x33d   : > { %266 = vst.msk [vmem:[#allocation2 + $0xe0] sm:$0xff] %vm237_vm2, %v8344_v59  ;;  %267 = vst.msk [vmem:[#allocation2 + $0xe8] sm:$0xff] %vm237_vm2, %v8344_v59  ;;  %v10982_v8 = vpop.f32.mrf.mxu1 }
 0x33e   : > { %268 = vst.msk [vmem:[#allocation2 + $0xf0] sm:$0xff] %vm237_vm2, %v8344_v59  ;;  %269 = vst.msk [vmem:[#allocation2 + $0xf8] sm:$0xff] %vm237_vm2, %v8344_v59  ;;  %v14780_v19 = vadd.f32 %v6519_v21, %v6394_v11  ;;  %v6397_v17 = vadd.f32 %v10982_v8, %v14558_v14  ;;  %v6529_v41 = vpop.f32.mrf.mxu0 }
 0x33f   : > { %v6253_v32 = vpop.f32.mrf.mxu1 }
 0x340   : > { %v14783_v28 = vadd.f32 %v11032_v52, %v6397_v17  ;;  %v6396_v61 = vadd.f32 %v6253_v32, %v14565_v5  ;;  %v11035_v18 = vpop.f32.mrf.mxu0 }
 0x341   : > { %v10985_v35 = vpop.f32.mrf.mxu1 }
 0x342   : > { %v14786_v7 = vadd.f32 %v6529_v41, %v6396_v61  ;;  %v6399_v47 = vadd.f32 %v10985_v35, %v14572_v26  ;;  %v6539_v58 = vpop.f32.mrf.mxu0 }
 0x343   : > { %v6263_v60 = vpop.f32.mrf.mxu1 }
 0x344   : > { %v14789_v45 = vadd.f32 %v11035_v18, %v6399_v47  ;;  %v6398_v1 = vadd.f32 %v6263_v60, %v14579_v4  ;;  %v11038_v14 = vpop.f32.mrf.mxu0 }
 0x345   : > { %v10988_v59 = vpop.f32.mrf.mxu1 }
 0x346   : > { %v14792_v27 = vadd.f32 %v6539_v58, %v6398_v1  ;;  %v6401_v50 = vadd.f32 %v10988_v59, %v14586_v31  ;;  %v6549_v5 = vpop.f32.mrf.mxu0 }
 0x347   : > { %v6273_v2 = vpop.f32.mrf.mxu1 }
 0x348   : > { %v14795_v12 = vadd.f32 %v11038_v14, %v6401_v50  ;;  %v6400_v25 = vadd.f32 %v6273_v2, %v14593_v42  ;;  %v11041_v26 = vpop.f32.mrf.mxu0 }
 0x349   : > { %v10991_v48 = vpop.f32.mrf.mxu1 }
 0x34a   : > { %v14798_v37 = vadd.f32 %v6549_v5, %v6400_v25  ;;  %v6403_v6 = vadd.f32 %v10991_v48, %v14600_v53  ;;  %v6559_v4 = vpop.f32.mrf.mxu0 }
 0x34b   : > { %v6283_v57 = vpop.f32.mrf.mxu1 }
 0x34c   : > { %v14801_v34 = vadd.f32 %v11041_v26, %v6403_v6  ;;  %v6402_v51 = vadd.f32 %v6283_v57, %v14607_v55  ;;  %v11044_v31 = vpop.f32.mrf.mxu0 }
 0x34d   : > { %v10994_v63 = vpop.f32.mrf.mxu1 }
 0x34e   : > { %v14804_v20 = vadd.f32 %v6559_v4, %v6402_v51  ;;  %v6405_v30 = vadd.f32 %v10994_v63, %v14614_v40  ;;  %v6569_v42 = vpop.f32.mrf.mxu0 }
 0x34f   : > { %v6293_v21 = vpop.f32.mrf.mxu1 }
 0x350   : > { %v14807_v11 = vadd.f32 %v11044_v31, %v6405_v30  ;;  %v6404_v8 = vadd.f32 %v6293_v21, %v14621_v56  ;;  %v11047_v53 = vpop.f32.mrf.mxu0 }
 0x351   : > { %v10997_v52 = vpop.f32.mrf.mxu1 }
 0x352   : > { %v14810_v17 = vadd.f32 %v6569_v42, %v6404_v8  ;;  %v6407_v32 = vadd.f32 %v10997_v52, %v14628_v62  ;;  %v6579_v55 = vpop.f32.mrf.mxu0 }
 0x353   : > { %v6303_v41 = vpop.f32.mrf.mxu1 }
 0x354   : > { %v14813_v61 = vadd.f32 %v11047_v53, %v6407_v32  ;;  %v6406_v35 = vadd.f32 %v6303_v41, %v14635_v39  ;;  %v11050_v40 = vpop.f32.mrf.mxu0 }
 0x355   : > { %v11000_v18 = vpop.f32.mrf.mxu1 }
 0x356   : > { %v14816_v47 = vadd.f32 %v6579_v55, %v6406_v35  ;;  %v6409_v60 = vadd.f32 %v11000_v18, %v14643_v15  ;;  %v6589_v56 = vpop.f32.mrf.mxu0 }
 0x357   : > { %v6313_v58 = vpop.f32.mrf.mxu1 }
 0x358   : > { %v14819_v1 = vadd.f32 %v11050_v40, %v6409_v60  ;;  %v6408_v59 = vadd.f32 %v6313_v58, %v14650_v24  ;;  %v11053_v62 = vpop.f32.mrf.mxu0 }
 0x359   : > { %v11003_v14 = vpop.f32.mrf.mxu1 }
 0x35a   : > { %v14822_v50 = vadd.f32 %v6589_v56, %v6408_v59  ;;  %v6411_v2 = vadd.f32 %v11003_v14, %v14658_v43  ;;  %v6599_v39 = vpop.f32.mrf.mxu0 }
 0x35b   : > { %v6323_v5 = vpop.f32.mrf.mxu1 }
 0x35c   : > { %v14825_v25 = vadd.f32 %v11053_v62, %v6411_v2  ;;  %v6410_v48 = vadd.f32 %v6323_v5, %v14664_v36  ;;  %v11056_v15 = vpop.f32.mrf.mxu0 }
 0x35d   : > { %v11006_v26 = vpop.f32.mrf.mxu1 }
 0x35e   : > { %15265 = vst [vmem:[#allocation7_spill] sm:$0xff] %v14825_v25  ;;  %v14828_v6 = vadd.f32 %v6599_v39, %v6410_v48  ;;  %v6413_v57 = vadd.f32 %v11006_v26, %v14672_v16  ;;  %v6609_v24 = vpop.f32.mrf.mxu0 }
 0x35f   : > { %v6333_v4 = vpop.f32.mrf.mxu1 }
 0x360   : > { %15266 = vst [vmem:[#allocation4_spill] sm:$0xff] %v14828_v6  ;;  %v14831_v51 = vadd.f32 %v11056_v15, %v6413_v57  ;;  %v6412_v63 = vadd.f32 %v6333_v4, %v14678_v49  ;;  %v11059_v43 = vpop.f32.mrf.mxu0 }
 0x361   : > { %v11009_v31 = vpop.f32.mrf.mxu1 }
 0x362   : > { %15267 = vst [vmem:[#allocation9_spill] sm:$0xff] %v14831_v51  ;;  %v14834_v30 = vadd.f32 %v6609_v24, %v6412_v63  ;;  %v6415_v21 = vadd.f32 %v11009_v31, %v14686_v10  ;;  %v6619_v36 = vpop.f32.mrf.mxu0 }
 0x363   : > { %v6343_v42 = vpop.f32.mrf.mxu1 }
 0x364   : > { %15268 = vst [vmem:[#allocation14_spill] sm:$0xff] %v14834_v30  ;;  %v14837_v8 = vadd.f32 %v11059_v43, %v6415_v21  ;;  %v6414_v52 = vadd.f32 %v6343_v42, %v14692_v9  ;;  %v11062_v16 = vpop.f32.mrf.mxu0 }
 0x365   : > { %v11012_v53 = vpop.f32.mrf.mxu1 }
 0x366   : > { %15269 = vst [vmem:[#allocation5_spill] sm:$0xff] %v14837_v8  ;;  %v14840_v32 = vadd.f32 %v6619_v36, %v6414_v52  ;;  %v6417_v41 = vadd.f32 %v11012_v53, %v14699_v54  ;;  %v6629_v49 = vpop.f32.mrf.mxu0 }
 0x367   : > { %v6353_v55 = vpop.f32.mrf.mxu1 }
 0x368   : > { %15270 = vst [vmem:[#allocation10_spill] sm:$0xff] %v14840_v32  ;;  %v14843_v35 = vadd.f32 %v11062_v16, %v6417_v41  ;;  %v6416_v18 = vadd.f32 %v6353_v55, %v14704_v29  ;;  %v11065_v10 = vpop.f32.mrf.mxu0 }
 0x369   : > { %v11015_v40 = vpop.f32.mrf.mxu1 }
 0x36a   : > { %15271 = vst [vmem:[#allocation8_spill] sm:$0xff] %v14843_v35  ;;  %v14846_v60 = vadd.f32 %v6629_v49, %v6416_v18  ;;  %v6419_v58 = vadd.f32 %v11015_v40, %v14711_v22  ;;  %v6639_v9 = vpop.f32.mrf.mxu0 }
 0x36b   : > { %v6363_v56 = vpop.f32.mrf.mxu1 }
 0x36c   : > { %15272 = vst [vmem:[#allocation11_spill] sm:$0xff] %v14846_v60  ;;  %v14849_v59 = vadd.f32 %v11065_v10, %v6419_v58  ;;  %v6418_v14 = vadd.f32 %v6363_v56, %v14716_v0  ;;  %v11068_v54 = vpop.f32.mrf.mxu0 }
 0x36d   : > { %v11018_v62 = vpop.f32.mrf.mxu1 }
 0x36e   : > { %15273 = vst [vmem:[#allocation12_spill] sm:$0xff] %v14849_v59  ;;  %v14852_v2 = vadd.f32 %v6639_v9, %v6418_v14  ;;  %v6421_v5 = vadd.f32 %v11018_v62, %v14722_v46  ;;  %v6649_v29 = vpop.f32.mrf.mxu0 }
 0x36f   : > { %v6373_v39 = vpop.f32.mrf.mxu1 }
 0x370   : > { %15274 = vst [vmem:[#allocation13_spill] sm:$0xff] %v14852_v2  ;;  %v14855_v48 = vadd.f32 %v11068_v54, %v6421_v5  ;;  %v6420_v26 = vadd.f32 %v6373_v39, %v14730_v13  ;;  %v11071_v22 = vpop.f32.mrf.mxu0 }
 0x371   : > { %v11021_v15 = vpop.f32.mrf.mxu1 }
 0x372   : > { %15275 = vst [vmem:[#allocation15_spill] sm:$0xff] %v14855_v48  ;;  %v14858_v57 = vadd.f32 %v6649_v29, %v6420_v26  ;;  %v6423_v4 = vadd.f32 %v11021_v15, %v14765_v3  ;;  %v6659_v0 = vpop.f32.mrf.mxu0 }
 0x373   : > { %v6383_v24 = vpop.f32.mrf.mxu1 }
 0x374   : > { %15276 = vst [vmem:[#allocation6_spill] sm:$0xff] %v14858_v57  ;;  %v14861_v63 = vadd.f32 %v11071_v22, %v6423_v4  ;;  %v6422_v31 = vadd.f32 %v6383_v24, %v14768_v38  ;;  %v14864_v46 = vpop.f32.mrf.mxu0 }
 0x375   : > { %v11076_v43 = vpop.f32.mrf.mxu1 }
 0x376   : > { %15277 = vst [vmem:[#allocation3_spill] sm:$0xff] %v14861_v63  ;;  %v14866_v21 = vadd.f32 %v6659_v0, %v6422_v31  ;;  %v14868_v36 = vpop.f32.mrf.mxu0 }
 0x377   : > { %v6785_v42 = vpop.f32.mrf.mxu1 }
 0x378   : > { %15278 = vst [vmem:[#allocation16_spill] sm:$0xff] %v14866_v21  ;;  %v14872_v52 = vpop.f32.mrf.mxu0 }
 0x379   : > { %v14870_v13 = vpop.f32.mrf.mxu1 }
 0x37a   : > { %v14876_v3 = vpop.f32.mrf.mxu0 }
 0x37b   : > { %v14874_v53 = vpop.f32.mrf.mxu1 }
 0x37c   : > { %v14880_v41 = vpop.f32.mrf.mxu0 }
 0x37d   : > { %v14878_v16 = vpop.f32.mrf.mxu1 }
 0x37e   : > { %v14884_v55 = vpop.f32.mrf.mxu0 }
 0x37f   : > { %v14882_v38 = vpop.f32.mrf.mxu1 }
 0x380   : > { %v14888_v18 = vpop.f32.mrf.mxu0 }
 0x381   : > { %v14886_v49 = vpop.f32.mrf.mxu1 }
 0x382   : > { %v14892_v10 = vpop.f32.mrf.mxu0 }
 0x383   : > { %v14890_v40 = vpop.f32.mrf.mxu1 }
 0x384   : > { %v14896_v56 = vpop.f32.mrf.mxu0 }
 0x385   : > { %v14894_v58 = vpop.f32.mrf.mxu1 }
 0x386   : > { %v14900_v14 = vpop.f32.mrf.mxu0 }
 0x387   : > { %v14898_v9 = vpop.f32.mrf.mxu1 }
 0x388   : > { %v14904_v54 = vpop.f32.mrf.mxu0 }
 0x389   : > { %v14902_v62 = vpop.f32.mrf.mxu1 }
 0x38a   : > { %v14908_v39 = vpop.f32.mrf.mxu0 }
 0x38b   : > { %v14906_v5 = vpop.f32.mrf.mxu1 }
 0x38c   : > { %v14912_v26 = vpop.f32.mrf.mxu0 }
 0x38d   : > { %v14910_v29 = vpop.f32.mrf.mxu1 }
 0x38e   : > { %v14916_v22 = vpop.f32.mrf.mxu0 }
 0x38f   : > { %v14914_v15 = vpop.f32.mrf.mxu1 }
 0x390   : > { %v14920_v24 = vpop.f32.mrf.mxu0 }
 0x391   : > { %v14918_v4 = vpop.f32.mrf.mxu1 }
 0x392   : > { %v14924_v31 = vpop.f32.mrf.mxu0 }
 0x393   : > { %v14922_v0 = vpop.f32.mrf.mxu1 }
 0x394   : > { %v14928_v63 = vpop.f32.mrf.mxu0 }
 0x395   : > { %v14926_v21 = vpop.f32.mrf.mxu1  ;;  %15279 = vst [vmem:[#allocation17_spill] sm:$0xff] %v14928_v63 }
 0x396   : > { %v14932_v48 = vpop.f32.mrf.mxu0 }
 0x397   : > { %v14930_v57 = vpop.f32.mrf.mxu1  ;;  %15280 = vst [vmem:[#allocation18_spill] sm:$0xff] %v14932_v48 }
 0x398   : > { %v14936_v59 = vpop.f32.mrf.mxu0 }
 0x399   : > { %v14934_v2 = vpop.f32.mrf.mxu1  ;;  %15282 = vst [vmem:[#allocation20_spill] sm:$0xff] %v14936_v59 }
 0x39a   : > { %15281 = vst [vmem:[#allocation19_spill] sm:$0xff] %v14934_v2  ;;  %v14940_v35 = vpop.f32.mrf.mxu0 }
 0x39b   : > { %v14938_v60 = vpop.f32.mrf.mxu1  ;;  %15284 = vst [vmem:[#allocation22_spill] sm:$0xff] %v14940_v35 }
 0x39c   : > { %15283 = vst [vmem:[#allocation21_spill] sm:$0xff] %v14938_v60  ;;  %v14944_v8 = vpop.f32.mrf.mxu0 }
 0x39d   : > { %v14942_v32 = vpop.f32.mrf.mxu1  ;;  %15286 = vst [vmem:[#allocation24_spill] sm:$0xff] %v14944_v8 }
 0x39e   : > { %15285 = vst [vmem:[#allocation23_spill] sm:$0xff] %v14942_v32  ;;  %v14948_v51 = vpop.f32.mrf.mxu0 }
 0x39f   : > { %v14946_v30 = vpop.f32.mrf.mxu1  ;;  %15288 = vst [vmem:[#allocation26_spill] sm:$0xff] %v14948_v51 }
 0x3a0   : > { %15287 = vst [vmem:[#allocation25_spill] sm:$0xff] %v14946_v30  ;;  %v14952_v25 = vpop.f32.mrf.mxu0 }
 0x3a1   : > { %v14950_v6 = vpop.f32.mrf.mxu1  ;;  %15290 = vst [vmem:[#allocation28_spill] sm:$0xff] %v14952_v25 }
 0x3a2   : > { %15289 = vst [vmem:[#allocation27_spill] sm:$0xff] %v14950_v6  ;;  %v14956_v2 = vpop.f32.mrf.mxu0 }
 0x3a3   : > { %v14954_v48 = vpop.f32.mrf.mxu1  ;;  %15292 = vst [vmem:[#allocation30_spill] sm:$0xff] %v14956_v2 }
 0x3a4   : > { %15291 = vst [vmem:[#allocation29_spill] sm:$0xff] %v14954_v48  ;;  %v14960_v60 = vpop.f32.mrf.mxu0 }
 0x3a5   : > { %v14958_v59 = vpop.f32.mrf.mxu1  ;;  %15294 = vst [vmem:[#allocation32_spill] sm:$0xff] %v14960_v60  ;;  %v6945_v60 = vadd.f32 %v11076_v43, %v14771_v44  ;;  %v6946_v44 = vadd.f32 %v14874_v53, %v14780_v19  ;;  %v7947_v53 = vld [vmem:[#allocation2 + $0x18] sm:$0xff] }
 0x3a6   : > { %15293 = vst [vmem:[#allocation31_spill] sm:$0xff] %v14958_v59  ;;  %v14964_v32 = vpop.f32.mrf.mxu0 }
 0x3a7   : > { %v14962_v35 = vpop.f32.mrf.mxu1  ;;  %15296 = vst [vmem:[#allocation34_spill] sm:$0xff] %v14964_v32 }
 0x3a8   : > { %15295 = vst [vmem:[#allocation33_spill] sm:$0xff] %v14962_v35  ;;  %v14968_v30 = vpop.f32.mrf.mxu0 }
 0x3a9   : > { %v14966_v8 = vpop.f32.mrf.mxu1  ;;  %15298 = vst [vmem:[#allocation36_spill] sm:$0xff] %v14968_v30  ;;  %v6944_v30 = vadd.f32 %v6785_v42, %v14774_v23  ;;  %v6949_v23 = vadd.f32 %v14878_v16, %v14783_v28  ;;  %v7945_v42 = vld [vmem:[#allocation2 + $0x8] sm:$0xff] }
 0x3aa   : > { %15297 = vst [vmem:[#allocation35_spill] sm:$0xff] %v14966_v8  ;;  %v14972_v6 = vpop.f32.mrf.mxu0 }
 0x3ab   : > { %v14970_v51 = vpop.f32.mrf.mxu1  ;;  %15300 = vst [vmem:[#allocation38_spill] sm:$0xff] %v14972_v6  ;;  %v7349_v6 = vadd.f32 %v14864_v46, %v6945_v60  ;;  %v7353_v28 = vadd.f32 %v14880_v41, %v6949_v23 }
 0x3ac   : > { %15299 = vst [vmem:[#allocation37_spill] sm:$0xff] %v14970_v51  ;;  %v14976_v48 = vpop.f32.mrf.mxu0 }
 0x3ad   : > { %v14974_v25 = vpop.f32.mrf.mxu1  ;;  %15302 = vst [vmem:[#allocation40_spill] sm:$0xff] %v14976_v48  ;;  %v6947_v48 = vadd.f32 %v14870_v13, %v14777_v33  ;;  %v6948_v33 = vadd.f32 %v14882_v38, %v14786_v7  ;;  %v7944_v13 = vld [vmem:[#allocation2] sm:$0xff] }
 0x3ae   : > { %15301 = vst [vmem:[#allocation39_spill] sm:$0xff] %v14974_v25  ;;  %v14980_v59 = vpop.f32.mrf.mxu0 }
 0x3af   : > { %v14978_v2 = vpop.f32.mrf.mxu1  ;;  %15304 = vst [vmem:[#allocation42_spill] sm:$0xff] %v14980_v59  ;;  %v7348_v59 = vadd.f32 %v14868_v36, %v6944_v30  ;;  %v7350_v36 = vadd.f32 %v14876_v3, %v6946_v44 }
 0x3b0   : > { %15303 = vst [vmem:[#allocation41_spill] sm:$0xff] %v14978_v2  ;;  %v14985_v32 = vpop.f32.mrf.mxu0 }
 0x3b1   : > { %v14983_v35 = vpop.f32.mrf.mxu1  ;;  %15306 = vst [vmem:[#allocation44_spill] sm:$0xff] %v14985_v32 }
 0x3b2   : > { %15305 = vst [vmem:[#allocation43_spill] sm:$0xff] %v14983_v35  ;;  %v14990_v51 = vpop.f32.mrf.mxu0 }
 0x3b3   : > { %v14988_v8 = vpop.f32.mrf.mxu1  ;;  %15308 = vst [vmem:[#allocation46_spill] sm:$0xff] %v14990_v51  ;;  %v7351_v51 = vadd.f32 %v14872_v52, %v6947_v48  ;;  %v7352_v48 = vadd.f32 %v14884_v55, %v6948_v33  ;;  %v7946_v52 = vld [vmem:[#allocation2 + $0x10] sm:$0xff] }
 0x3b4   : > { %15307 = vst [vmem:[#allocation45_spill] sm:$0xff] %v14988_v8  ;;  %v11226_v25 = vpop.f32.mrf.mxu0 }
 0x3b5   : > { %v11176_v2 = vpop.f32.mrf.mxu1 }
 0x3b6   : > { %v7631_v43 = vadd.f32 %v11176_v2, %v7349_v6  ;;  %v7753_v8 = vpop.f32.mrf.mxu0 }
 0x3b7   : > { %v7471_v32 = vpop.f32.mrf.mxu1 }
 0x3b8   : > { %v7913_v60 = vadd.f32 %v11226_v25, %v7631_v43  ;;  %v7630_v46 = vadd.f32 %v7471_v32, %v7348_v59  ;;  %v11229_v30 = vpop.f32.mrf.mxu0  ;;  %v6951_v25 = vadd.f32 %v14886_v49, %v14789_v45  ;;  %v6953_v45 = vadd.f32 %v14894_v58, %v14795_v12  ;;  %v7949_v49 = vld [vmem:[#allocation2 + $0x28] sm:$0xff] }
 0x3b9   : > { %v11179_v35 = vpop.f32.mrf.mxu1 }
 0x3ba   : > { %v7977_v19 = vadd.f32 %v7945_v42, %v7913_v60  ;;  %v7912_v6 = vadd.f32 %v7753_v8, %v7630_v46  ;;  %v7633_v2 = vadd.f32 %v11179_v35, %v7351_v51  ;;  %v7763_v63 = vpop.f32.mrf.mxu0  ;;  %v6950_v51 = vadd.f32 %v14890_v40, %v14792_v27  ;;  %v7948_v40 = vld [vmem:[#allocation2 + $0x20] sm:$0xff] }
 0x3bb   : > { %v7481_v16 = vpop.f32.mrf.mxu1  ;;  %v7355_v23 = vadd.f32 %v14888_v18, %v6951_v25  ;;  %v6952_v27 = vadd.f32 %v14898_v9, %v14798_v37  ;;  %v7357_v18 = vadd.f32 %v14896_v56, %v6953_v45  ;;  %v6954_v56 = vadd.f32 %v14906_v5, %v14804_v20  ;;  %v7952_v5 = vld [vmem:[#allocation2 + $0x40] sm:$0xff] }
 0x3bc   : > { %8010 = vst.msk [vmem:[#allocation2 + $0x8] sm:$0xff] %vm237_vm2, %v7977_v19  ;;  %v7976_v32 = vadd.f32 %v7944_v13, %v7912_v6  ;;  %v7915_v7 = vadd.f32 %v11229_v30, %v7633_v2  ;;  %v7632_v59 = vadd.f32 %v7481_v16, %v7350_v36  ;;  %v11232_v38 = vpop.f32.mrf.mxu0  ;;  %v7354_v33 = vadd.f32 %v14892_v10, %v6950_v51  ;;  %v7951_v30 = vld [vmem:[#allocation2 + $0x38] sm:$0xff] }
 0x3bd   : > { %v11182_v3 = vpop.f32.mrf.mxu1  ;;  %v6955_v6 = vadd.f32 %v14902_v62, %v14801_v34  ;;  %v7356_v10 = vadd.f32 %v14900_v14, %v6952_v27  ;;  %v6957_v34 = vadd.f32 %v14910_v29, %v14807_v11  ;;  %v7953_v62 = vld [vmem:[#allocation2 + $0x48] sm:$0xff]  ;;  %v6956_v20 = vadd.f32 %v14914_v15, %v14810_v17 }
 0x3be   : > { %8009 = vst.msk [vmem:[#allocation2] sm:$0xff] %vm237_vm2, %v7976_v32  ;;  %v7979_v8 = vadd.f32 %v7947_v53, %v7915_v7  ;;  %v7914_v35 = vadd.f32 %v7763_v63, %v7632_v59  ;;  %v7635_v41 = vadd.f32 %v11182_v3, %v7353_v28  ;;  %v7773_v43 = vpop.f32.mrf.mxu0  ;;  %v7950_v28 = vld [vmem:[#allocation2 + $0x30] sm:$0xff]  ;;  %v7358_v45 = vadd.f32 %v14908_v39, %v6954_v56  ;;  %v15311_v56 = vld [vmem:[#allocation19_spill] sm:$0xff] }
 0x3bf   : > { %v7491_v44 = vpop.f32.mrf.mxu1  ;;  %v7359_v14 = vadd.f32 %v14904_v54, %v6955_v6  ;;  %v7361_v54 = vadd.f32 %v14912_v26, %v6957_v34  ;;  %v6959_v17 = vadd.f32 %v14918_v4, %v14813_v61  ;;  %v7360_v39 = vadd.f32 %v14916_v22, %v6956_v20  ;;  %v7957_v4 = vld [vmem:[#allocation2 + $0x68] sm:$0xff]  ;;  %v7958_v34 = vld [vmem:[#allocation2 + $0x70] sm:$0xff] }
 0x3c0   : > { %8012 = vst.msk [vmem:[#allocation2 + $0x18] sm:$0xff] %vm237_vm2, %v7979_v8  ;;  %v7978_v55 = vadd.f32 %v7946_v52, %v7914_v35  ;;  %v7917_v42 = vadd.f32 %v11232_v38, %v7635_v41  ;;  %v7634_v60 = vadd.f32 %v7491_v44, %v7352_v48  ;;  %v11235_v63 = vpop.f32.mrf.mxu0  ;;  %v7955_v44 = vld [vmem:[#allocation2 + $0x58] sm:$0xff]  ;;  %v6958_v26 = vadd.f32 %v14922_v0, %v14816_v47  ;;  %v7956_v0 = vld [vmem:[#allocation2 + $0x60] sm:$0xff] }
 0x3c1   : > { %v11185_v46 = vpop.f32.mrf.mxu1  ;;  %v6961_v61 = vadd.f32 %v14926_v21, %v14819_v1  ;;  %v7363_v22 = vadd.f32 %v14920_v24, %v6959_v17  ;;  %v6960_v47 = vadd.f32 %v14930_v57, %v14822_v50  ;;  %v15309_v24 = vld [vmem:[#allocation17_spill] sm:$0xff]  ;;  %v15318_v17 = vld [vmem:[#allocation14_spill] sm:$0xff] }
 0x3c2   : > { %8011 = vst.msk [vmem:[#allocation2 + $0x10] sm:$0xff] %vm237_vm2, %v7978_v55  ;;  %v7981_v12 = vadd.f32 %v7949_v49, %v7917_v42  ;;  %v7916_v58 = vadd.f32 %v7773_v43, %v7634_v60  ;;  %v7637_v13 = vadd.f32 %v11185_v46, %v7355_v23  ;;  %v7783_v19 = vpop.f32.mrf.mxu0  ;;  %v7954_v60 = vld [vmem:[#allocation2 + $0x50] sm:$0xff] }
 0x3c3   : > { %v7501_v36 = vpop.f32.mrf.mxu1  ;;  %v8045_v41 = vld [vmem:[#allocation2 + $0x8] sm:$0xff] }
 0x3c4   : > { %8014 = vst.msk [vmem:[#allocation2 + $0x28] sm:$0xff] %vm237_vm2, %v7981_v12  ;;  %v7980_v37 = vadd.f32 %v7948_v40, %v7916_v58  ;;  %v7919_v9 = vadd.f32 %v11235_v63, %v7637_v13  ;;  %v7636_v2 = vadd.f32 %v7501_v36, %v7354_v33  ;;  %v11238_v16 = vpop.f32.mrf.mxu0 }
 0x3c5   : > { %v11188_v53 = vpop.f32.mrf.mxu1  ;;  %v8044_v25 = vld [vmem:[#allocation2] sm:$0xff] }
 0x3c6   : > { %8013 = vst.msk [vmem:[#allocation2 + $0x20] sm:$0xff] %vm237_vm2, %v7980_v37  ;;  %v7983_v32 = vadd.f32 %v7951_v30, %v7919_v9  ;;  %v7918_v7 = vadd.f32 %v7783_v19, %v7636_v2  ;;  %v7639_v59 = vadd.f32 %v11188_v53, %v7357_v18  ;;  %8076 = vxpose.xlu0.b32.start [1/16] (narrow) %v8044_v25, 8  ;;  %v7793_v52 = vpop.f32.mrf.mxu0  ;;  %v15310_v25 = vld [vmem:[#allocation7_spill] sm:$0xff] }
 0x3c7   : > { %v7511_v48 = vpop.f32.mrf.mxu1  ;;  %v8047_v37 = vld [vmem:[#allocation2 + $0x18] sm:$0xff]  ;;  %v7362_v9 = vadd.f32 %v14924_v31, %v6958_v26  ;;  %v6963_v50 = vadd.f32 %v15311_v56, %v15310_v25  ;;  %v15327_v25 = vld [vmem:[#allocation8_spill] sm:$0xff]  ;;  %v15328_v56 = vld [vmem:[#allocation31_spill] sm:$0xff] }
 0x3c8   : > { %8016 = vst.msk [vmem:[#allocation2 + $0x38] sm:$0xff] %vm237_vm2, %v7983_v32  ;;  %v7982_v3 = vadd.f32 %v7950_v28, %v7918_v7  ;;  %v7921_v38 = vadd.f32 %v11238_v16, %v7639_v59  ;;  %v7638_v51 = vadd.f32 %v7511_v48, %v7356_v10  ;;  %v11241_v35 = vpop.f32.mrf.mxu0  ;;  %v7365_v10 = vadd.f32 %v15309_v24, %v6961_v61  ;;  %v7959_v28 = vld [vmem:[#allocation2 + $0x78] sm:$0xff]  ;;  %v15326_v24 = vld [vmem:[#allocation29_spill] sm:$0xff] }
 0x3c9   : > { %v11191_v8 = vpop.f32.mrf.mxu1  ;;  %v8046_v46 = vld [vmem:[#allocation2 + $0x10] sm:$0xff]  ;;  %v15312_v31 = vld [vmem:[#allocation18_spill] sm:$0xff] }
 0x3ca   : > { %8015 = vst.msk [vmem:[#allocation2 + $0x30] sm:$0xff] %vm237_vm2, %v7982_v3  ;;  %v7985_v11 = vadd.f32 %v7953_v62, %v7921_v38  ;;  %v7920_v29 = vadd.f32 %v7793_v52, %v7638_v51  ;;  %v7641_v49 = vadd.f32 %v11191_v8, %v7359_v14  ;;  %8077 = vxpose.xlu0.b32.cont [2/16] (narrow) %v8045_v41, 8  ;;  %v7803_v23 = vpop.f32.mrf.mxu0  ;;  %v15313_v14 = vld [vmem:[#allocation4_spill] sm:$0xff]  ;;  %v15314_v3 = vld [vmem:[#allocation21_spill] sm:$0xff] }
 0x3cb   : > { %v7521_v43 = vpop.f32.mrf.mxu1  ;;  %v7364_v59 = vadd.f32 %v15312_v31, %v6960_v47  ;;  %v6962_v38 = vadd.f32 %v15314_v3, %v15313_v14  ;;  %v15315_v8 = vld [vmem:[#allocation9_spill] sm:$0xff]  ;;  %v15329_v31 = vld [vmem:[#allocation28_spill] sm:$0xff] }
 0x3cc   : > { %8018 = vst.msk [vmem:[#allocation2 + $0x48] sm:$0xff] %vm237_vm2, %v7985_v11  ;;  %v7984_v15 = vadd.f32 %v7952_v5, %v7920_v29  ;;  %v7923_v55 = vadd.f32 %v11241_v35, %v7641_v49  ;;  %v7640_v42 = vadd.f32 %v7521_v43, %v7358_v45  ;;  %v11244_v40 = vpop.f32.mrf.mxu0  ;;  %v15316_v35 = vld [vmem:[#allocation23_spill] sm:$0xff]  ;;  %v7961_v45 = vld [vmem:[#allocation2 + $0x88] sm:$0xff]  ;;  %v15331_v14 = vld [vmem:[#allocation33_spill] sm:$0xff] }
 0x3cd   : > { %v11194_v27 = vpop.f32.mrf.mxu1  ;;  %v8048_v52 = vld [vmem:[#allocation2 + $0x20] sm:$0xff]  ;;  %v6965_v41 = vadd.f32 %v15316_v35, %v15315_v8  ;;  %v15317_v49 = vld [vmem:[#allocation20_spill] sm:$0xff]  ;;  %v15332_v8 = vld [vmem:[#allocation30_spill] sm:$0xff] }
 0x3ce   : > { %8017 = vst.msk [vmem:[#allocation2 + $0x40] sm:$0xff] %vm237_vm2, %v7984_v15  ;;  %v7987_v63 = vadd.f32 %v7955_v44, %v7923_v55  ;;  %v7922_v33 = vadd.f32 %v7803_v23, %v7640_v42  ;;  %v7643_v12 = vadd.f32 %v11194_v27, %v7361_v54  ;;  %8078 = vxpose.xlu0.b32.cont [3/16] (narrow) %v8046_v46, 8  ;;  %v7813_v13 = vpop.f32.mrf.mxu0  ;;  %v15319_v15 = vld [vmem:[#allocation25_spill] sm:$0xff]  ;;  %v7960_v42 = vld [vmem:[#allocation2 + $0x80] sm:$0xff] }
 0x3cf   : > { %v7531_v58 = vpop.f32.mrf.mxu1  ;;  %v7367_v54 = vadd.f32 %v15317_v49, %v6963_v50  ;;  %v6964_v55 = vadd.f32 %v15319_v15, %v15318_v17  ;;  %v6969_v50 = vadd.f32 %v15328_v56, %v15327_v25  ;;  %v15335_v17 = vld [vmem:[#allocation35_spill] sm:$0xff] }
 0x3d0   : > { %8020 = vst.msk [vmem:[#allocation2 + $0x58] sm:$0xff] %vm237_vm2, %v7987_v63  ;;  %v7986_v18 = vadd.f32 %v7954_v60, %v7922_v33  ;;  %v7925_v30 = vadd.f32 %v11244_v40, %v7643_v12  ;;  %v7642_v36 = vadd.f32 %v7531_v58, %v7360_v39  ;;  %v11247_v6 = vpop.f32.mrf.mxu0  ;;  %v8049_v60 = vld [vmem:[#allocation2 + $0x28] sm:$0xff]  ;;  %v15320_v40 = vld [vmem:[#allocation22_spill] sm:$0xff]  ;;  %v7968_v25 = vld [vmem:[#allocation2 + $0xc0] sm:$0xff] }
 0x3d1   : > { %v11197_v19 = vpop.f32.mrf.mxu1  ;;  %v7366_v46 = vadd.f32 %v15320_v40, %v6962_v38  ;;  %v15321_v12 = vld [vmem:[#allocation24_spill] sm:$0xff]  ;;  %v7963_v58 = vld [vmem:[#allocation2 + $0x98] sm:$0xff]  ;;  %v15337_v40 = vld [vmem:[#allocation13_spill] sm:$0xff] }
 0x3d2   : > { %8019 = vst.msk [vmem:[#allocation2 + $0x50] sm:$0xff] %vm237_vm2, %v7986_v18  ;;  %v7989_v1 = vadd.f32 %v7957_v4, %v7925_v30  ;;  %v7924_v21 = vadd.f32 %v7813_v13, %v7642_v36  ;;  %v7645_v2 = vadd.f32 %v11197_v19, %v7363_v22  ;;  %8079 = vxpose.xlu0.b32.cont [4/16] (narrow) %v8047_v37, 8  ;;  %v7823_v16 = vpop.f32.mrf.mxu0  ;;  %v15322_v22 = vld [vmem:[#allocation5_spill] sm:$0xff]  ;;  %v15323_v18 = vld [vmem:[#allocation27_spill] sm:$0xff]  ;;  %v15324_v19 = vld [vmem:[#allocation26_spill] sm:$0xff] }
 0x3d3   : > { %v7541_v53 = vpop.f32.mrf.mxu1  ;;  %v7369_v61 = vadd.f32 %v15321_v12, %v6965_v41  ;;  %v6967_v30 = vadd.f32 %v15323_v18, %v15322_v22  ;;  %v15339_v18 = vld [vmem:[#allocation15_spill] sm:$0xff] }
 0x3d4   : > { %8022 = vst.msk [vmem:[#allocation2 + $0x68] sm:$0xff] %vm237_vm2, %v7989_v1  ;;  %v7988_v57 = vadd.f32 %v7956_v0, %v7924_v21  ;;  %v7927_v32 = vadd.f32 %v11247_v6, %v7645_v2  ;;  %v7644_v7 = vadd.f32 %v7541_v53, %v7362_v9  ;;  %v11250_v48 = vpop.f32.mrf.mxu0  ;;  %v7368_v6 = vadd.f32 %v15324_v19, %v6964_v55  ;;  %v7962_v9 = vld [vmem:[#allocation2 + $0x90] sm:$0xff]  ;;  %v15325_v2 = vld [vmem:[#allocation10_spill] sm:$0xff] }
 0x3d5   : > { %v11200_v62 = vpop.f32.mrf.mxu1  ;;  %v8050_v1 = vld [vmem:[#allocation2 + $0x30] sm:$0xff] }
 0x3d6   : > { %8021 = vst.msk [vmem:[#allocation2 + $0x60] sm:$0xff] %vm237_vm2, %v7988_v57  ;;  %v7991_v51 = vadd.f32 %v7959_v28, %v7927_v32  ;;  %v7926_v20 = vadd.f32 %v7823_v16, %v7644_v7  ;;  %v7647_v5 = vadd.f32 %v11200_v62, %v7365_v10  ;;  %8080 = vxpose.xlu0.b32.cont [5/16] (narrow) %v8048_v52, 8  ;;  %v7833_v29 = vpop.f32.mrf.mxu0  ;;  %v7965_v32 = vld [vmem:[#allocation2 + $0xa8] sm:$0xff]  ;;  %v15330_v52 = vld [vmem:[#allocation11_spill] sm:$0xff] }
 0x3d7   : > { %v7551_v11 = vpop.f32.mrf.mxu1  ;;  %v6966_v10 = vadd.f32 %v15326_v24, %v15325_v2  ;;  %v6968_v3 = vadd.f32 %v15331_v14, %v15330_v52  ;;  %v15342_v2 = vld [vmem:[#allocation38_spill] sm:$0xff]  ;;  %v15346_v14 = vld [vmem:[#allocation3_spill] sm:$0xff] }
 0x3d8   : > { %8024 = vst.msk [vmem:[#allocation2 + $0x78] sm:$0xff] %vm237_vm2, %v7991_v51  ;;  %v7990_v44 = vadd.f32 %v7958_v34, %v7926_v20  ;;  %v7929_v43 = vadd.f32 %v11250_v48, %v7647_v5  ;;  %v7646_v23 = vadd.f32 %v7551_v11, %v7364_v59  ;;  %v11253_v27 = vpop.f32.mrf.mxu0  ;;  %v7371_v59 = vadd.f32 %v15329_v31, %v6967_v30  ;;  %v7964_v51 = vld [vmem:[#allocation2 + $0xa0] sm:$0xff]  ;;  %v8051_v20 = vld [vmem:[#allocation2 + $0x38] sm:$0xff] }
 0x3d9   : > { %v11203_v39 = vpop.f32.mrf.mxu1  ;;  %v7370_v35 = vadd.f32 %v15332_v8, %v6966_v10  ;;  %v15340_v30 = vld [vmem:[#allocation39_spill] sm:$0xff]  ;;  %v15343_v10 = vld [vmem:[#allocation6_spill] sm:$0xff] }
 0x3da   : > { %8023 = vst.msk [vmem:[#allocation2 + $0x70] sm:$0xff] %vm237_vm2, %v7990_v44  ;;  %v7993_v26 = vadd.f32 %v7961_v45, %v7929_v43  ;;  %v7928_v63 = vadd.f32 %v7833_v29, %v7646_v23  ;;  %v7649_v33 = vadd.f32 %v11203_v39, %v7367_v54  ;;  %8081 = vxpose.xlu0.b32.cont [6/16] (narrow) %v8049_v60, 8  ;;  %v7843_v13 = vpop.f32.mrf.mxu0  ;;  %v15333_v29 = vld [vmem:[#allocation32_spill] sm:$0xff]  ;;  %v7967_v44 = vld [vmem:[#allocation2 + $0xb8] sm:$0xff] }
 0x3db   : > { %v7561_v4 = vpop.f32.mrf.mxu1  ;;  %v7373_v49 = vadd.f32 %v15333_v29, %v6969_v50  ;;  %v15334_v23 = vld [vmem:[#allocation12_spill] sm:$0xff]  ;;  %v15336_v60 = vld [vmem:[#allocation34_spill] sm:$0xff] }
 0x3dc   : > { %8026 = vst.msk [vmem:[#allocation2 + $0x88] sm:$0xff] %vm237_vm2, %v7993_v26  ;;  %v7992_v36 = vadd.f32 %v7960_v42, %v7928_v63  ;;  %v7648_v47 = vadd.f32 %v7561_v4, %v7366_v46  ;;  %v7931_v0 = vadd.f32 %v11253_v27, %v7649_v33  ;;  %v11256_v21 = vpop.f32.mrf.mxu0  ;;  %v6971_v15 = vadd.f32 %v15335_v17, %v15334_v23  ;;  %v15338_v46 = vld [vmem:[#allocation37_spill] sm:$0xff]  ;;  %v8053_v50 = vld [vmem:[#allocation2 + $0x48] sm:$0xff]  ;;  %v15348_v8 = vld [vmem:[#allocation42_spill] sm:$0xff] }
 0x3dd   : > { %v11206_v37 = vpop.f32.mrf.mxu1  ;;  %v7372_v27 = vadd.f32 %v15336_v60, %v6968_v3  ;;  %v6970_v26 = vadd.f32 %v15338_v46, %v15337_v40  ;;  %v7966_v33 = vld [vmem:[#allocation2 + $0xb0] sm:$0xff]  ;;  %v15347_v3 = vld [vmem:[#allocation43_spill] sm:$0xff]  ;;  %v15351_v60 = vld [vmem:[#allocation44_spill] sm:$0xff] }
 0x3de   : > { %8025 = vst.msk [vmem:[#allocation2 + $0x80] sm:$0xff] %vm237_vm2, %v7992_v36  ;;  %v7995_v28 = vadd.f32 %v7963_v58, %v7931_v0  ;;  %v7651_v53 = vadd.f32 %v11206_v37, %v7369_v61  ;;  %v7930_v16 = vadd.f32 %v7843_v13, %v7648_v47  ;;  %8082 = vxpose.xlu0.b32.cont [7/16] (narrow) %v8050_v1, 8  ;;  %v7853_v7 = vpop.f32.mrf.mxu0  ;;  %v8052_v61 = vld [vmem:[#allocation2 + $0x40] sm:$0xff]  ;;  %v7969_v0 = vld [vmem:[#allocation2 + $0xc8] sm:$0xff] }
 0x3df   : > { %v7571_v57 = vpop.f32.mrf.mxu1  ;;  %v6973_v36 = vadd.f32 %v15340_v30, %v15339_v18  ;;  %v7374_v24 = vadd.f32 %v15342_v2, %v6970_v26 }
 0x3e0   : > { %8028 = vst.msk [vmem:[#allocation2 + $0x98] sm:$0xff] %vm237_vm2, %v7995_v28  ;;  %v7994_v34 = vadd.f32 %v7962_v9, %v7930_v16  ;;  %v7650_v62 = vadd.f32 %v7571_v57, %v7368_v6  ;;  %v7933_v48 = vadd.f32 %v11256_v21, %v7651_v53  ;;  %v11259_v5 = vpop.f32.mrf.mxu0  ;;  %v15341_v6 = vld [vmem:[#allocation36_spill] sm:$0xff]  ;;  %v15344_v28 = vld [vmem:[#allocation41_spill] sm:$0xff] }
 0x3e1   : > { %v11209_v38 = vpop.f32.mrf.mxu1  ;;  %v7375_v37 = vadd.f32 %v15341_v6, %v6971_v15  ;;  %v6972_v53 = vadd.f32 %v15344_v28, %v15343_v10 }
 0x3e2   : > { %8027 = vst.msk [vmem:[#allocation2 + $0x90] sm:$0xff] %vm237_vm2, %v7994_v34  ;;  %v7997_v41 = vadd.f32 %v7965_v32, %v7933_v48  ;;  %v7653_v45 = vadd.f32 %v11209_v38, %v7371_v59  ;;  %v7932_v11 = vadd.f32 %v7853_v7, %v7650_v62  ;;  %8083 = vxpose.xlu0.b32.cont [8/16] (narrow) %v8051_v20, 8  ;;  %v7863_v43 = vpop.f32.mrf.mxu0  ;;  %v15345_v59 = vld [vmem:[#allocation40_spill] sm:$0xff]  ;;  %v7971_v48 = vld [vmem:[#allocation2 + $0xd8] sm:$0xff] }
 0x3e3   : > { %v7581_v54 = vpop.f32.mrf.mxu1  ;;  %v8061_v56 = vld [vmem:[#allocation2 + $0x88] sm:$0xff]  ;;  %v7377_v34 = vadd.f32 %v15345_v59, %v6973_v36  ;;  %v6975_v38 = vadd.f32 %v15347_v3, %v15346_v14 }
 0x3e4   : > { %8030 = vst.msk [vmem:[#allocation2 + $0xa8] sm:$0xff] %vm237_vm2, %v7997_v41  ;;  %v7996_v55 = vadd.f32 %v7964_v51, %v7932_v11  ;;  %v7652_v42 = vadd.f32 %v7581_v54, %v7370_v35  ;;  %v7935_v39 = vadd.f32 %v11259_v5, %v7653_v45  ;;  %v11262_v4 = vpop.f32.mrf.mxu0  ;;  %v7376_v35 = vadd.f32 %v15348_v8, %v6972_v53  ;;  %v15349_v41 = vld [vmem:[#allocation16_spill] sm:$0xff]  ;;  %v15350_v45 = vld [vmem:[#allocation45_spill] sm:$0xff] }
 0x3e5   : > { %v11212_v63 = vpop.f32.mrf.mxu1  ;;  %v8060_v12 = vld [vmem:[#allocation2 + $0x80] sm:$0xff]  ;;  %v6974_v11 = vadd.f32 %v15350_v45, %v15349_v41  ;;  %v8057_v53 = vld [vmem:[#allocation2 + $0x68] sm:$0xff] }
 0x3e6   : > { %8029 = vst.msk [vmem:[#allocation2 + $0xa0] sm:$0xff] %vm237_vm2, %v7996_v55  ;;  %v7999_v58 = vadd.f32 %v7967_v44, %v7935_v39  ;;  %v7655_v13 = vadd.f32 %v11212_v63, %v7373_v49  ;;  %v7934_v22 = vadd.f32 %v7863_v43, %v7652_v42  ;;  %8108 = vxpose.xlu1.b32.start [1/16] (narrow) %v8060_v12, 8  ;;  %v7873_v19 = vpop.f32.mrf.mxu0  ;;  %v7970_v49 = vld [vmem:[#allocation2 + $0xd0] sm:$0xff]  ;;  %v7973_v42 = vld [vmem:[#allocation2 + $0xe8] sm:$0xff]  ;;  %v15352_v63 = vld [vmem:[#allocation46_spill] sm:$0xff] }
 0x3e7   : > { %8084 = vxpose.xlu0.b32.cont [9/16] (narrow) %v8052_v61, 8  ;;  %v7591_v47 = vpop.f32.mrf.mxu1  ;;  %v8054_v44 = vld [vmem:[#allocation2 + $0x50] sm:$0xff]  ;;  %v7972_v61 = vld [vmem:[#allocation2 + $0xe0] sm:$0xff] }
 0x3e8   : > { %8032 = vst.msk [vmem:[#allocation2 + $0xb8] sm:$0xff] %vm237_vm2, %v7999_v58  ;;  %v7998_v9 = vadd.f32 %v7966_v33, %v7934_v22  ;;  %v7654_v1 = vadd.f32 %v7591_v47, %v7372_v27  ;;  %v7937_v21 = vadd.f32 %v11262_v4, %v7655_v13  ;;  %v11265_v57 = vpop.f32.mrf.mxu0  ;;  %v7379_v27 = vadd.f32 %v15351_v60, %v6975_v38  ;;  %v8063_v4 = vld [vmem:[#allocation2 + $0x98] sm:$0xff] }
 0x3e9   : > { %v11215_v16 = vpop.f32.mrf.mxu1  ;;  %v8062_v54 = vld [vmem:[#allocation2 + $0x90] sm:$0xff]  ;;  %v7378_v33 = vadd.f32 %v15352_v63, %v6974_v11  ;;  %v8055_v58 = vld [vmem:[#allocation2 + $0x58] sm:$0xff] }
 0x3ea   : > { %8031 = vst.msk [vmem:[#allocation2 + $0xb0] sm:$0xff] %vm237_vm2, %v7998_v9  ;;  %v8001_v32 = vadd.f32 %v7969_v0, %v7937_v21  ;;  %v7657_v7 = vadd.f32 %v11215_v16, %v7375_v37  ;;  %v7936_v31 = vadd.f32 %v7873_v19, %v7654_v1  ;;  %8109 = vxpose.xlu1.b32.cont [2/16] (narrow) %v8061_v56, 8  ;;  %v7883_v52 = vpop.f32.mrf.mxu0  ;;  %v7975_v47 = vld [vmem:[#allocation2 + $0xf8] sm:$0xff]  ;;  %v7974_v9 = vld [vmem:[#allocation2 + $0xf0] sm:$0xff]  ;;  %v8056_v21 = vld [vmem:[#allocation2 + $0x60] sm:$0xff] }
 0x3eb   : > { %8085 = vxpose.xlu0.b32.cont [10/16] (narrow) %v8053_v50, 8  ;;  %v7601_v62 = vpop.f32.mrf.mxu1  ;;  %v8065_v28 = vld [vmem:[#allocation2 + $0xa8] sm:$0xff]  ;;  %v8059_v50 = vld [vmem:[#allocation2 + $0x78] sm:$0xff] }
 0x3ec   : > { %8034 = vst.msk [vmem:[#allocation2 + $0xc8] sm:$0xff] %vm237_vm2, %v8001_v32  ;;  %v8000_v51 = vadd.f32 %v7968_v25, %v7936_v31  ;;  %v7656_v20 = vadd.f32 %v7601_v62, %v7374_v24  ;;  %v7939_v5 = vadd.f32 %v11265_v57, %v7657_v7  ;;  %v11268_v43 = vpop.f32.mrf.mxu0  ;;  %v8058_v25 = vld [vmem:[#allocation2 + $0x70] sm:$0xff] }
 0x3ed   : > { %v11218_v29 = vpop.f32.mrf.mxu1  ;;  %v8064_v1 = vld [vmem:[#allocation2 + $0xa0] sm:$0xff] }
 0x3ee   : > { %8033 = vst.msk [vmem:[#allocation2 + $0xc0] sm:$0xff] %vm237_vm2, %v8000_v51  ;;  %v8003_v23 = vadd.f32 %v7971_v48, %v7939_v5  ;;  %v7659_v17 = vadd.f32 %v11218_v29, %v7377_v34  ;;  %v7938_v15 = vadd.f32 %v7883_v52, %v7656_v20  ;;  %8110 = vxpose.xlu1.b32.cont [3/16] (narrow) %v8062_v54, 8  ;;  %v7893_v39 = vpop.f32.mrf.mxu0 }
 0x3ef   : > { %8086 = vxpose.xlu0.b32.cont [11/16] (narrow) %v8054_v44, 8  ;;  %v7611_v55 = vpop.f32.mrf.mxu1  ;;  %v8067_v56 = vld [vmem:[#allocation2 + $0xb8] sm:$0xff] }
 0x3f0   : > { %8036 = vst.msk [vmem:[#allocation2 + $0xd8] sm:$0xff] %vm237_vm2, %v8003_v23  ;;  %v8002_v40 = vadd.f32 %v7970_v49, %v7938_v15  ;;  %v7658_v46 = vadd.f32 %v7611_v55, %v7376_v35  ;;  %v7941_v26 = vadd.f32 %v11268_v43, %v7659_v17  ;;  %v11271_v13 = vpop.f32.mrf.mxu0 }
 0x3f1   : > { %v11221_v12 = vpop.f32.mrf.mxu1  ;;  %v8066_v16 = vld [vmem:[#allocation2 + $0xb0] sm:$0xff] }
 0x3f2   : > { %8035 = vst.msk [vmem:[#allocation2 + $0xd0] sm:$0xff] %vm237_vm2, %v8002_v40  ;;  %v8005_v22 = vadd.f32 %v7973_v42, %v7941_v26  ;;  %v7661_v18 = vadd.f32 %v11221_v12, %v7379_v27  ;;  %v7940_v30 = vadd.f32 %v7893_v39, %v7658_v46  ;;  %8111 = vxpose.xlu1.b32.cont [4/16] (narrow) %v8063_v4, 8  ;;  %v7903_v0 = vpop.f32.mrf.mxu0 }
 0x3f3   : > { %8087 = vxpose.xlu0.b32.cont [12/16] (narrow) %v8055_v58, 8  ;;  %v7621_v36 = vpop.f32.mrf.mxu1  ;;  %v8069_v32 = vld [vmem:[#allocation2 + $0xc8] sm:$0xff] }
 0x3f4   : > { %8038 = vst.msk [vmem:[#allocation2 + $0xe8] sm:$0xff] %vm237_vm2, %v8005_v22  ;;  %v8004_v19 = vadd.f32 %v7972_v61, %v7940_v30  ;;  %v7660_v6 = vadd.f32 %v7621_v36, %v7378_v33  ;;  %v7943_v37 = vadd.f32 %v11271_v13, %v7661_v18 }
 0x3f5   : > { %v8068_v57 = vld [vmem:[#allocation2 + $0xc0] sm:$0xff] }
 0x3f6   : > { %8037 = vst.msk [vmem:[#allocation2 + $0xe0] sm:$0xff] %vm237_vm2, %v8004_v19  ;;  %v8007_v2 = vadd.f32 %v7975_v47, %v7943_v37  ;;  %v7942_v24 = vadd.f32 %v7903_v0, %v7660_v6  ;;  %8112 = vxpose.xlu1.b32.cont [5/16] (narrow) %v8064_v1, 8 }
 0x3f7   : > { %8088 = vxpose.xlu0.b32.cont [13/16] (narrow) %v8056_v21, 8  ;;  %v8071_v31 = vld [vmem:[#allocation2 + $0xd8] sm:$0xff] }
 0x3f8   : > { %8040 = vst.msk [vmem:[#allocation2 + $0xf8] sm:$0xff] %vm237_vm2, %v8007_v2  ;;  %v8006_v10 = vadd.f32 %v7974_v9, %v7942_v24 }
 0x3f9   : > { %v8070_v7 = vld [vmem:[#allocation2 + $0xd0] sm:$0xff] }
 0x3fa   : > { %8039 = vst.msk [vmem:[#allocation2 + $0xf0] sm:$0xff] %vm237_vm2, %v8006_v10  ;;  %8113 = vxpose.xlu1.b32.cont [6/16] (narrow) %v8065_v28, 8 }
 0x3fb   : > { %8089 = vxpose.xlu0.b32.cont [14/16] (narrow) %v8057_v53, 8  ;;  %v8073_v34 = vld [vmem:[#allocation2 + $0xe8] sm:$0xff] }
 0x3fd   : > { %v8072_v59 = vld [vmem:[#allocation2 + $0xe0] sm:$0xff] }
 0x3fe   : > { %8114 = vxpose.xlu1.b32.cont [7/16] (narrow) %v8066_v16, 8 }
 0x3ff   : > { %8090 = vxpose.xlu0.b32.cont [15/16] (narrow) %v8058_v25, 8  ;;  %v8075_v48 = vld [vmem:[#allocation2 + $0xf8] sm:$0xff] }
 0x401   : > { %v8074_v62 = vld [vmem:[#allocation2 + $0xf0] sm:$0xff] }
 0x402   : > { %8115 = vxpose.xlu1.b32.cont [8/16] (narrow) %v8067_v56, 8 }
 0x403   : > { %8091 = vxpose.xlu0.b32.end [16/16] (narrow) %v8059_v50, 8 }
 0x406   : > { %8116 = vxpose.xlu1.b32.cont [9/16] (narrow) %v8068_v57, 8 }
 0x40a   : > { %8117 = vxpose.xlu1.b32.cont [10/16] (narrow) %v8069_v32, 8 }
 0x40e   : > { %8118 = vxpose.xlu1.b32.cont [11/16] (narrow) %v8070_v7, 8 }
 0x412   : > { %8119 = vxpose.xlu1.b32.cont [12/16] (narrow) %v8071_v31, 8 }
 0x416   : > { %8120 = vxpose.xlu1.b32.cont [13/16] (narrow) %v8072_v59, 8 }
 0x41a   : > { %8121 = vxpose.xlu1.b32.cont [14/16] (narrow) %v8073_v34, 8 }
 0x41e   : > { %8122 = vxpose.xlu1.b32.cont [15/16] (narrow) %v8074_v62, 8 }
 0x422   : > { %8123 = vxpose.xlu1.b32.end [16/16] (narrow) %v8075_v48, 8 }
 0x443   : > { %v8092_v52 = vpop.trf.xlu0 }
 0x444   : > { %8140 = vst [vmem:[%s224_s30] sm:$0xff] %v8092_v52 }
 0x462   : > { %v8124_v14 = vpop.trf.xlu1 }
 0x463   : > { %8141 = vst [vmem:[%s224_s30 + $0x8] sm:$0xff] %v8124_v14 }
 0x464 PF: > { %s13_s14 = sadd.s32 1, %s11343_s14   ;;  %s15353_s12 = smov %s11339_s13 }
 0x465   : > { %p10_p5 = scmp.ge.s32.totalorder %s13_s14, 4   ;;  %s15354_s13 = smov %s15356_s15 }
 0x467   :  { %12 = sbr.rel (!%p10_p5) target bundleno = 2 (0x2), region = 95 }

</bundles_post_ra>
